<compile_context>
chip_gen: v7x
topology: tpu7x:2x2x1
jax: 0.10.0
libtpu: 0.0.40
codegen_flags: <defaults>
</compile_context>

<pallas_src>
import math
from functools import partial

import jax
import jax.numpy as jnp
from jax import lax
from jax.experimental import pallas as pl
from jax.experimental.pallas import tpu as pltpu

# ----------------------- LIF constants (norse LIFParameters) -----------------------
DT = 1e-3
TAU_MEM_INV = 1.0 / 0.25      # module sets tau_mem = 0.25
TAU_SYN_INV = 200.0           # norse default 1 / 5e-3
V_LEAK = 0.0
V_TH = 0.1
V_RESET = 0.0
LN_EPS = 1e-5

MXU_DTYPE = jnp.bfloat16      # MXU input precision (f32 accumulation everywhere)


def _layer_norm(h, g, b):
    mean = jnp.mean(h, axis=-1, keepdims=True)
    d = h - mean
    var = jnp.mean(d * d, axis=-1, keepdims=True)
    return d * lax.rsqrt(var + LN_EPS) * g + b


def _mm(a_f32, w_bf16):
    # bf16 MXU inputs (weights already bf16), f32 accumulation.
    return jnp.dot(a_f32.astype(MXU_DTYPE), w_bf16, preferred_element_type=jnp.float32)


# ========================= Single fused forward kernel =========================
def fused_forward_kernel(x_ref, w_in_ref, w_res_ref, w_ro_ref, b_ro_ref,
                         wqkv_ref, bqkv_ref, wo_ref, bo_ref,
                         g1_ref, be1_ref, wf1_ref, bf1_ref, wf2_ref, bf2_ref,
                         g2_ref, be2_ref,
                         o_ref, zbuf_ref, *, T, nhead, num_layers):
    # One batch (one full sequence) per grid step.
    #   x_ref: (T, I)   w_in: (I, R) f32   w_res: (R, R) f32   w_ro: (R, D) bf16
    #   stacked per-layer weights: leading L axis
    #   o_ref: (T, D) f32   zbuf (VMEM scratch): (T, R) f32
    R = w_res_ref.shape[0]
    D = o_ref.shape[-1]
    hd = D // nhead
    scale = 1.0 / math.sqrt(hd)

    # ---------- LIF reservoir scan (state reset per batch, like the reference) ----------
    # Input projection hoisted out of the serial time loop: one (T, I) @ (I, R) matmul.
    inp_all = jnp.dot(x_ref[...], w_in_ref[...],
                      preferred_element_type=jnp.float32)           # (T, R) f32
    w_res = w_res_ref[...]

    v = jnp.zeros((1, R), jnp.float32)
    cur = jnp.zeros((1, R), jnp.float32)
    z = jnp.zeros((1, R), jnp.float32)

    # Statically unrolled scan (T small & known) so the LLO scheduler can co-issue.
    # Recurrent/LIF math stays f32 so spike patterns match the f32 reference exactly.
    for t in range(T):
        total = inp_all[t:t + 1, :] + jnp.dot(z, w_res,
                                              preferred_element_type=jnp.float32)
        # norse lif_step
        v_dec = v + DT * TAU_MEM_INV * ((V_LEAK - v) + cur)
        i_dec = cur * (1.0 - DT * TAU_SYN_INV)
        z = (v_dec > V_TH).astype(jnp.float32)
        v = (1.0 - z) * v_dec + z * V_RESET
        cur = i_dec + total
        zbuf_ref[pl.ds(t, 1), :] = z          # spikes staged in VMEM, never hit HBM

    # ---------- fused readout linear: (T, R) @ (R, D) + bias (spikes exact in bf16) ----------
    h = _mm(zbuf_ref[...], w_ro_ref[...]) + b_ro_ref[...]           # (T, D) f32

    # ---------- transformer encoder layers, fully fused in-kernel ----------
    for l in range(num_layers):
        qkv = _mm(h, wqkv_ref[l]) + bqkv_ref[l]                     # (T, 3D) f32
        qkv_b = qkv.astype(MXU_DTYPE)        # cast once; slice bf16 views per head below

        heads = []
        for hh in range(nhead):
            qh = qkv_b[:, hh * hd:(hh + 1) * hd]
            kh = qkv_b[:, D + hh * hd:D + (hh + 1) * hd]
            vh = qkv_b[:, 2 * D + hh * hd:2 * D + (hh + 1) * hd]
            s = lax.dot_general(qh, kh, (((1,), (1,)), ((), ())),
                                preferred_element_type=jnp.float32) * scale   # (T, T)
            s = s - jnp.max(s, axis=-1, keepdims=True)
            p = jnp.exp(s)                                          # f32 softmax (VPU/EUP)
            p = p * pl.reciprocal(jnp.sum(p, axis=-1, keepdims=True), approx=True)
            heads.append(jnp.dot(p.astype(MXU_DTYPE), vh,
                                 preferred_element_type=jnp.float32))
        attn = jnp.concatenate(heads, axis=-1)                      # (T, D)
        attn = _mm(attn, wo_ref[l]) + bo_ref[l]                     # out projection

        h1 = _layer_norm(h + attn, g1_ref[l], be1_ref[l])           # post-LN: LN(x + attn)

        ff = jnp.maximum(_mm(h1, wf1_ref[l]) + bf1_ref[l], 0.0)
        ff = _mm(ff, wf2_ref[l]) + bf2_ref[l]
        h = _layer_norm(h1 + ff, g2_ref[l], be2_ref[l])             # LN(h1 + ff)
        # TODO(synk): dropout omitted (eval-mode / deterministic forward).

    o_ref[...] = h


# ========================= Wrapper =========================
def lsm_transformer_forward(x, params, nhead):
    B, T, I = x.shape
    w_in = params["input_weights"]          # (I, R)  f32
    w_res = params["reservoir_weights"]     # (R, R)  f32
    w_ro = params["readout_w"]              # (R, D)  bf16
    b_ro = params["readout_b"]              # (1, D)  f32
    R = w_res.shape[0]
    D = w_ro.shape[1]
    L = params["wqkv"].shape[0]

    x2d = x.reshape(B * T, I)
    c2 = lambda b: (0, 0)
    c3 = lambda b: (0, 0, 0)

    # Advisory cost estimate (tiny) so XLA doesn't over-serialize around the call.
    flops = B * (2 * T * I * R + 2 * T * R * R + 2 * T * R * D
                 + L * (2 * T * D * 3 * D + 4 * T * T * D + 2 * T * D * D
                        + 4 * T * D * 4 * D))
    trans = B * L * (nhead * T * T + T)
    weight_list = [w_in, w_res, w_ro, b_ro,
                   params["wqkv"], params["bqkv"], params["wo"], params["bo"],
                   params["ln1_g"], params["ln1_b"],
                   params["wf1"], params["bf1"], params["wf2"], params["bf2"],
                   params["ln2_g"], params["ln2_b"]]
    bytes_accessed = (x2d.size * 4 + B * T * D * 4
                      + sum(int(w.size) * w.dtype.itemsize for w in weight_list))

    out = pl.pallas_call(
        partial(fused_forward_kernel, T=T, nhead=nhead, num_layers=L),
        out_shape=jax.ShapeDtypeStruct((B * T, D), jnp.float32),
        grid=(B,),
        in_specs=[
            pl.BlockSpec((T, I), lambda b: (b, 0)),          # per-batch input rows
            pl.BlockSpec((I, R), c2),
            pl.BlockSpec((R, R), c2),
            pl.BlockSpec((R, D), c2),
            pl.BlockSpec((1, D), c2),
            pl.BlockSpec((L, D, 3 * D), c3),                 # wqkv (stacked over layers)
            pl.BlockSpec((L, 1, 3 * D), c3),                 # bqkv
            pl.BlockSpec((L, D, D), c3),                     # wo
            pl.BlockSpec((L, 1, D), c3),                     # bo
            pl.BlockSpec((L, 1, D), c3),                     # ln1_g
            pl.BlockSpec((L, 1, D), c3),                     # ln1_b
            pl.BlockSpec((L, D, 4 * D), c3),                 # wf1
            pl.BlockSpec((L, 1, 4 * D), c3),                 # bf1
            pl.BlockSpec((L, 4 * D, D), c3),                 # wf2
            pl.BlockSpec((L, 1, D), c3),                     # bf2
            pl.BlockSpec((L, 1, D), c3),                     # ln2_g
            pl.BlockSpec((L, 1, D), c3),                     # ln2_b
        ],
        out_specs=pl.BlockSpec((T, D), lambda b: (b, 0)),
        scratch_shapes=[pltpu.VMEM((T, R), jnp.float32)],    # spike buffer, VMEM-only
        compiler_params=pltpu.CompilerParams(dimension_semantics=("parallel",)),
        cost_estimate=pl.CostEstimate(flops=int(flops), transcendentals=int(trans),
                                      bytes_accessed=int(bytes_accessed)),
    )(x2d, w_in, w_res, w_ro, b_ro,
      params["wqkv"], params["bqkv"], params["wo"], params["bo"],
      params["ln1_g"], params["ln1_b"],
      params["wf1"], params["bf1"], params["wf2"], params["bf2"],
      params["ln2_g"], params["ln2_b"])
    return out.reshape(B, T, D)


# ========================= Deterministic parameter init =========================
def init_params(key, input_size, reservoir_size, transformer_dim, nhead, num_layers,
                connectivity=0.2):
    R, D = reservoir_size, transformer_dim
    # Pad reservoir to 128 lanes; padded neurons have zero in/rec/readout weights ->
    # zero current -> never spike -> identical semantics to the un-padded reference.
    R_pad = ((R + 127) // 128) * 128
    keys = iter(jax.random.split(key, 8 * num_layers + 8))

    # scipy.sparse.random(density=connectivity) analogue
    mask = (jax.random.uniform(next(keys), (R, R)) < connectivity).astype(jnp.float32)
    vals = jax.random.uniform(next(keys), (R, R))
    reservoir_weights = jnp.zeros((R_pad, R_pad), jnp.float32).at[:R, :R].set(mask * vals)

    w_in = jax.random.normal(next(keys), (input_size, R)) * 0.1
    input_weights = jnp.zeros((input_size, R_pad), jnp.float32).at[:, :R].set(w_in)

    bound = 1.0 / math.sqrt(R)
    ro_w = jax.random.uniform(next(keys), (R, D), minval=-bound, maxval=bound)
    # Readout weight pre-cast to bf16 once at init (spikes are exact 0/1 in bf16).
    readout_w = jnp.zeros((R_pad, D), jnp.float32).at[:R, :].set(ro_w).astype(jnp.bfloat16)
    readout_b = jax.random.uniform(next(keys), (1, D),
                                   minval=-bound, maxval=bound).astype(jnp.float32)

    def make_layer(k):
        ks = jax.random.split(k, 4)
        return dict(
            # linear weights stored pre-transposed (in_features, out_features), bf16 at init
            wqkv=(jax.random.normal(ks[0], (D, 3 * D)) * 0.05).astype(jnp.bfloat16),
            bqkv=jnp.zeros((1, 3 * D), jnp.float32),
            wo=(jax.random.normal(ks[1], (D, D)) * 0.05).astype(jnp.bfloat16),
            bo=jnp.zeros((1, D), jnp.float32),
            wf1=(jax.random.normal(ks[2], (D, 4 * D)) * 0.05).astype(jnp.bfloat16),
            bf1=jnp.zeros((1, 4 * D), jnp.float32),
            wf2=(jax.random.normal(ks[3], (4 * D, D)) * 0.05).astype(jnp.bfloat16),
            bf2=jnp.zeros((1, D), jnp.float32),
            ln1_g=jnp.ones((1, D), jnp.float32),
            ln1_b=jnp.zeros((1, D), jnp.float32),
            ln2_g=jnp.ones((1, D), jnp.float32),
            ln2_b=jnp.zeros((1, D), jnp.float32),
        )

    layer_dicts = [make_layer(next(keys)) for _ in range(num_layers)]
    # Stack every per-layer tensor along a leading L axis for the fused kernel.
    stacked = {k: jnp.stack([ld[k] for ld in layer_dicts], axis=0)
               for k in layer_dicts[0]}

    return {
        "reservoir_weights": reservoir_weights,
        "input_weights": input_weights,
        "readout_w": readout_w,
        "readout_b": readout_b,
        **stacked,
    }


# ========================= Main =========================
if __name__ == "__main__":
    # small, TPU-friendly shapes consistent with the module's forward
    B, T = 2, 8
    INPUT_SIZE = 4
    RESERVOIR_SIZE = 100     # module default; padded internally to 128 lanes (inert neurons)
    TRANSFORMER_DIM = 64
    NHEAD = 4
    NUM_LAYERS = 2

    key = jax.random.PRNGKey(0)
    k_x, k_p = jax.random.split(key)
    x = jax.random.normal(k_x, (B, T, INPUT_SIZE), dtype=jnp.float32)
    params = init_params(k_p, INPUT_SIZE, RESERVOIR_SIZE, TRANSFORMER_DIM, NHEAD, NUM_LAYERS)

    forward = jax.jit(lsm_transformer_forward, static_argnums=(2,))
    out = forward(x, params, NHEAD)
    out = jax.block_until_ready(out)
    assert out.shape == (B, T, TRANSFORMER_DIM)
    assert bool(jnp.all(jnp.isfinite(out)))
    print("KERNEL_OK")
</pallas_src>

<mosaic_0001>
module attributes {stable_mosaic.version = 11 : i64} {
  func.func @fused_forward_kernel(%arg0: i32, %arg1: memref<8x4xf32, #tpu.memory_space<vmem>>, %arg2: memref<4x128xf32, #tpu.memory_space<vmem>>, %arg3: memref<128x128xf32, #tpu.memory_space<vmem>>, %arg4: memref<128x64xbf16, #tpu.memory_space<vmem>>, %arg5: memref<1x64xf32, #tpu.memory_space<vmem>>, %arg6: memref<2x64x192xbf16, #tpu.memory_space<vmem>>, %arg7: memref<2x1x192xf32, #tpu.memory_space<vmem>>, %arg8: memref<2x64x64xbf16, #tpu.memory_space<vmem>>, %arg9: memref<2x1x64xf32, #tpu.memory_space<vmem>>, %arg10: memref<2x1x64xf32, #tpu.memory_space<vmem>>, %arg11: memref<2x1x64xf32, #tpu.memory_space<vmem>>, %arg12: memref<2x64x256xbf16, #tpu.memory_space<vmem>>, %arg13: memref<2x1x256xf32, #tpu.memory_space<vmem>>, %arg14: memref<2x256x64xbf16, #tpu.memory_space<vmem>>, %arg15: memref<2x1x64xf32, #tpu.memory_space<vmem>>, %arg16: memref<2x1x64xf32, #tpu.memory_space<vmem>>, %arg17: memref<2x1x64xf32, #tpu.memory_space<vmem>>, %arg18: memref<8x64xf32, #tpu.memory_space<vmem>>, %arg19: memref<8x128xf32, #tpu.memory_space<vmem>>) attributes {dimension_semantics = [#tpu.dimension_semantics<parallel>], iteration_bounds = array<i64: 2>, scalar_prefetch = 0 : i64, scratch_operands = 1 : i64, tpu.core_type = #tpu.core_type<tc>, window_params = [{transform_indices = @transform_0, window_bounds = array<i64: 8, 4>}, {pipeline_mode = #tpu.pipeline_mode<synchronous>, transform_indices = @transform_1, window_bounds = array<i64: 4, 128>}, {pipeline_mode = #tpu.pipeline_mode<synchronous>, transform_indices = @transform_2, window_bounds = array<i64: 128, 128>}, {pipeline_mode = #tpu.pipeline_mode<synchronous>, transform_indices = @transform_3, window_bounds = array<i64: 128, 64>}, {pipeline_mode = #tpu.pipeline_mode<synchronous>, transform_indices = @transform_4, window_bounds = array<i64: 1, 64>}, {pipeline_mode = #tpu.pipeline_mode<synchronous>, transform_indices = @transform_5, window_bounds = array<i64: 2, 64, 192>}, {pipeline_mode = #tpu.pipeline_mode<synchronous>, transform_indices = @transform_6, window_bounds = array<i64: 2, 1, 192>}, {pipeline_mode = #tpu.pipeline_mode<synchronous>, transform_indices = @transform_7, window_bounds = array<i64: 2, 64, 64>}, {pipeline_mode = #tpu.pipeline_mode<synchronous>, transform_indices = @transform_8, window_bounds = array<i64: 2, 1, 64>}, {pipeline_mode = #tpu.pipeline_mode<synchronous>, transform_indices = @transform_9, window_bounds = array<i64: 2, 1, 64>}, {pipeline_mode = #tpu.pipeline_mode<synchronous>, transform_indices = @transform_10, window_bounds = array<i64: 2, 1, 64>}, {pipeline_mode = #tpu.pipeline_mode<synchronous>, transform_indices = @transform_11, window_bounds = array<i64: 2, 64, 256>}, {pipeline_mode = #tpu.pipeline_mode<synchronous>, transform_indices = @transform_12, window_bounds = array<i64: 2, 1, 256>}, {pipeline_mode = #tpu.pipeline_mode<synchronous>, transform_indices = @transform_13, window_bounds = array<i64: 2, 256, 64>}, {pipeline_mode = #tpu.pipeline_mode<synchronous>, transform_indices = @transform_14, window_bounds = array<i64: 2, 1, 64>}, {pipeline_mode = #tpu.pipeline_mode<synchronous>, transform_indices = @transform_15, window_bounds = array<i64: 2, 1, 64>}, {pipeline_mode = #tpu.pipeline_mode<synchronous>, transform_indices = @transform_16, window_bounds = array<i64: 2, 1, 64>}, {transform_indices = @transform_17, window_bounds = array<i64: 8, 64>}]} {
    %c0 = arith.constant 0 : index
    %c0_0 = arith.constant 0 : index
    %0 = vector.load %arg1[%c0, %c0_0] : memref<8x4xf32, #tpu.memory_space<vmem>>, vector<8x4xf32>
    %c0_1 = arith.constant 0 : index
    %c0_2 = arith.constant 0 : index
    %1 = vector.load %arg2[%c0_1, %c0_2] : memref<4x128xf32, #tpu.memory_space<vmem>>, vector<4x128xf32>
    %cst = arith.constant dense<0.000000e+00> : vector<8x128xf32>
    %2 = tpu.matmul %0, %1, %cst {dimension_numbers = #tpu.dot_dimension_numbers<[1], [0], [0], [1], [0, 0, 1, 1], [], []>} : vector<8x4xf32>, vector<4x128xf32>, vector<8x128xf32> -> vector<8x128xf32>
    %c0_3 = arith.constant 0 : index
    %c0_4 = arith.constant 0 : index
    %3 = vector.load %arg3[%c0_3, %c0_4] : memref<128x128xf32, #tpu.memory_space<vmem>>, vector<128x128xf32>
    %cst_5 = arith.constant 0.000000e+00 : f32
    %4 = vector.broadcast %cst_5 : f32 to vector<1x128xf32>
    %cst_6 = arith.constant 0.000000e+00 : f32
    %5 = vector.broadcast %cst_6 : f32 to vector<1x128xf32>
    %cst_7 = arith.constant 0.000000e+00 : f32
    %6 = vector.broadcast %cst_7 : f32 to vector<1x128xf32>
    %7 = vector.extract_strided_slice %2 {offsets = [0, 0], sizes = [1, 128], strides = [1, 1]} : vector<8x128xf32> to vector<1x128xf32>
    %cst_8 = arith.constant dense<0.000000e+00> : vector<1x128xf32>
    %8 = tpu.matmul %6, %3, %cst_8 {dimension_numbers = #tpu.dot_dimension_numbers<[1], [0], [0], [1], [0, 0, 1, 1], [], []>} : vector<1x128xf32>, vector<128x128xf32>, vector<1x128xf32> -> vector<1x128xf32>
    %9 = arith.addf %7, %8 : vector<1x128xf32>
    %cst_9 = arith.constant 0.000000e+00 : f32
    %10 = vector.broadcast %cst_9 : f32 to vector<1x128xf32>
    %11 = arith.subf %10, %4 : vector<1x128xf32>
    %12 = arith.addf %11, %5 : vector<1x128xf32>
    %cst_10 = arith.constant 4.000000e-03 : f32
    %13 = vector.broadcast %cst_10 : f32 to vector<1x128xf32>
    %14 = arith.mulf %13, %12 : vector<1x128xf32>
    %15 = arith.addf %4, %14 : vector<1x128xf32>
    %cst_11 = arith.constant 8.000000e-01 : f32
    %16 = vector.broadcast %cst_11 : f32 to vector<1x128xf32>
    %17 = arith.mulf %5, %16 : vector<1x128xf32>
    %cst_12 = arith.constant 1.000000e-01 : f32
    %18 = vector.broadcast %cst_12 : f32 to vector<1x128xf32>
    %19 = arith.cmpf ogt, %15, %18 : vector<1x128xf32>
    %20 = arith.extui %19 : vector<1x128xi1> to vector<1x128xi32>
    %21 = arith.sitofp %20 : vector<1x128xi32> to vector<1x128xf32>
    %cst_13 = arith.constant 1.000000e+00 : f32
    %22 = vector.broadcast %cst_13 : f32 to vector<1x128xf32>
    %23 = arith.subf %22, %21 : vector<1x128xf32>
    %24 = arith.mulf %23, %15 : vector<1x128xf32>
    %cst_14 = arith.constant 0.000000e+00 : f32
    %25 = vector.broadcast %cst_14 : f32 to vector<1x128xf32>
    %26 = arith.mulf %21, %25 : vector<1x128xf32>
    %27 = arith.addf %24, %26 : vector<1x128xf32>
    %28 = arith.addf %17, %9 : vector<1x128xf32>
    %c0_15 = arith.constant 0 : index
    %c0_16 = arith.constant 0 : index
    %29 = vector.load %arg19[%c0_15, %c0_16] : memref<8x128xf32, #tpu.memory_space<vmem>>, vector<1x128xf32>
    tpu.vector_store %arg19[%c0_15, %c0_16], %21 {strides = array<i32>} : memref<8x128xf32, #tpu.memory_space<vmem>>, vector<1x128xf32>,
    %30 = vector.extract_strided_slice %2 {offsets = [1, 0], sizes = [1, 128], strides = [1, 1]} : vector<8x128xf32> to vector<1x128xf32>
    %cst_17 = arith.constant dense<0.000000e+00> : vector<1x128xf32>
    %31 = tpu.matmul %21, %3, %cst_17 {dimension_numbers = #tpu.dot_dimension_numbers<[1], [0], [0], [1], [0, 0, 1, 1], [], []>} : vector<1x128xf32>, vector<128x128xf32>, vector<1x128xf32> -> vector<1x128xf32>
    %32 = arith.addf %30, %31 : vector<1x128xf32>
    %cst_18 = arith.constant 0.000000e+00 : f32
    %33 = vector.broadcast %cst_18 : f32 to vector<1x128xf32>
    %34 = arith.subf %33, %27 : vector<1x128xf32>
    %35 = arith.addf %34, %28 : vector<1x128xf32>
    %cst_19 = arith.constant 4.000000e-03 : f32
    %36 = vector.broadcast %cst_19 : f32 to vector<1x128xf32>
    %37 = arith.mulf %36, %35 : vector<1x128xf32>
    %38 = arith.addf %27, %37 : vector<1x128xf32>
    %cst_20 = arith.constant 8.000000e-01 : f32
    %39 = vector.broadcast %cst_20 : f32 to vector<1x128xf32>
    %40 = arith.mulf %28, %39 : vector<1x128xf32>
    %cst_21 = arith.constant 1.000000e-01 : f32
    %41 = vector.broadcast %cst_21 : f32 to vector<1x128xf32>
    %42 = arith.cmpf ogt, %38, %41 : vector<1x128xf32>
    %43 = arith.extui %42 : vector<1x128xi1> to vector<1x128xi32>
    %44 = arith.sitofp %43 : vector<1x128xi32> to vector<1x128xf32>
    %cst_22 = arith.constant 1.000000e+00 : f32
    %45 = vector.broadcast %cst_22 : f32 to vector<1x128xf32>
    %46 = arith.subf %45, %44 : vector<1x128xf32>
    %47 = arith.mulf %46, %38 : vector<1x128xf32>
    %cst_23 = arith.constant 0.000000e+00 : f32
    %48 = vector.broadcast %cst_23 : f32 to vector<1x128xf32>
    %49 = arith.mulf %44, %48 : vector<1x128xf32>
    %50 = arith.addf %47, %49 : vector<1x128xf32>
    %51 = arith.addf %40, %32 : vector<1x128xf32>
    %c1 = arith.constant 1 : index
    %c0_24 = arith.constant 0 : index
    %52 = vector.load %arg19[%c1, %c0_24] : memref<8x128xf32, #tpu.memory_space<vmem>>, vector<1x128xf32>
    tpu.vector_store %arg19[%c1, %c0_24], %44 {strides = array<i32>} : memref<8x128xf32, #tpu.memory_space<vmem>>, vector<1x128xf32>,
    %53 = vector.extract_strided_slice %2 {offsets = [2, 0], sizes = [1, 128], strides = [1, 1]} : vector<8x128xf32> to vector<1x128xf32>
    %cst_25 = arith.constant dense<0.000000e+00> : vector<1x128xf32>
    %54 = tpu.matmul %44, %3, %cst_25 {dimension_numbers = #tpu.dot_dimension_numbers<[1], [0], [0], [1], [0, 0, 1, 1], [], []>} : vector<1x128xf32>, vector<128x128xf32>, vector<1x128xf32> -> vector<1x128xf32>
    %55 = arith.addf %53, %54 : vector<1x128xf32>
    %cst_26 = arith.constant 0.000000e+00 : f32
    %56 = vector.broadcast %cst_26 : f32 to vector<1x128xf32>
    %57 = arith.subf %56, %50 : vector<1x128xf32>
    %58 = arith.addf %57, %51 : vector<1x128xf32>
    %cst_27 = arith.constant 4.000000e-03 : f32
    %59 = vector.broadcast %cst_27 : f32 to vector<1x128xf32>
    %60 = arith.mulf %59, %58 : vector<1x128xf32>
    %61 = arith.addf %50, %60 : vector<1x128xf32>
    %cst_28 = arith.constant 8.000000e-01 : f32
    %62 = vector.broadcast %cst_28 : f32 to vector<1x128xf32>
    %63 = arith.mulf %51, %62 : vector<1x128xf32>
    %cst_29 = arith.constant 1.000000e-01 : f32
    %64 = vector.broadcast %cst_29 : f32 to vector<1x128xf32>
    %65 = arith.cmpf ogt, %61, %64 : vector<1x128xf32>
    %66 = arith.extui %65 : vector<1x128xi1> to vector<1x128xi32>
    %67 = arith.sitofp %66 : vector<1x128xi32> to vector<1x128xf32>
    %cst_30 = arith.constant 1.000000e+00 : f32
    %68 = vector.broadcast %cst_30 : f32 to vector<1x128xf32>
    %69 = arith.subf %68, %67 : vector<1x128xf32>
    %70 = arith.mulf %69, %61 : vector<1x128xf32>
    %cst_31 = arith.constant 0.000000e+00 : f32
    %71 = vector.broadcast %cst_31 : f32 to vector<1x128xf32>
    %72 = arith.mulf %67, %71 : vector<1x128xf32>
    %73 = arith.addf %70, %72 : vector<1x128xf32>
    %74 = arith.addf %63, %55 : vector<1x128xf32>
    %c2 = arith.constant 2 : index
    %c0_32 = arith.constant 0 : index
    %75 = vector.load %arg19[%c2, %c0_32] : memref<8x128xf32, #tpu.memory_space<vmem>>, vector<1x128xf32>
    tpu.vector_store %arg19[%c2, %c0_32], %67 {strides = array<i32>} : memref<8x128xf32, #tpu.memory_space<vmem>>, vector<1x128xf32>,
    %76 = vector.extract_strided_slice %2 {offsets = [3, 0], sizes = [1, 128], strides = [1, 1]} : vector<8x128xf32> to vector<1x128xf32>
    %cst_33 = arith.constant dense<0.000000e+00> : vector<1x128xf32>
    %77 = tpu.matmul %67, %3, %cst_33 {dimension_numbers = #tpu.dot_dimension_numbers<[1], [0], [0], [1], [0, 0, 1, 1], [], []>} : vector<1x128xf32>, vector<128x128xf32>, vector<1x128xf32> -> vector<1x128xf32>
    %78 = arith.addf %76, %77 : vector<1x128xf32>
    %cst_34 = arith.constant 0.000000e+00 : f32
    %79 = vector.broadcast %cst_34 : f32 to vector<1x128xf32>
    %80 = arith.subf %79, %73 : vector<1x128xf32>
    %81 = arith.addf %80, %74 : vector<1x128xf32>
    %cst_35 = arith.constant 4.000000e-03 : f32
    %82 = vector.broadcast %cst_35 : f32 to vector<1x128xf32>
    %83 = arith.mulf %82, %81 : vector<1x128xf32>
    %84 = arith.addf %73, %83 : vector<1x128xf32>
    %cst_36 = arith.constant 8.000000e-01 : f32
    %85 = vector.broadcast %cst_36 : f32 to vector<1x128xf32>
    %86 = arith.mulf %74, %85 : vector<1x128xf32>
    %cst_37 = arith.constant 1.000000e-01 : f32
    %87 = vector.broadcast %cst_37 : f32 to vector<1x128xf32>
    %88 = arith.cmpf ogt, %84, %87 : vector<1x128xf32>
    %89 = arith.extui %88 : vector<1x128xi1> to vector<1x128xi32>
    %90 = arith.sitofp %89 : vector<1x128xi32> to vector<1x128xf32>
    %cst_38 = arith.constant 1.000000e+00 : f32
    %91 = vector.broadcast %cst_38 : f32 to vector<1x128xf32>
    %92 = arith.subf %91, %90 : vector<1x128xf32>
    %93 = arith.mulf %92, %84 : vector<1x128xf32>
    %cst_39 = arith.constant 0.000000e+00 : f32
    %94 = vector.broadcast %cst_39 : f32 to vector<1x128xf32>
    %95 = arith.mulf %90, %94 : vector<1x128xf32>
    %96 = arith.addf %93, %95 : vector<1x128xf32>
    %97 = arith.addf %86, %78 : vector<1x128xf32>
    %c3 = arith.constant 3 : index
    %c0_40 = arith.constant 0 : index
    %98 = vector.load %arg19[%c3, %c0_40] : memref<8x128xf32, #tpu.memory_space<vmem>>, vector<1x128xf32>
    tpu.vector_store %arg19[%c3, %c0_40], %90 {strides = array<i32>} : memref<8x128xf32, #tpu.memory_space<vmem>>, vector<1x128xf32>,
    %99 = vector.extract_strided_slice %2 {offsets = [4, 0], sizes = [1, 128], strides = [1, 1]} : vector<8x128xf32> to vector<1x128xf32>
    %cst_41 = arith.constant dense<0.000000e+00> : vector<1x128xf32>
    %100 = tpu.matmul %90, %3, %cst_41 {dimension_numbers = #tpu.dot_dimension_numbers<[1], [0], [0], [1], [0, 0, 1, 1], [], []>} : vector<1x128xf32>, vector<128x128xf32>, vector<1x128xf32> -> vector<1x128xf32>
    %101 = arith.addf %99, %100 : vector<1x128xf32>
    %cst_42 = arith.constant 0.000000e+00 : f32
    %102 = vector.broadcast %cst_42 : f32 to vector<1x128xf32>
    %103 = arith.subf %102, %96 : vector<1x128xf32>
    %104 = arith.addf %103, %97 : vector<1x128xf32>
    %cst_43 = arith.constant 4.000000e-03 : f32
    %105 = vector.broadcast %cst_43 : f32 to vector<1x128xf32>
    %106 = arith.mulf %105, %104 : vector<1x128xf32>
    %107 = arith.addf %96, %106 : vector<1x128xf32>
    %cst_44 = arith.constant 8.000000e-01 : f32
    %108 = vector.broadcast %cst_44 : f32 to vector<1x128xf32>
    %109 = arith.mulf %97, %108 : vector<1x128xf32>
    %cst_45 = arith.constant 1.000000e-01 : f32
    %110 = vector.broadcast %cst_45 : f32 to vector<1x128xf32>
    %111 = arith.cmpf ogt, %107, %110 : vector<1x128xf32>
    %112 = arith.extui %111 : vector<1x128xi1> to vector<1x128xi32>
    %113 = arith.sitofp %112 : vector<1x128xi32> to vector<1x128xf32>
    %cst_46 = arith.constant 1.000000e+00 : f32
    %114 = vector.broadcast %cst_46 : f32 to vector<1x128xf32>
    %115 = arith.subf %114, %113 : vector<1x128xf32>
    %116 = arith.mulf %115, %107 : vector<1x128xf32>
    %cst_47 = arith.constant 0.000000e+00 : f32
    %117 = vector.broadcast %cst_47 : f32 to vector<1x128xf32>
    %118 = arith.mulf %113, %117 : vector<1x128xf32>
    %119 = arith.addf %116, %118 : vector<1x128xf32>
    %120 = arith.addf %109, %101 : vector<1x128xf32>
    %c4 = arith.constant 4 : index
    %c0_48 = arith.constant 0 : index
    %121 = vector.load %arg19[%c4, %c0_48] : memref<8x128xf32, #tpu.memory_space<vmem>>, vector<1x128xf32>
    tpu.vector_store %arg19[%c4, %c0_48], %113 {strides = array<i32>} : memref<8x128xf32, #tpu.memory_space<vmem>>, vector<1x128xf32>,
    %122 = vector.extract_strided_slice %2 {offsets = [5, 0], sizes = [1, 128], strides = [1, 1]} : vector<8x128xf32> to vector<1x128xf32>
    %cst_49 = arith.constant dense<0.000000e+00> : vector<1x128xf32>
    %123 = tpu.matmul %113, %3, %cst_49 {dimension_numbers = #tpu.dot_dimension_numbers<[1], [0], [0], [1], [0, 0, 1, 1], [], []>} : vector<1x128xf32>, vector<128x128xf32>, vector<1x128xf32> -> vector<1x128xf32>
    %124 = arith.addf %122, %123 : vector<1x128xf32>
    %cst_50 = arith.constant 0.000000e+00 : f32
    %125 = vector.broadcast %cst_50 : f32 to vector<1x128xf32>
    %126 = arith.subf %125, %119 : vector<1x128xf32>
    %127 = arith.addf %126, %120 : vector<1x128xf32>
    %cst_51 = arith.constant 4.000000e-03 : f32
    %128 = vector.broadcast %cst_51 : f32 to vector<1x128xf32>
    %129 = arith.mulf %128, %127 : vector<1x128xf32>
    %130 = arith.addf %119, %129 : vector<1x128xf32>
    %cst_52 = arith.constant 8.000000e-01 : f32
    %131 = vector.broadcast %cst_52 : f32 to vector<1x128xf32>
    %132 = arith.mulf %120, %131 : vector<1x128xf32>
    %cst_53 = arith.constant 1.000000e-01 : f32
    %133 = vector.broadcast %cst_53 : f32 to vector<1x128xf32>
    %134 = arith.cmpf ogt, %130, %133 : vector<1x128xf32>
    %135 = arith.extui %134 : vector<1x128xi1> to vector<1x128xi32>
    %136 = arith.sitofp %135 : vector<1x128xi32> to vector<1x128xf32>
    %cst_54 = arith.constant 1.000000e+00 : f32
    %137 = vector.broadcast %cst_54 : f32 to vector<1x128xf32>
    %138 = arith.subf %137, %136 : vector<1x128xf32>
    %139 = arith.mulf %138, %130 : vector<1x128xf32>
    %cst_55 = arith.constant 0.000000e+00 : f32
    %140 = vector.broadcast %cst_55 : f32 to vector<1x128xf32>
    %141 = arith.mulf %136, %140 : vector<1x128xf32>
    %142 = arith.addf %139, %141 : vector<1x128xf32>
    %143 = arith.addf %132, %124 : vector<1x128xf32>
    %c5 = arith.constant 5 : index
    %c0_56 = arith.constant 0 : index
    %144 = vector.load %arg19[%c5, %c0_56] : memref<8x128xf32, #tpu.memory_space<vmem>>, vector<1x128xf32>
    tpu.vector_store %arg19[%c5, %c0_56], %136 {strides = array<i32>} : memref<8x128xf32, #tpu.memory_space<vmem>>, vector<1x128xf32>,
    %145 = vector.extract_strided_slice %2 {offsets = [6, 0], sizes = [1, 128], strides = [1, 1]} : vector<8x128xf32> to vector<1x128xf32>
    %cst_57 = arith.constant dense<0.000000e+00> : vector<1x128xf32>
    %146 = tpu.matmul %136, %3, %cst_57 {dimension_numbers = #tpu.dot_dimension_numbers<[1], [0], [0], [1], [0, 0, 1, 1], [], []>} : vector<1x128xf32>, vector<128x128xf32>, vector<1x128xf32> -> vector<1x128xf32>
    %147 = arith.addf %145, %146 : vector<1x128xf32>
    %cst_58 = arith.constant 0.000000e+00 : f32
    %148 = vector.broadcast %cst_58 : f32 to vector<1x128xf32>
    %149 = arith.subf %148, %142 : vector<1x128xf32>
    %150 = arith.addf %149, %143 : vector<1x128xf32>
    %cst_59 = arith.constant 4.000000e-03 : f32
    %151 = vector.broadcast %cst_59 : f32 to vector<1x128xf32>
    %152 = arith.mulf %151, %150 : vector<1x128xf32>
    %153 = arith.addf %142, %152 : vector<1x128xf32>
    %cst_60 = arith.constant 8.000000e-01 : f32
    %154 = vector.broadcast %cst_60 : f32 to vector<1x128xf32>
    %155 = arith.mulf %143, %154 : vector<1x128xf32>
    %cst_61 = arith.constant 1.000000e-01 : f32
    %156 = vector.broadcast %cst_61 : f32 to vector<1x128xf32>
    %157 = arith.cmpf ogt, %153, %156 : vector<1x128xf32>
    %158 = arith.extui %157 : vector<1x128xi1> to vector<1x128xi32>
    %159 = arith.sitofp %158 : vector<1x128xi32> to vector<1x128xf32>
    %cst_62 = arith.constant 1.000000e+00 : f32
    %160 = vector.broadcast %cst_62 : f32 to vector<1x128xf32>
    %161 = arith.subf %160, %159 : vector<1x128xf32>
    %162 = arith.mulf %161, %153 : vector<1x128xf32>
    %cst_63 = arith.constant 0.000000e+00 : f32
    %163 = vector.broadcast %cst_63 : f32 to vector<1x128xf32>
    %164 = arith.mulf %159, %163 : vector<1x128xf32>
    %165 = arith.addf %162, %164 : vector<1x128xf32>
    %166 = arith.addf %155, %147 : vector<1x128xf32>
    %c6 = arith.constant 6 : index
    %c0_64 = arith.constant 0 : index
    %167 = vector.load %arg19[%c6, %c0_64] : memref<8x128xf32, #tpu.memory_space<vmem>>, vector<1x128xf32>
    tpu.vector_store %arg19[%c6, %c0_64], %159 {strides = array<i32>} : memref<8x128xf32, #tpu.memory_space<vmem>>, vector<1x128xf32>,
    %cst_65 = arith.constant 0.000000e+00 : f32
    %168 = vector.broadcast %cst_65 : f32 to vector<1x128xf32>
    %169 = arith.subf %168, %165 : vector<1x128xf32>
    %170 = arith.addf %169, %166 : vector<1x128xf32>
    %cst_66 = arith.constant 4.000000e-03 : f32
    %171 = vector.broadcast %cst_66 : f32 to vector<1x128xf32>
    %172 = arith.mulf %171, %170 : vector<1x128xf32>
    %173 = arith.addf %165, %172 : vector<1x128xf32>
    %cst_67 = arith.constant 1.000000e-01 : f32
    %174 = vector.broadcast %cst_67 : f32 to vector<1x128xf32>
    %175 = arith.cmpf ogt, %173, %174 : vector<1x128xf32>
    %176 = arith.extui %175 : vector<1x128xi1> to vector<1x128xi32>
    %177 = arith.sitofp %176 : vector<1x128xi32> to vector<1x128xf32>
    %c7 = arith.constant 7 : index
    %c0_68 = arith.constant 0 : index
    %178 = vector.load %arg19[%c7, %c0_68] : memref<8x128xf32, #tpu.memory_space<vmem>>, vector<1x128xf32>
    tpu.vector_store %arg19[%c7, %c0_68], %177 {strides = array<i32>} : memref<8x128xf32, #tpu.memory_space<vmem>>, vector<1x128xf32>,
    %c0_69 = arith.constant 0 : index
    %c0_70 = arith.constant 0 : index
    %179 = vector.load %arg19[%c0_69, %c0_70] : memref<8x128xf32, #tpu.memory_space<vmem>>, vector<8x128xf32>
    %c0_71 = arith.constant 0 : index
    %c0_72 = arith.constant 0 : index
    %180 = vector.load %arg4[%c0_71, %c0_72] : memref<128x64xbf16, #tpu.memory_space<vmem>>, vector<128x64xbf16>
    %181 = arith.truncf %179 : vector<8x128xf32> to vector<8x128xbf16>
    %cst_73 = arith.constant dense<0.000000e+00> : vector<8x64xf32>
    %182 = tpu.matmul %181, %180, %cst_73 {dimension_numbers = #tpu.dot_dimension_numbers<[1], [0], [0], [1], [0, 0, 1, 1], [], []>} : vector<8x128xbf16>, vector<128x64xbf16>, vector<8x64xf32> -> vector<8x64xf32>
    %c0_74 = arith.constant 0 : index
    %c0_75 = arith.constant 0 : index
    %183 = vector.load %arg5[%c0_74, %c0_75] : memref<1x64xf32, #tpu.memory_space<vmem>>, vector<1x64xf32>
    %184 = vector.broadcast %183 : vector<1x64xf32> to vector<8x64xf32>
    %185 = arith.addf %182, %184 : vector<8x64xf32>
    %c0_76 = arith.constant 0 : index
    %c0_77 = arith.constant 0 : index
    %c0_78 = arith.constant 0 : index
    %186 = vector.load %arg6[%c0_76, %c0_77, %c0_78] : memref<2x64x192xbf16, #tpu.memory_space<vmem>>, vector<1x64x192xbf16>
    %187 = vector.shape_cast %186 : vector<1x64x192xbf16> to vector<64x192xbf16>
    %188 = arith.truncf %185 : vector<8x64xf32> to vector<8x64xbf16>
    %cst_79 = arith.constant dense<0.000000e+00> : vector<8x192xf32>
    %189 = tpu.matmul %188, %187, %cst_79 {dimension_numbers = #tpu.dot_dimension_numbers<[1], [0], [0], [1], [0, 0, 1, 1], [], []>} : vector<8x64xbf16>, vector<64x192xbf16>, vector<8x192xf32> -> vector<8x192xf32>
    %c0_80 = arith.constant 0 : index
    %c0_81 = arith.constant 0 : index
    %c0_82 = arith.constant 0 : index
    %190 = vector.load %arg7[%c0_80, %c0_81, %c0_82] : memref<2x1x192xf32, #tpu.memory_space<vmem>>, vector<1x1x192xf32>
    %191 = vector.shape_cast %190 : vector<1x1x192xf32> to vector<1x192xf32>
    %192 = vector.broadcast %191 : vector<1x192xf32> to vector<8x192xf32>
    %193 = arith.addf %189, %192 : vector<8x192xf32>
    %194 = arith.truncf %193 : vector<8x192xf32> to vector<8x192xbf16>
    %195 = vector.extract_strided_slice %194 {offsets = [0, 0], sizes = [8, 16], strides = [1, 1]} : vector<8x192xbf16> to vector<8x16xbf16>
    %196 = vector.extract_strided_slice %194 {offsets = [0, 64], sizes = [8, 16], strides = [1, 1]} : vector<8x192xbf16> to vector<8x16xbf16>
    %197 = vector.extract_strided_slice %194 {offsets = [0, 128], sizes = [8, 16], strides = [1, 1]} : vector<8x192xbf16> to vector<8x16xbf16>
    %cst_83 = arith.constant dense<0.000000e+00> : vector<8x8xf32>
    %198 = tpu.matmul %195, %196, %cst_83 {dimension_numbers = #tpu.dot_dimension_numbers<[1], [1], [0], [0], [0, 0, 1, 0], [], []>} : vector<8x16xbf16>, vector<8x16xbf16>, vector<8x8xf32> -> vector<8x8xf32>
    %cst_84 = arith.constant 2.500000e-01 : f32
    %199 = vector.broadcast %cst_84 : f32 to vector<8x8xf32>
    %200 = arith.mulf %198, %199 : vector<8x8xf32>
    %cst_85 = arith.constant dense<0xFF800000> : vector<8xf32>
    %201 = vector.multi_reduction <maximumf>, %200, %cst_85 [1] : vector<8x8xf32> to vector<8xf32>
    %202 = vector.shape_cast %201 : vector<8xf32> to vector<8x1xf32>
    %203 = vector.broadcast %202 : vector<8x1xf32> to vector<8x8xf32>
    %204 = arith.subf %200, %203 : vector<8x8xf32>
    %205 = math.exp %204 : vector<8x8xf32>
    %cst_86 = arith.constant dense<0.000000e+00> : vector<8xf32>
    %206 = vector.multi_reduction <add>, %205, %cst_86 [1] : vector<8x8xf32> to vector<8xf32>
    %207 = vector.shape_cast %206 : vector<8xf32> to vector<8x1xf32>
    %208 = tpu.reciprocal %207 {approx = true} : vector<8x1xf32> -> vector<8x1xf32>
    %209 = vector.broadcast %208 : vector<8x1xf32> to vector<8x8xf32>
    %210 = arith.mulf %205, %209 : vector<8x8xf32>
    %211 = arith.truncf %210 : vector<8x8xf32> to vector<8x8xbf16>
    %cst_87 = arith.constant dense<0.000000e+00> : vector<8x16xf32>
    %212 = tpu.matmul %211, %197, %cst_87 {dimension_numbers = #tpu.dot_dimension_numbers<[1], [0], [0], [1], [0, 0, 1, 1], [], []>} : vector<8x8xbf16>, vector<8x16xbf16>, vector<8x16xf32> -> vector<8x16xf32>
    %213 = vector.extract_strided_slice %194 {offsets = [0, 16], sizes = [8, 16], strides = [1, 1]} : vector<8x192xbf16> to vector<8x16xbf16>
    %214 = vector.extract_strided_slice %194 {offsets = [0, 80], sizes = [8, 16], strides = [1, 1]} : vector<8x192xbf16> to vector<8x16xbf16>
    %215 = vector.extract_strided_slice %194 {offsets = [0, 144], sizes = [8, 16], strides = [1, 1]} : vector<8x192xbf16> to vector<8x16xbf16>
    %cst_88 = arith.constant dense<0.000000e+00> : vector<8x8xf32>
    %216 = tpu.matmul %213, %214, %cst_88 {dimension_numbers = #tpu.dot_dimension_numbers<[1], [1], [0], [0], [0, 0, 1, 0], [], []>} : vector<8x16xbf16>, vector<8x16xbf16>, vector<8x8xf32> -> vector<8x8xf32>
    %cst_89 = arith.constant 2.500000e-01 : f32
    %217 = vector.broadcast %cst_89 : f32 to vector<8x8xf32>
    %218 = arith.mulf %216, %217 : vector<8x8xf32>
    %cst_90 = arith.constant dense<0xFF800000> : vector<8xf32>
    %219 = vector.multi_reduction <maximumf>, %218, %cst_90 [1] : vector<8x8xf32> to vector<8xf32>
    %220 = vector.shape_cast %219 : vector<8xf32> to vector<8x1xf32>
    %221 = vector.broadcast %220 : vector<8x1xf32> to vector<8x8xf32>
    %222 = arith.subf %218, %221 : vector<8x8xf32>
    %223 = math.exp %222 : vector<8x8xf32>
    %cst_91 = arith.constant dense<0.000000e+00> : vector<8xf32>
    %224 = vector.multi_reduction <add>, %223, %cst_91 [1] : vector<8x8xf32> to vector<8xf32>
    %225 = vector.shape_cast %224 : vector<8xf32> to vector<8x1xf32>
    %226 = tpu.reciprocal %225 {approx = true} : vector<8x1xf32> -> vector<8x1xf32>
    %227 = vector.broadcast %226 : vector<8x1xf32> to vector<8x8xf32>
    %228 = arith.mulf %223, %227 : vector<8x8xf32>
    %229 = arith.truncf %228 : vector<8x8xf32> to vector<8x8xbf16>
    %cst_92 = arith.constant dense<0.000000e+00> : vector<8x16xf32>
    %230 = tpu.matmul %229, %215, %cst_92 {dimension_numbers = #tpu.dot_dimension_numbers<[1], [0], [0], [1], [0, 0, 1, 1], [], []>} : vector<8x8xbf16>, vector<8x16xbf16>, vector<8x16xf32> -> vector<8x16xf32>
    %231 = vector.extract_strided_slice %194 {offsets = [0, 32], sizes = [8, 16], strides = [1, 1]} : vector<8x192xbf16> to vector<8x16xbf16>
    %232 = vector.extract_strided_slice %194 {offsets = [0, 96], sizes = [8, 16], strides = [1, 1]} : vector<8x192xbf16> to vector<8x16xbf16>
    %233 = vector.extract_strided_slice %194 {offsets = [0, 160], sizes = [8, 16], strides = [1, 1]} : vector<8x192xbf16> to vector<8x16xbf16>
    %cst_93 = arith.constant dense<0.000000e+00> : vector<8x8xf32>
    %234 = tpu.matmul %231, %232, %cst_93 {dimension_numbers = #tpu.dot_dimension_numbers<[1], [1], [0], [0], [0, 0, 1, 0], [], []>} : vector<8x16xbf16>, vector<8x16xbf16>, vector<8x8xf32> -> vector<8x8xf32>
    %cst_94 = arith.constant 2.500000e-01 : f32
    %235 = vector.broadcast %cst_94 : f32 to vector<8x8xf32>
    %236 = arith.mulf %234, %235 : vector<8x8xf32>
    %cst_95 = arith.constant dense<0xFF800000> : vector<8xf32>
    %237 = vector.multi_reduction <maximumf>, %236, %cst_95 [1] : vector<8x8xf32> to vector<8xf32>
    %238 = vector.shape_cast %237 : vector<8xf32> to vector<8x1xf32>
    %239 = vector.broadcast %238 : vector<8x1xf32> to vector<8x8xf32>
    %240 = arith.subf %236, %239 : vector<8x8xf32>
    %241 = math.exp %240 : vector<8x8xf32>
    %cst_96 = arith.constant dense<0.000000e+00> : vector<8xf32>
    %242 = vector.multi_reduction <add>, %241, %cst_96 [1] : vector<8x8xf32> to vector<8xf32>
    %243 = vector.shape_cast %242 : vector<8xf32> to vector<8x1xf32>
    %244 = tpu.reciprocal %243 {approx = true} : vector<8x1xf32> -> vector<8x1xf32>
    %245 = vector.broadcast %244 : vector<8x1xf32> to vector<8x8xf32>
    %246 = arith.mulf %241, %245 : vector<8x8xf32>
    %247 = arith.truncf %246 : vector<8x8xf32> to vector<8x8xbf16>
    %cst_97 = arith.constant dense<0.000000e+00> : vector<8x16xf32>
    %248 = tpu.matmul %247, %233, %cst_97 {dimension_numbers = #tpu.dot_dimension_numbers<[1], [0], [0], [1], [0, 0, 1, 1], [], []>} : vector<8x8xbf16>, vector<8x16xbf16>, vector<8x16xf32> -> vector<8x16xf32>
    %249 = vector.extract_strided_slice %194 {offsets = [0, 48], sizes = [8, 16], strides = [1, 1]} : vector<8x192xbf16> to vector<8x16xbf16>
    %250 = vector.extract_strided_slice %194 {offsets = [0, 112], sizes = [8, 16], strides = [1, 1]} : vector<8x192xbf16> to vector<8x16xbf16>
    %251 = vector.extract_strided_slice %194 {offsets = [0, 176], sizes = [8, 16], strides = [1, 1]} : vector<8x192xbf16> to vector<8x16xbf16>
    %cst_98 = arith.constant dense<0.000000e+00> : vector<8x8xf32>
    %252 = tpu.matmul %249, %250, %cst_98 {dimension_numbers = #tpu.dot_dimension_numbers<[1], [1], [0], [0], [0, 0, 1, 0], [], []>} : vector<8x16xbf16>, vector<8x16xbf16>, vector<8x8xf32> -> vector<8x8xf32>
    %cst_99 = arith.constant 2.500000e-01 : f32
    %253 = vector.broadcast %cst_99 : f32 to vector<8x8xf32>
    %254 = arith.mulf %252, %253 : vector<8x8xf32>
    %cst_100 = arith.constant dense<0xFF800000> : vector<8xf32>
    %255 = vector.multi_reduction <maximumf>, %254, %cst_100 [1] : vector<8x8xf32> to vector<8xf32>
    %256 = vector.shape_cast %255 : vector<8xf32> to vector<8x1xf32>
    %257 = vector.broadcast %256 : vector<8x1xf32> to vector<8x8xf32>
    %258 = arith.subf %254, %257 : vector<8x8xf32>
    %259 = math.exp %258 : vector<8x8xf32>
    %cst_101 = arith.constant dense<0.000000e+00> : vector<8xf32>
    %260 = vector.multi_reduction <add>, %259, %cst_101 [1] : vector<8x8xf32> to vector<8xf32>
    %261 = vector.shape_cast %260 : vector<8xf32> to vector<8x1xf32>
    %262 = tpu.reciprocal %261 {approx = true} : vector<8x1xf32> -> vector<8x1xf32>
    %263 = vector.broadcast %262 : vector<8x1xf32> to vector<8x8xf32>
    %264 = arith.mulf %259, %263 : vector<8x8xf32>
    %265 = arith.truncf %264 : vector<8x8xf32> to vector<8x8xbf16>
    %cst_102 = arith.constant dense<0.000000e+00> : vector<8x16xf32>
    %266 = tpu.matmul %265, %251, %cst_102 {dimension_numbers = #tpu.dot_dimension_numbers<[1], [0], [0], [1], [0, 0, 1, 1], [], []>} : vector<8x8xbf16>, vector<8x16xbf16>, vector<8x16xf32> -> vector<8x16xf32>
    %267 = tpu.concatenate %212, %230, %248, %266 in 1 : vector<8x16xf32>, vector<8x16xf32>, vector<8x16xf32>, vector<8x16xf32> -> vector<8x64xf32>
    %c0_103 = arith.constant 0 : index
    %c0_104 = arith.constant 0 : index
    %c0_105 = arith.constant 0 : index
    %268 = vector.load %arg8[%c0_103, %c0_104, %c0_105] : memref<2x64x64xbf16, #tpu.memory_space<vmem>>, vector<1x64x64xbf16>
    %269 = vector.shape_cast %268 : vector<1x64x64xbf16> to vector<64x64xbf16>
    %270 = arith.truncf %267 : vector<8x64xf32> to vector<8x64xbf16>
    %cst_106 = arith.constant dense<0.000000e+00> : vector<8x64xf32>
    %271 = tpu.matmul %270, %269, %cst_106 {dimension_numbers = #tpu.dot_dimension_numbers<[1], [0], [0], [1], [0, 0, 1, 1], [], []>} : vector<8x64xbf16>, vector<64x64xbf16>, vector<8x64xf32> -> vector<8x64xf32>
    %c0_107 = arith.constant 0 : index
    %c0_108 = arith.constant 0 : index
    %c0_109 = arith.constant 0 : index
    %272 = vector.load %arg9[%c0_107, %c0_108, %c0_109] : memref<2x1x64xf32, #tpu.memory_space<vmem>>, vector<1x1x64xf32>
    %273 = vector.shape_cast %272 : vector<1x1x64xf32> to vector<1x64xf32>
    %274 = vector.broadcast %273 : vector<1x64xf32> to vector<8x64xf32>
    %275 = arith.addf %271, %274 : vector<8x64xf32>
    %276 = arith.addf %185, %275 : vector<8x64xf32>
    %c0_110 = arith.constant 0 : index
    %c0_111 = arith.constant 0 : index
    %c0_112 = arith.constant 0 : index
    %277 = vector.load %arg10[%c0_110, %c0_111, %c0_112] : memref<2x1x64xf32, #tpu.memory_space<vmem>>, vector<1x1x64xf32>
    %278 = vector.shape_cast %277 : vector<1x1x64xf32> to vector<1x64xf32>
    %c0_113 = arith.constant 0 : index
    %c0_114 = arith.constant 0 : index
    %c0_115 = arith.constant 0 : index
    %279 = vector.load %arg11[%c0_113, %c0_114, %c0_115] : memref<2x1x64xf32, #tpu.memory_space<vmem>>, vector<1x1x64xf32>
    %280 = vector.shape_cast %279 : vector<1x1x64xf32> to vector<1x64xf32>
    %cst_116 = arith.constant dense<0.000000e+00> : vector<8xf32>
    %281 = vector.multi_reduction <add>, %276, %cst_116 [1] : vector<8x64xf32> to vector<8xf32>
    %282 = vector.shape_cast %281 : vector<8xf32> to vector<8x1xf32>
    %cst_117 = arith.constant 6.400000e+01 : f32
    %283 = vector.broadcast %cst_117 : f32 to vector<8x1xf32>
    %284 = arith.divf %282, %283 : vector<8x1xf32>
    %285 = vector.broadcast %284 : vector<8x1xf32> to vector<8x64xf32>
    %286 = arith.subf %276, %285 : vector<8x64xf32>
    %287 = arith.mulf %286, %286 : vector<8x64xf32>
    %cst_118 = arith.constant dense<0.000000e+00> : vector<8xf32>
    %288 = vector.multi_reduction <add>, %287, %cst_118 [1] : vector<8x64xf32> to vector<8xf32>
    %289 = vector.shape_cast %288 : vector<8xf32> to vector<8x1xf32>
    %cst_119 = arith.constant 6.400000e+01 : f32
    %290 = vector.broadcast %cst_119 : f32 to vector<8x1xf32>
    %291 = arith.divf %289, %290 : vector<8x1xf32>
    %cst_120 = arith.constant 9.99999974E-6 : f32
    %292 = vector.broadcast %cst_120 : f32 to vector<8x1xf32>
    %293 = arith.addf %291, %292 : vector<8x1xf32>
    %294 = math.rsqrt %293 : vector<8x1xf32>
    %295 = vector.broadcast %294 : vector<8x1xf32> to vector<8x64xf32>
    %296 = arith.mulf %286, %295 : vector<8x64xf32>
    %297 = vector.broadcast %278 : vector<1x64xf32> to vector<8x64xf32>
    %298 = arith.mulf %296, %297 : vector<8x64xf32>
    %299 = vector.broadcast %280 : vector<1x64xf32> to vector<8x64xf32>
    %300 = arith.addf %298, %299 : vector<8x64xf32>
    %c0_121 = arith.constant 0 : index
    %c0_122 = arith.constant 0 : index
    %c0_123 = arith.constant 0 : index
    %301 = vector.load %arg12[%c0_121, %c0_122, %c0_123] : memref<2x64x256xbf16, #tpu.memory_space<vmem>>, vector<1x64x256xbf16>
    %302 = vector.shape_cast %301 : vector<1x64x256xbf16> to vector<64x256xbf16>
    %303 = arith.truncf %300 : vector<8x64xf32> to vector<8x64xbf16>
    %cst_124 = arith.constant dense<0.000000e+00> : vector<8x256xf32>
    %304 = tpu.matmul %303, %302, %cst_124 {dimension_numbers = #tpu.dot_dimension_numbers<[1], [0], [0], [1], [0, 0, 1, 1], [], []>} : vector<8x64xbf16>, vector<64x256xbf16>, vector<8x256xf32> -> vector<8x256xf32>
    %c0_125 = arith.constant 0 : index
    %c0_126 = arith.constant 0 : index
    %c0_127 = arith.constant 0 : index
    %305 = vector.load %arg13[%c0_125, %c0_126, %c0_127] : memref<2x1x256xf32, #tpu.memory_space<vmem>>, vector<1x1x256xf32>
    %306 = vector.shape_cast %305 : vector<1x1x256xf32> to vector<1x256xf32>
    %307 = vector.broadcast %306 : vector<1x256xf32> to vector<8x256xf32>
    %308 = arith.addf %304, %307 : vector<8x256xf32>
    %cst_128 = arith.constant 0.000000e+00 : f32
    %309 = vector.broadcast %cst_128 : f32 to vector<8x256xf32>
    %310 = arith.maximumf %308, %309 : vector<8x256xf32>
    %c0_129 = arith.constant 0 : index
    %c0_130 = arith.constant 0 : index
    %c0_131 = arith.constant 0 : index
    %311 = vector.load %arg14[%c0_129, %c0_130, %c0_131] : memref<2x256x64xbf16, #tpu.memory_space<vmem>>, vector<1x256x64xbf16>
    %312 = vector.shape_cast %311 : vector<1x256x64xbf16> to vector<256x64xbf16>
    %313 = arith.truncf %310 : vector<8x256xf32> to vector<8x256xbf16>
    %cst_132 = arith.constant dense<0.000000e+00> : vector<8x64xf32>
    %314 = tpu.matmul %313, %312, %cst_132 {dimension_numbers = #tpu.dot_dimension_numbers<[1], [0], [0], [1], [0, 0, 1, 1], [], []>} : vector<8x256xbf16>, vector<256x64xbf16>, vector<8x64xf32> -> vector<8x64xf32>
    %c0_133 = arith.constant 0 : index
    %c0_134 = arith.constant 0 : index
    %c0_135 = arith.constant 0 : index
    %315 = vector.load %arg15[%c0_133, %c0_134, %c0_135] : memref<2x1x64xf32, #tpu.memory_space<vmem>>, vector<1x1x64xf32>
    %316 = vector.shape_cast %315 : vector<1x1x64xf32> to vector<1x64xf32>
    %317 = vector.broadcast %316 : vector<1x64xf32> to vector<8x64xf32>
    %318 = arith.addf %314, %317 : vector<8x64xf32>
    %319 = arith.addf %300, %318 : vector<8x64xf32>
    %c0_136 = arith.constant 0 : index
    %c0_137 = arith.constant 0 : index
    %c0_138 = arith.constant 0 : index
    %320 = vector.load %arg16[%c0_136, %c0_137, %c0_138] : memref<2x1x64xf32, #tpu.memory_space<vmem>>, vector<1x1x64xf32>
    %321 = vector.shape_cast %320 : vector<1x1x64xf32> to vector<1x64xf32>
    %c0_139 = arith.constant 0 : index
    %c0_140 = arith.constant 0 : index
    %c0_141 = arith.constant 0 : index
    %322 = vector.load %arg17[%c0_139, %c0_140, %c0_141] : memref<2x1x64xf32, #tpu.memory_space<vmem>>, vector<1x1x64xf32>
    %323 = vector.shape_cast %322 : vector<1x1x64xf32> to vector<1x64xf32>
    %cst_142 = arith.constant dense<0.000000e+00> : vector<8xf32>
    %324 = vector.multi_reduction <add>, %319, %cst_142 [1] : vector<8x64xf32> to vector<8xf32>
    %325 = vector.shape_cast %324 : vector<8xf32> to vector<8x1xf32>
    %cst_143 = arith.constant 6.400000e+01 : f32
    %326 = vector.broadcast %cst_143 : f32 to vector<8x1xf32>
    %327 = arith.divf %325, %326 : vector<8x1xf32>
    %328 = vector.broadcast %327 : vector<8x1xf32> to vector<8x64xf32>
    %329 = arith.subf %319, %328 : vector<8x64xf32>
    %330 = arith.mulf %329, %329 : vector<8x64xf32>
    %cst_144 = arith.constant dense<0.000000e+00> : vector<8xf32>
    %331 = vector.multi_reduction <add>, %330, %cst_144 [1] : vector<8x64xf32> to vector<8xf32>
    %332 = vector.shape_cast %331 : vector<8xf32> to vector<8x1xf32>
    %cst_145 = arith.constant 6.400000e+01 : f32
    %333 = vector.broadcast %cst_145 : f32 to vector<8x1xf32>
    %334 = arith.divf %332, %333 : vector<8x1xf32>
    %cst_146 = arith.constant 9.99999974E-6 : f32
    %335 = vector.broadcast %cst_146 : f32 to vector<8x1xf32>
    %336 = arith.addf %334, %335 : vector<8x1xf32>
    %337 = math.rsqrt %336 : vector<8x1xf32>
    %338 = vector.broadcast %337 : vector<8x1xf32> to vector<8x64xf32>
    %339 = arith.mulf %329, %338 : vector<8x64xf32>
    %340 = vector.broadcast %321 : vector<1x64xf32> to vector<8x64xf32>
    %341 = arith.mulf %339, %340 : vector<8x64xf32>
    %342 = vector.broadcast %323 : vector<1x64xf32> to vector<8x64xf32>
    %343 = arith.addf %341, %342 : vector<8x64xf32>
    %c1_147 = arith.constant 1 : index
    %c0_148 = arith.constant 0 : index
    %c0_149 = arith.constant 0 : index
    %344 = vector.load %arg6[%c1_147, %c0_148, %c0_149] : memref<2x64x192xbf16, #tpu.memory_space<vmem>>, vector<1x64x192xbf16>
    %345 = vector.shape_cast %344 : vector<1x64x192xbf16> to vector<64x192xbf16>
    %346 = arith.truncf %343 : vector<8x64xf32> to vector<8x64xbf16>
    %cst_150 = arith.constant dense<0.000000e+00> : vector<8x192xf32>
    %347 = tpu.matmul %346, %345, %cst_150 {dimension_numbers = #tpu.dot_dimension_numbers<[1], [0], [0], [1], [0, 0, 1, 1], [], []>} : vector<8x64xbf16>, vector<64x192xbf16>, vector<8x192xf32> -> vector<8x192xf32>
    %c1_151 = arith.constant 1 : index
    %c0_152 = arith.constant 0 : index
    %c0_153 = arith.constant 0 : index
    %348 = vector.load %arg7[%c1_151, %c0_152, %c0_153] : memref<2x1x192xf32, #tpu.memory_space<vmem>>, vector<1x1x192xf32>
    %349 = vector.shape_cast %348 : vector<1x1x192xf32> to vector<1x192xf32>
    %350 = vector.broadcast %349 : vector<1x192xf32> to vector<8x192xf32>
    %351 = arith.addf %347, %350 : vector<8x192xf32>
    %352 = arith.truncf %351 : vector<8x192xf32> to vector<8x192xbf16>
    %353 = vector.extract_strided_slice %352 {offsets = [0, 0], sizes = [8, 16], strides = [1, 1]} : vector<8x192xbf16> to vector<8x16xbf16>
    %354 = vector.extract_strided_slice %352 {offsets = [0, 64], sizes = [8, 16], strides = [1, 1]} : vector<8x192xbf16> to vector<8x16xbf16>
    %355 = vector.extract_strided_slice %352 {offsets = [0, 128], sizes = [8, 16], strides = [1, 1]} : vector<8x192xbf16> to vector<8x16xbf16>
    %cst_154 = arith.constant dense<0.000000e+00> : vector<8x8xf32>
    %356 = tpu.matmul %353, %354, %cst_154 {dimension_numbers = #tpu.dot_dimension_numbers<[1], [1], [0], [0], [0, 0, 1, 0], [], []>} : vector<8x16xbf16>, vector<8x16xbf16>, vector<8x8xf32> -> vector<8x8xf32>
    %cst_155 = arith.constant 2.500000e-01 : f32
    %357 = vector.broadcast %cst_155 : f32 to vector<8x8xf32>
    %358 = arith.mulf %356, %357 : vector<8x8xf32>
    %cst_156 = arith.constant dense<0xFF800000> : vector<8xf32>
    %359 = vector.multi_reduction <maximumf>, %358, %cst_156 [1] : vector<8x8xf32> to vector<8xf32>
    %360 = vector.shape_cast %359 : vector<8xf32> to vector<8x1xf32>
    %361 = vector.broadcast %360 : vector<8x1xf32> to vector<8x8xf32>
    %362 = arith.subf %358, %361 : vector<8x8xf32>
    %363 = math.exp %362 : vector<8x8xf32>
    %cst_157 = arith.constant dense<0.000000e+00> : vector<8xf32>
    %364 = vector.multi_reduction <add>, %363, %cst_157 [1] : vector<8x8xf32> to vector<8xf32>
    %365 = vector.shape_cast %364 : vector<8xf32> to vector<8x1xf32>
    %366 = tpu.reciprocal %365 {approx = true} : vector<8x1xf32> -> vector<8x1xf32>
    %367 = vector.broadcast %366 : vector<8x1xf32> to vector<8x8xf32>
    %368 = arith.mulf %363, %367 : vector<8x8xf32>
    %369 = arith.truncf %368 : vector<8x8xf32> to vector<8x8xbf16>
    %cst_158 = arith.constant dense<0.000000e+00> : vector<8x16xf32>
    %370 = tpu.matmul %369, %355, %cst_158 {dimension_numbers = #tpu.dot_dimension_numbers<[1], [0], [0], [1], [0, 0, 1, 1], [], []>} : vector<8x8xbf16>, vector<8x16xbf16>, vector<8x16xf32> -> vector<8x16xf32>
    %371 = vector.extract_strided_slice %352 {offsets = [0, 16], sizes = [8, 16], strides = [1, 1]} : vector<8x192xbf16> to vector<8x16xbf16>
    %372 = vector.extract_strided_slice %352 {offsets = [0, 80], sizes = [8, 16], strides = [1, 1]} : vector<8x192xbf16> to vector<8x16xbf16>
    %373 = vector.extract_strided_slice %352 {offsets = [0, 144], sizes = [8, 16], strides = [1, 1]} : vector<8x192xbf16> to vector<8x16xbf16>
    %cst_159 = arith.constant dense<0.000000e+00> : vector<8x8xf32>
    %374 = tpu.matmul %371, %372, %cst_159 {dimension_numbers = #tpu.dot_dimension_numbers<[1], [1], [0], [0], [0, 0, 1, 0], [], []>} : vector<8x16xbf16>, vector<8x16xbf16>, vector<8x8xf32> -> vector<8x8xf32>
    %cst_160 = arith.constant 2.500000e-01 : f32
    %375 = vector.broadcast %cst_160 : f32 to vector<8x8xf32>
    %376 = arith.mulf %374, %375 : vector<8x8xf32>
    %cst_161 = arith.constant dense<0xFF800000> : vector<8xf32>
    %377 = vector.multi_reduction <maximumf>, %376, %cst_161 [1] : vector<8x8xf32> to vector<8xf32>
    %378 = vector.shape_cast %377 : vector<8xf32> to vector<8x1xf32>
    %379 = vector.broadcast %378 : vector<8x1xf32> to vector<8x8xf32>
    %380 = arith.subf %376, %379 : vector<8x8xf32>
    %381 = math.exp %380 : vector<8x8xf32>
    %cst_162 = arith.constant dense<0.000000e+00> : vector<8xf32>
    %382 = vector.multi_reduction <add>, %381, %cst_162 [1] : vector<8x8xf32> to vector<8xf32>
    %383 = vector.shape_cast %382 : vector<8xf32> to vector<8x1xf32>
    %384 = tpu.reciprocal %383 {approx = true} : vector<8x1xf32> -> vector<8x1xf32>
    %385 = vector.broadcast %384 : vector<8x1xf32> to vector<8x8xf32>
    %386 = arith.mulf %381, %385 : vector<8x8xf32>
    %387 = arith.truncf %386 : vector<8x8xf32> to vector<8x8xbf16>
    %cst_163 = arith.constant dense<0.000000e+00> : vector<8x16xf32>
    %388 = tpu.matmul %387, %373, %cst_163 {dimension_numbers = #tpu.dot_dimension_numbers<[1], [0], [0], [1], [0, 0, 1, 1], [], []>} : vector<8x8xbf16>, vector<8x16xbf16>, vector<8x16xf32> -> vector<8x16xf32>
    %389 = vector.extract_strided_slice %352 {offsets = [0, 32], sizes = [8, 16], strides = [1, 1]} : vector<8x192xbf16> to vector<8x16xbf16>
    %390 = vector.extract_strided_slice %352 {offsets = [0, 96], sizes = [8, 16], strides = [1, 1]} : vector<8x192xbf16> to vector<8x16xbf16>
    %391 = vector.extract_strided_slice %352 {offsets = [0, 160], sizes = [8, 16], strides = [1, 1]} : vector<8x192xbf16> to vector<8x16xbf16>
    %cst_164 = arith.constant dense<0.000000e+00> : vector<8x8xf32>
    %392 = tpu.matmul %389, %390, %cst_164 {dimension_numbers = #tpu.dot_dimension_numbers<[1], [1], [0], [0], [0, 0, 1, 0], [], []>} : vector<8x16xbf16>, vector<8x16xbf16>, vector<8x8xf32> -> vector<8x8xf32>
    %cst_165 = arith.constant 2.500000e-01 : f32
    %393 = vector.broadcast %cst_165 : f32 to vector<8x8xf32>
    %394 = arith.mulf %392, %393 : vector<8x8xf32>
    %cst_166 = arith.constant dense<0xFF800000> : vector<8xf32>
    %395 = vector.multi_reduction <maximumf>, %394, %cst_166 [1] : vector<8x8xf32> to vector<8xf32>
    %396 = vector.shape_cast %395 : vector<8xf32> to vector<8x1xf32>
    %397 = vector.broadcast %396 : vector<8x1xf32> to vector<8x8xf32>
    %398 = arith.subf %394, %397 : vector<8x8xf32>
    %399 = math.exp %398 : vector<8x8xf32>
    %cst_167 = arith.constant dense<0.000000e+00> : vector<8xf32>
    %400 = vector.multi_reduction <add>, %399, %cst_167 [1] : vector<8x8xf32> to vector<8xf32>
    %401 = vector.shape_cast %400 : vector<8xf32> to vector<8x1xf32>
    %402 = tpu.reciprocal %401 {approx = true} : vector<8x1xf32> -> vector<8x1xf32>
    %403 = vector.broadcast %402 : vector<8x1xf32> to vector<8x8xf32>
    %404 = arith.mulf %399, %403 : vector<8x8xf32>
    %405 = arith.truncf %404 : vector<8x8xf32> to vector<8x8xbf16>
    %cst_168 = arith.constant dense<0.000000e+00> : vector<8x16xf32>
    %406 = tpu.matmul %405, %391, %cst_168 {dimension_numbers = #tpu.dot_dimension_numbers<[1], [0], [0], [1], [0, 0, 1, 1], [], []>} : vector<8x8xbf16>, vector<8x16xbf16>, vector<8x16xf32> -> vector<8x16xf32>
    %407 = vector.extract_strided_slice %352 {offsets = [0, 48], sizes = [8, 16], strides = [1, 1]} : vector<8x192xbf16> to vector<8x16xbf16>
    %408 = vector.extract_strided_slice %352 {offsets = [0, 112], sizes = [8, 16], strides = [1, 1]} : vector<8x192xbf16> to vector<8x16xbf16>
    %409 = vector.extract_strided_slice %352 {offsets = [0, 176], sizes = [8, 16], strides = [1, 1]} : vector<8x192xbf16> to vector<8x16xbf16>
    %cst_169 = arith.constant dense<0.000000e+00> : vector<8x8xf32>
    %410 = tpu.matmul %407, %408, %cst_169 {dimension_numbers = #tpu.dot_dimension_numbers<[1], [1], [0], [0], [0, 0, 1, 0], [], []>} : vector<8x16xbf16>, vector<8x16xbf16>, vector<8x8xf32> -> vector<8x8xf32>
    %cst_170 = arith.constant 2.500000e-01 : f32
    %411 = vector.broadcast %cst_170 : f32 to vector<8x8xf32>
    %412 = arith.mulf %410, %411 : vector<8x8xf32>
    %cst_171 = arith.constant dense<0xFF800000> : vector<8xf32>
    %413 = vector.multi_reduction <maximumf>, %412, %cst_171 [1] : vector<8x8xf32> to vector<8xf32>
    %414 = vector.shape_cast %413 : vector<8xf32> to vector<8x1xf32>
    %415 = vector.broadcast %414 : vector<8x1xf32> to vector<8x8xf32>
    %416 = arith.subf %412, %415 : vector<8x8xf32>
    %417 = math.exp %416 : vector<8x8xf32>
    %cst_172 = arith.constant dense<0.000000e+00> : vector<8xf32>
    %418 = vector.multi_reduction <add>, %417, %cst_172 [1] : vector<8x8xf32> to vector<8xf32>
    %419 = vector.shape_cast %418 : vector<8xf32> to vector<8x1xf32>
    %420 = tpu.reciprocal %419 {approx = true} : vector<8x1xf32> -> vector<8x1xf32>
    %421 = vector.broadcast %420 : vector<8x1xf32> to vector<8x8xf32>
    %422 = arith.mulf %417, %421 : vector<8x8xf32>
    %423 = arith.truncf %422 : vector<8x8xf32> to vector<8x8xbf16>
    %cst_173 = arith.constant dense<0.000000e+00> : vector<8x16xf32>
    %424 = tpu.matmul %423, %409, %cst_173 {dimension_numbers = #tpu.dot_dimension_numbers<[1], [0], [0], [1], [0, 0, 1, 1], [], []>} : vector<8x8xbf16>, vector<8x16xbf16>, vector<8x16xf32> -> vector<8x16xf32>
    %425 = tpu.concatenate %370, %388, %406, %424 in 1 : vector<8x16xf32>, vector<8x16xf32>, vector<8x16xf32>, vector<8x16xf32> -> vector<8x64xf32>
    %c1_174 = arith.constant 1 : index
    %c0_175 = arith.constant 0 : index
    %c0_176 = arith.constant 0 : index
    %426 = vector.load %arg8[%c1_174, %c0_175, %c0_176] : memref<2x64x64xbf16, #tpu.memory_space<vmem>>, vector<1x64x64xbf16>
    %427 = vector.shape_cast %426 : vector<1x64x64xbf16> to vector<64x64xbf16>
    %428 = arith.truncf %425 : vector<8x64xf32> to vector<8x64xbf16>
    %cst_177 = arith.constant dense<0.000000e+00> : vector<8x64xf32>
    %429 = tpu.matmul %428, %427, %cst_177 {dimension_numbers = #tpu.dot_dimension_numbers<[1], [0], [0], [1], [0, 0, 1, 1], [], []>} : vector<8x64xbf16>, vector<64x64xbf16>, vector<8x64xf32> -> vector<8x64xf32>
    %c1_178 = arith.constant 1 : index
    %c0_179 = arith.constant 0 : index
    %c0_180 = arith.constant 0 : index
    %430 = vector.load %arg9[%c1_178, %c0_179, %c0_180] : memref<2x1x64xf32, #tpu.memory_space<vmem>>, vector<1x1x64xf32>
    %431 = vector.shape_cast %430 : vector<1x1x64xf32> to vector<1x64xf32>
    %432 = vector.broadcast %431 : vector<1x64xf32> to vector<8x64xf32>
    %433 = arith.addf %429, %432 : vector<8x64xf32>
    %434 = arith.addf %343, %433 : vector<8x64xf32>
    %c1_181 = arith.constant 1 : index
    %c0_182 = arith.constant 0 : index
    %c0_183 = arith.constant 0 : index
    %435 = vector.load %arg10[%c1_181, %c0_182, %c0_183] : memref<2x1x64xf32, #tpu.memory_space<vmem>>, vector<1x1x64xf32>
    %436 = vector.shape_cast %435 : vector<1x1x64xf32> to vector<1x64xf32>
    %c1_184 = arith.constant 1 : index
    %c0_185 = arith.constant 0 : index
    %c0_186 = arith.constant 0 : index
    %437 = vector.load %arg11[%c1_184, %c0_185, %c0_186] : memref<2x1x64xf32, #tpu.memory_space<vmem>>, vector<1x1x64xf32>
    %438 = vector.shape_cast %437 : vector<1x1x64xf32> to vector<1x64xf32>
    %cst_187 = arith.constant dense<0.000000e+00> : vector<8xf32>
    %439 = vector.multi_reduction <add>, %434, %cst_187 [1] : vector<8x64xf32> to vector<8xf32>
    %440 = vector.shape_cast %439 : vector<8xf32> to vector<8x1xf32>
    %cst_188 = arith.constant 6.400000e+01 : f32
    %441 = vector.broadcast %cst_188 : f32 to vector<8x1xf32>
    %442 = arith.divf %440, %441 : vector<8x1xf32>
    %443 = vector.broadcast %442 : vector<8x1xf32> to vector<8x64xf32>
    %444 = arith.subf %434, %443 : vector<8x64xf32>
    %445 = arith.mulf %444, %444 : vector<8x64xf32>
    %cst_189 = arith.constant dense<0.000000e+00> : vector<8xf32>
    %446 = vector.multi_reduction <add>, %445, %cst_189 [1] : vector<8x64xf32> to vector<8xf32>
    %447 = vector.shape_cast %446 : vector<8xf32> to vector<8x1xf32>
    %cst_190 = arith.constant 6.400000e+01 : f32
    %448 = vector.broadcast %cst_190 : f32 to vector<8x1xf32>
    %449 = arith.divf %447, %448 : vector<8x1xf32>
    %cst_191 = arith.constant 9.99999974E-6 : f32
    %450 = vector.broadcast %cst_191 : f32 to vector<8x1xf32>
    %451 = arith.addf %449, %450 : vector<8x1xf32>
    %452 = math.rsqrt %451 : vector<8x1xf32>
    %453 = vector.broadcast %452 : vector<8x1xf32> to vector<8x64xf32>
    %454 = arith.mulf %444, %453 : vector<8x64xf32>
    %455 = vector.broadcast %436 : vector<1x64xf32> to vector<8x64xf32>
    %456 = arith.mulf %454, %455 : vector<8x64xf32>
    %457 = vector.broadcast %438 : vector<1x64xf32> to vector<8x64xf32>
    %458 = arith.addf %456, %457 : vector<8x64xf32>
    %c1_192 = arith.constant 1 : index
    %c0_193 = arith.constant 0 : index
    %c0_194 = arith.constant 0 : index
    %459 = vector.load %arg12[%c1_192, %c0_193, %c0_194] : memref<2x64x256xbf16, #tpu.memory_space<vmem>>, vector<1x64x256xbf16>
    %460 = vector.shape_cast %459 : vector<1x64x256xbf16> to vector<64x256xbf16>
    %461 = arith.truncf %458 : vector<8x64xf32> to vector<8x64xbf16>
    %cst_195 = arith.constant dense<0.000000e+00> : vector<8x256xf32>
    %462 = tpu.matmul %461, %460, %cst_195 {dimension_numbers = #tpu.dot_dimension_numbers<[1], [0], [0], [1], [0, 0, 1, 1], [], []>} : vector<8x64xbf16>, vector<64x256xbf16>, vector<8x256xf32> -> vector<8x256xf32>
    %c1_196 = arith.constant 1 : index
    %c0_197 = arith.constant 0 : index
    %c0_198 = arith.constant 0 : index
    %463 = vector.load %arg13[%c1_196, %c0_197, %c0_198] : memref<2x1x256xf32, #tpu.memory_space<vmem>>, vector<1x1x256xf32>
    %464 = vector.shape_cast %463 : vector<1x1x256xf32> to vector<1x256xf32>
    %465 = vector.broadcast %464 : vector<1x256xf32> to vector<8x256xf32>
    %466 = arith.addf %462, %465 : vector<8x256xf32>
    %cst_199 = arith.constant 0.000000e+00 : f32
    %467 = vector.broadcast %cst_199 : f32 to vector<8x256xf32>
    %468 = arith.maximumf %466, %467 : vector<8x256xf32>
    %c1_200 = arith.constant 1 : index
    %c0_201 = arith.constant 0 : index
    %c0_202 = arith.constant 0 : index
    %469 = vector.load %arg14[%c1_200, %c0_201, %c0_202] : memref<2x256x64xbf16, #tpu.memory_space<vmem>>, vector<1x256x64xbf16>
    %470 = vector.shape_cast %469 : vector<1x256x64xbf16> to vector<256x64xbf16>
    %471 = arith.truncf %468 : vector<8x256xf32> to vector<8x256xbf16>
    %cst_203 = arith.constant dense<0.000000e+00> : vector<8x64xf32>
    %472 = tpu.matmul %471, %470, %cst_203 {dimension_numbers = #tpu.dot_dimension_numbers<[1], [0], [0], [1], [0, 0, 1, 1], [], []>} : vector<8x256xbf16>, vector<256x64xbf16>, vector<8x64xf32> -> vector<8x64xf32>
    %c1_204 = arith.constant 1 : index
    %c0_205 = arith.constant 0 : index
    %c0_206 = arith.constant 0 : index
    %473 = vector.load %arg15[%c1_204, %c0_205, %c0_206] : memref<2x1x64xf32, #tpu.memory_space<vmem>>, vector<1x1x64xf32>
    %474 = vector.shape_cast %473 : vector<1x1x64xf32> to vector<1x64xf32>
    %475 = vector.broadcast %474 : vector<1x64xf32> to vector<8x64xf32>
    %476 = arith.addf %472, %475 : vector<8x64xf32>
    %477 = arith.addf %458, %476 : vector<8x64xf32>
    %c1_207 = arith.constant 1 : index
    %c0_208 = arith.constant 0 : index
    %c0_209 = arith.constant 0 : index
    %478 = vector.load %arg16[%c1_207, %c0_208, %c0_209] : memref<2x1x64xf32, #tpu.memory_space<vmem>>, vector<1x1x64xf32>
    %479 = vector.shape_cast %478 : vector<1x1x64xf32> to vector<1x64xf32>
    %c1_210 = arith.constant 1 : index
    %c0_211 = arith.constant 0 : index
    %c0_212 = arith.constant 0 : index
    %480 = vector.load %arg17[%c1_210, %c0_211, %c0_212] : memref<2x1x64xf32, #tpu.memory_space<vmem>>, vector<1x1x64xf32>
    %481 = vector.shape_cast %480 : vector<1x1x64xf32> to vector<1x64xf32>
    %cst_213 = arith.constant dense<0.000000e+00> : vector<8xf32>
    %482 = vector.multi_reduction <add>, %477, %cst_213 [1] : vector<8x64xf32> to vector<8xf32>
    %483 = vector.shape_cast %482 : vector<8xf32> to vector<8x1xf32>
    %cst_214 = arith.constant 6.400000e+01 : f32
    %484 = vector.broadcast %cst_214 : f32 to vector<8x1xf32>
    %485 = arith.divf %483, %484 : vector<8x1xf32>
    %486 = vector.broadcast %485 : vector<8x1xf32> to vector<8x64xf32>
    %487 = arith.subf %477, %486 : vector<8x64xf32>
    %488 = arith.mulf %487, %487 : vector<8x64xf32>
    %cst_215 = arith.constant dense<0.000000e+00> : vector<8xf32>
    %489 = vector.multi_reduction <add>, %488, %cst_215 [1] : vector<8x64xf32> to vector<8xf32>
    %490 = vector.shape_cast %489 : vector<8xf32> to vector<8x1xf32>
    %cst_216 = arith.constant 6.400000e+01 : f32
    %491 = vector.broadcast %cst_216 : f32 to vector<8x1xf32>
    %492 = arith.divf %490, %491 : vector<8x1xf32>
    %cst_217 = arith.constant 9.99999974E-6 : f32
    %493 = vector.broadcast %cst_217 : f32 to vector<8x1xf32>
    %494 = arith.addf %492, %493 : vector<8x1xf32>
    %495 = math.rsqrt %494 : vector<8x1xf32>
    %496 = vector.broadcast %495 : vector<8x1xf32> to vector<8x64xf32>
    %497 = arith.mulf %487, %496 : vector<8x64xf32>
    %498 = vector.broadcast %479 : vector<1x64xf32> to vector<8x64xf32>
    %499 = arith.mulf %497, %498 : vector<8x64xf32>
    %500 = vector.broadcast %481 : vector<1x64xf32> to vector<8x64xf32>
    %501 = arith.addf %499, %500 : vector<8x64xf32>
    %c0_218 = arith.constant 0 : index
    %c0_219 = arith.constant 0 : index
    %502 = vector.load %arg18[%c0_218, %c0_219] : memref<8x64xf32, #tpu.memory_space<vmem>>, vector<8x64xf32>
    tpu.vector_store %arg18[%c0_218, %c0_219], %501 {strides = array<i32>} : memref<8x64xf32, #tpu.memory_space<vmem>>, vector<8x64xf32>,
    return
  }
  func.func @transform_0(%arg0: i32) -> (i32, i32) {
    %c0_i32 = arith.constant 0 : i32
    %c0_i32_0 = arith.constant 0 : i32
    return %arg0, %c0_i32 : i32, i32
  }
  func.func @transform_1(%arg0: i32) -> (i32, i32) {
    %c0_i32 = arith.constant 0 : i32
    %c0_i32_0 = arith.constant 0 : i32
    %c0_i32_1 = arith.constant 0 : i32
    return %c0_i32, %c0_i32_0 : i32, i32
  }
  func.func @transform_2(%arg0: i32) -> (i32, i32) {
    %c0_i32 = arith.constant 0 : i32
    %c0_i32_0 = arith.constant 0 : i32
    %c0_i32_1 = arith.constant 0 : i32
    return %c0_i32, %c0_i32_0 : i32, i32
  }
  func.func @transform_3(%arg0: i32) -> (i32, i32) {
    %c0_i32 = arith.constant 0 : i32
    %c0_i32_0 = arith.constant 0 : i32
    %c0_i32_1 = arith.constant 0 : i32
    return %c0_i32, %c0_i32_0 : i32, i32
  }
  func.func @transform_4(%arg0: i32) -> (i32, i32) {
    %c0_i32 = arith.constant 0 : i32
    %c0_i32_0 = arith.constant 0 : i32
    %c0_i32_1 = arith.constant 0 : i32
    return %c0_i32, %c0_i32_0 : i32, i32
  }
  func.func @transform_5(%arg0: i32) -> (i32, i32, i32) {
    %c0_i32 = arith.constant 0 : i32
    %c0_i32_0 = arith.constant 0 : i32
    %c0_i32_1 = arith.constant 0 : i32
    %c0_i32_2 = arith.constant 0 : i32
    return %c0_i32, %c0_i32_0, %c0_i32_1 : i32, i32, i32
  }
  func.func @transform_6(%arg0: i32) -> (i32, i32, i32) {
    %c0_i32 = arith.constant 0 : i32
    %c0_i32_0 = arith.constant 0 : i32
    %c0_i32_1 = arith.constant 0 : i32
    %c0_i32_2 = arith.constant 0 : i32
    return %c0_i32, %c0_i32_0, %c0_i32_1 : i32, i32, i32
  }
  func.func @transform_7(%arg0: i32) -> (i32, i32, i32) {
    %c0_i32 = arith.constant 0 : i32
    %c0_i32_0 = arith.constant 0 : i32
    %c0_i32_1 = arith.constant 0 : i32
    %c0_i32_2 = arith.constant 0 : i32
    return %c0_i32, %c0_i32_0, %c0_i32_1 : i32, i32, i32
  }
  func.func @transform_8(%arg0: i32) -> (i32, i32, i32) {
    %c0_i32 = arith.constant 0 : i32
    %c0_i32_0 = arith.constant 0 : i32
    %c0_i32_1 = arith.constant 0 : i32
    %c0_i32_2 = arith.constant 0 : i32
    return %c0_i32, %c0_i32_0, %c0_i32_1 : i32, i32, i32
  }
  func.func @transform_9(%arg0: i32) -> (i32, i32, i32) {
    %c0_i32 = arith.constant 0 : i32
    %c0_i32_0 = arith.constant 0 : i32
    %c0_i32_1 = arith.constant 0 : i32
    %c0_i32_2 = arith.constant 0 : i32
    return %c0_i32, %c0_i32_0, %c0_i32_1 : i32, i32, i32
  }
  func.func @transform_10(%arg0: i32) -> (i32, i32, i32) {
    %c0_i32 = arith.constant 0 : i32
    %c0_i32_0 = arith.constant 0 : i32
    %c0_i32_1 = arith.constant 0 : i32
    %c0_i32_2 = arith.constant 0 : i32
    return %c0_i32, %c0_i32_0, %c0_i32_1 : i32, i32, i32
  }
  func.func @transform_11(%arg0: i32) -> (i32, i32, i32) {
    %c0_i32 = arith.constant 0 : i32
    %c0_i32_0 = arith.constant 0 : i32
    %c0_i32_1 = arith.constant 0 : i32
    %c0_i32_2 = arith.constant 0 : i32
    return %c0_i32, %c0_i32_0, %c0_i32_1 : i32, i32, i32
  }
  func.func @transform_12(%arg0: i32) -> (i32, i32, i32) {
    %c0_i32 = arith.constant 0 : i32
    %c0_i32_0 = arith.constant 0 : i32
    %c0_i32_1 = arith.constant 0 : i32
    %c0_i32_2 = arith.constant 0 : i32
    return %c0_i32, %c0_i32_0, %c0_i32_1 : i32, i32, i32
  }
  func.func @transform_13(%arg0: i32) -> (i32, i32, i32) {
    %c0_i32 = arith.constant 0 : i32
    %c0_i32_0 = arith.constant 0 : i32
    %c0_i32_1 = arith.constant 0 : i32
    %c0_i32_2 = arith.constant 0 : i32
    return %c0_i32, %c0_i32_0, %c0_i32_1 : i32, i32, i32
  }
  func.func @transform_14(%arg0: i32) -> (i32, i32, i32) {
    %c0_i32 = arith.constant 0 : i32
    %c0_i32_0 = arith.constant 0 : i32
    %c0_i32_1 = arith.constant 0 : i32
    %c0_i32_2 = arith.constant 0 : i32
    return %c0_i32, %c0_i32_0, %c0_i32_1 : i32, i32, i32
  }
  func.func @transform_15(%arg0: i32) -> (i32, i32, i32) {
    %c0_i32 = arith.constant 0 : i32
    %c0_i32_0 = arith.constant 0 : i32
    %c0_i32_1 = arith.constant 0 : i32
    %c0_i32_2 = arith.constant 0 : i32
    return %c0_i32, %c0_i32_0, %c0_i32_1 : i32, i32, i32
  }
  func.func @transform_16(%arg0: i32) -> (i32, i32, i32) {
    %c0_i32 = arith.constant 0 : i32
    %c0_i32_0 = arith.constant 0 : i32
    %c0_i32_1 = arith.constant 0 : i32
    %c0_i32_2 = arith.constant 0 : i32
    return %c0_i32, %c0_i32_0, %c0_i32_1 : i32, i32, i32
  }
  func.func @transform_17(%arg0: i32) -> (i32, i32) {
    %c0_i32 = arith.constant 0 : i32
    %c0_i32_0 = arith.constant 0 : i32
    return %arg0, %c0_i32 : i32, i32
  }
}

</mosaic_0001>

<bundles_post_ra>
// kernel: lsm_transformer_forward.1
= control target key start
LH: loop header
LB: loop body
LE: loop exit
PB: predicated region body
PF: predicated region fallthrough
CT: control target
= control target key end

     0   :  { %s5688_s0 = inlined_call_operand.vmem [shape: f32[16,4], index: 0, kind: input, shape index: {}]   ;;  %s5689_s1 = inlined_call_operand.vmem [shape: f32[4,128], index: 1, kind: input, shape index: {}]   ;;  %s5690_s2 = inlined_call_operand.vmem [shape: f32[128,128], index: 2, kind: input, shape index: {}]   ;;  %s5691_s3 = inlined_call_operand.vmem [shape: bf16[128,64], index: 3, kind: input, shape index: {}]   ;;  %s5692_s4 = inlined_call_operand.vmem [shape: f32[1,64], index: 4, kind: input, shape index: {}]   ;;  %s5693_s5 = inlined_call_operand.vmem [shape: bf16[2,64,192], index: 5, kind: input, shape index: {}]   ;;  %s5694_s6 = inlined_call_operand.vmem [shape: f32[2,1,192], index: 6, kind: input, shape index: {}]   ;;  %s5695_s7 = inlined_call_operand.hbm [shape: bf16[2,64,64], index: 7, kind: input, shape index: {}]   ;;  %s5696_s8 = inlined_call_operand.vmem [shape: f32[2,1,64], index: 8, kind: input, shape index: {}]   ;;  %s5697_s9 = inlined_call_operand.vmem [shape: f32[2,1,64], index: 9, kind: input, shape index: {}]   ;;  %s5698_s10 = inlined_call_operand.vmem [shape: f32[2,1,64], index: 10, kind: input, shape index: {}]   ;;  %s5699_s11 = inlined_call_operand.vmem [shape: bf16[2,64,256], index: 11, kind: input, shape index: {}]   ;;  %s5700_s12 = inlined_call_operand.vmem [shape: f32[2,1,256], index: 12, kind: input, shape index: {}]   ;;  %s5701_s13 = inlined_call_operand.vmem [shape: bf16[2,256,64], index: 13, kind: input, shape index: {}]   ;;  %s5702_s14 = inlined_call_operand.vmem [shape: f32[2,1,64], index: 14, kind: input, shape index: {}]   ;;  %s5703_s15 = inlined_call_operand.vmem [shape: f32[2,1,64], index: 15, kind: input, shape index: {}]   ;;  %s5704_s16 = inlined_call_operand.vmem [shape: f32[2,1,64], index: 16, kind: input, shape index: {}]   ;;  %s5705_s17 = inlined_call_operand.hbm [shape: f32[16,64], index: 17, kind: output, shape index: {}]  }
   0x1   :  { %5722 = sst [smem:[#allocation15_spill]] %s5688_s0 }
   0x2   :  { %5723 = sst [smem:[#allocation16_spill]] %s5689_s1 }
   0x3   :  { %5724 = sst [smem:[#allocation17_spill]] %s5695_s7 }
   0x4   :  { %5725 = sst [smem:[#allocation18_spill]] %s5705_s17 }
   0x5   :  { %22 = vsyncpa [#allocation4], 0 }
   0x6   :  { %23 = vsyncpa [#allocation5], 0 }
   0x7   :  { %25 = vsyncpa [#allocation5 + $0x1], 0  ;;  %s4862_s24 = smov 0   ;;  %s4864_s25 = smov 0  }
   0x8   :  { %s4866_s26 = smov 0   ;;  %s4868_s27 = smov 0  }
   0x9 LB: > { %5726 = sst [smem:[#allocation9_spill]] %s4742_s24  ;;  %s4883_s28 = sadd.s32 4294967295, %s4754_s27   ;;  %s4754_s27 = sphi %s4868_s27, %s5751_s27   ;;  %s4750_s26 = sphi %s4866_s26, %s5753_s26   ;;  %s4746_s25 = sphi %s4864_s25, %s5755_s25   ;;  %s4742_s24 = sphi %s4862_s24, %s5754_s24  }
   0xa   : > { %5727 = sst [smem:[#allocation10_spill]] %s4750_s26  ;;  %s3489_s29 = sadd.s32 4294967294, %s4754_s27  }
   0xb   : > { %5728 = sst [smem:[#allocation11_spill]] %s4754_s27  ;;  %s4887_s0 = sadd.s32 1, %s4754_s27  }
   0xc   : > { %5729 = sst [smem:[#allocation12_spill]] %s4887_s0  ;;  %s400_s30 = sadd.s32 1, %s4750_s26 }
   0xd   : > { %s397_s18 = ssub.s32 %s4754_s27, %s4887_s0  ;;  %p410_p0 = scmp.ne.s32.totalorder %s4750_s26, %s4746_s25 }
   0xe   : > { %p398_p1 = scmp.eq.s32.totalorder %s397_s18, 0  ;;  %p411_p2 = scmp.eq.s32.totalorder %s4883_s28, 1 }
   0xf   : > { %p416_p3 = scmp.ne.s32.totalorder %s4746_s25, %s4742_s24  ;;  %p417_p4 = scmp.eq.s32.totalorder %s3489_s29, 1 }
  0x10   : > { %s4898_s19 = scalar_select %p398_p1, %s4750_s26, %s400_s30  }
  0x11   : > { %p4900_p5 = por %p411_p2, %p410_p0  ;;  %p4904_p6 = por %p417_p4, %p416_p3 }
  0x12   : > { %5730 = sst [smem:[#allocation13_spill]] %s4898_s19  ;;  %p3490_p7 = scmp.ge.s32.totalorder %s4754_s27, 1 }
  0x13   : > { %s5731_s1 = scalar_select %p4900_p5, 1, 0 }
  0x14   : > { %s5732_s20 = scalar_select %p4904_p6, 1, 0 }
  0x15   : > { %p424_p8 = scmp.lt.s32.totalorder %s4754_s27, 3  ;;  %p5711_p9 = scmp.eq.s32.totalorder %s4883_s28, 0 }
  0x16   : > { %5733 = sst [smem:[#allocation14_spill]] %s5732_s20  ;;  %s4756_s22 = smov [#allocation3]  }
  0x17   : > { %p4911_p10 = pnand %p3490_p7, %p424_p8  ;;  %s454_s23 = sshll.u32 %s4756_s22, 4  ;;  %s455_s23 = int_to_ptr.vmem [resolvable:$true] %s454_s23 }
  0x18   : > { %s5736_s7 = sld [smem:[#allocation17_spill]] }
  0x19   : > { %s5734_s21 = scalar_select %p4911_p10, 1, 0 }
  0x1a   : > { %p4466_p11 = pneg %p4911_p10 }
  0x1c   : > { %p4919_p12 = pnand %p5711_p9, %p4466_p11 }
  0x1e   : > { %s4660_s19 = scalar_lea.hbm %s5736_s7, 1024  ;;  %p4662_p0 = pneg %p4919_p12 }
  0x1f   : > { %p4661_p13 = scmp.ne.s32.totalorder %s5736_s7, %s4660_s19  ;;  %p4667_p3 = scmp.lt.u32.totalorder %s4660_s19, %s5736_s7 }
  0x21   : > { %p4663_p1 = pnand %p4662_p0, %p4661_p13 }
  0x23   : > { %p4664_p2 = pneg %p4663_p1 }
  0x25   : > { %p4669_p4 = pnand %p4667_p3, %p4664_p2 }
  0x27   : > { %4672 = shalt.err (!%p4669_p4)
}
  0x28   : > { %s4673_s24 = scalar_lea.vmem %s455_s23, 1024  ;;  %p4681_p9 = scmp.lt.s32.totalorder %s455_s23, %s455_s23 }
  0x29   : > { %p4674_p7 = scmp.ne.s32.totalorder %s455_s23, %s4673_s24  ;;  %p4682_p6 = scmp.lt.s32.totalorder %s4673_s24, %s4673_s24 }
  0x2b   : > { %p4676_p8 = pnand %p4674_p7, %p4662_p0  ;;  %p4683_p5 = por %p4682_p6, %p4681_p9 }
  0x2d   : > { %p4677_p11 = pneg %p4676_p8 }
  0x2f   : > { %p4684_p10 = pnand %p4683_p5, %p4677_p11 }
  0x31   : > { %4687 = shalt.err (!%p4684_p10)
}
  0x32   : > { %s4757_s26 = smov 64   ;;  %s4758_s0 = smov 4  }
  0x33   : > { %4469 = dma.hbm_to_vmem [thread:$0]  (!%p4919_p12), %s5736_s7, 1024, %s455_s23, [#allocation4], %s4757_s26, %s4757_s26, %s4758_s0  }
  0x34   : > { %p5737_p13 = scmp.ne.s32.totalorder %s5734_s21, 0 }
  0x35   : > { %p5738_p1 = scmp.eq.s32.totalorder (!%p5737_p13), %s4883_s28, 0 }
  0x36   : > { %504 = sbr.rel (%p5737_p13) target bundleno = 6324 (0x18b4), region = 88 }
  0x3d   : > { %4733 = dma.done.wait (%p5738_p1), [#allocation4], 1024   ;;  %p5739_p0 = pmov %p5738_p1 }
  0x3e   : > { %v4759_v0 = vmov 0.0   ;;  %vm4760_vm0 = vmmov 0   ;;  %p555_p5 = scmp.lt.s32.totalorder %s4883_s28, 1  ;;  %v4761_v1 = vmov 0.0|0.0   ;;  %vm566_vm1 = vcmask 1043456   ;;  %s5740_s23 = sld [smem:[#allocation15_spill]] }
  0x3f   : > { %4735 = vsyncadd (%p5739_p0), [#allocation4], 4294966272  ;;  %3902 = vmatprep.subr.mxu0 %v4759_v0  ;;  %735 = vst [vmem:[#allocation2] sm:$0x1] %v4759_v0  ;;  %3904 = vmatprep.mubr.msk.f32.mxu0 %vm4760_vm0, %v4759_v0  ;;  %vm562_vm2 = vcmask 31744   ;;  %s5741_s0 = sld [smem:[#allocation16_spill]] }
  0x40   : > { %4292 = vmatprep.subr.bf16.mxu1 %v4761_v1  ;;  %3939 = vmatprep.mubr.msk.f32.mxu1 %vm4760_vm0, %v4759_v0  ;;  %s556_s24 = scalar_select %p555_p5, %s4883_s28, 1  ;;  %v640_v4 = vld [vmem:[%s5690_s2] sm:$0xff]  ;;  %v641_v5 = vld [vmem:[%s5690_s2 + $0x8] sm:$0xff]  ;;  %v642_v6 = vld [vmem:[%s5690_s2 + $0x10] sm:$0xff]  ;;  %v4762_v41 = vmov 1.0   ;;  %vm1464_vm10 = vcmask 523264  }
  0x41   : > { %v643_v7 = vld [vmem:[%s5690_s2 + $0x18] sm:$0xff]  ;;  %v4974_v8 = vpack.c.bf16 %v641_v5, %v640_v4  ;;  %v644_v10 = vld [vmem:[%s5690_s2 + $0x20] sm:$0xff]  ;;  %v645_v11 = vld [vmem:[%s5690_s2 + $0x28] sm:$0xff]  ;;  %s4766_s22 = smov 32   ;;  %s4767_s26 = smov 48   ;;  %vm1514_vm11 = vcmask 130048  }
  0x42   : > { %s3496_s19 = sshll.u32 %s556_s24, 3  ;;  %v4980_v9 = vpack.c.bf16 %v643_v7, %v642_v6  ;;  %v646_v12 = vld [vmem:[%s5690_s2 + $0x30] sm:$0xff]  ;;  %v647_v13 = vld [vmem:[%s5690_s2 + $0x38] sm:$0xff]  ;;  %v4998_v14 = vpack.c.bf16 %v645_v11, %v644_v10  ;;  %v648_v15 = vld [vmem:[%s5690_s2 + $0x40] sm:$0xff]  ;;  %s5720_s30 = smov 96   ;;  %vm1562_vm12 = vcmask 64512  }
  0x43   : > { %4294 = vmatpush3.bf16.msra.mxu1 %v4974_v8  ;;  %v649_v16 = vld [vmem:[%s5690_s2 + $0x48] sm:$0xff]  ;;  %v5010_v17 = vpack.c.bf16 %v647_v13, %v646_v12  ;;  %v650_v18 = vld [vmem:[%s5690_s2 + $0x50] sm:$0xff]  ;;  %v651_v19 = vld [vmem:[%s5690_s2 + $0x58] sm:$0xff]  ;;  %s5716_s18 = smov 80   ;;  %vm1968_vm13 = vcmask 261120   ;;  %vm1970_vm14 = vcmask 392192  }
  0x44   : > { %s558_s29 = scalar_lea.vmem %s5740_s23, %s3496_s19  ;;  %4295 = vmatprep.subr.bf16.mxu1 %v4761_v1  ;;  %v5022_v20 = vpack.c.bf16 %v649_v16, %v648_v15  ;;  %v652_v21 = vld [vmem:[%s5690_s2 + $0x60] sm:$0xff]  ;;  %v653_v22 = vld [vmem:[%s5690_s2 + $0x68] sm:$0xff]  ;;  %v5034_v23 = vpack.c.bf16 %v651_v19, %v650_v18  ;;  %v654_v24 = vld [vmem:[%s5690_s2 + $0x70] sm:$0xff]  ;;  %s4764_s23 = smov 112  }
  0x45   : > { %v561_v2 = vld [vmem:[%s5741_s0] sm:$0xf]  ;;  %v655_v25 = vld [vmem:[%s5690_s2 + $0x78] sm:$0xff]  ;;  %v5046_v26 = vpack.c.bf16 %v653_v22, %v652_v21  ;;  %s5718_s0 = smov 16   ;;  %s5744_s20 = smov 80  }
  0x46   : > { %v560_v3 = vld [vmem:[%s558_s29] sm:$0xff]  ;;  %3903 = vmatpush3.msk.msra.mxu0 %vm566_vm1, %v561_v2  ;;  %v5052_v27 = vpack.c.bf16 %v655_v25, %v654_v24  ;;  %s4765_s29 = smov 64   ;;  %s3683_s24 = sshll.u32 %s4883_s28, 7 }
  0x47   : > { %4316 = vmatprep.subr.bf16.mxu0 %v4761_v1  ;;  %3905 = vmatmul.mubr.msk.f32.vlgmr.msra.gmra.mrb[0].mxu0 %vm562_vm2, %v560_v3  ;;  %p5746_p9 = scmp.ne.s32.totalorder %s5731_s1, 0  ;;  %s4771_s28 = smov [#allocation6]  }
  0x48   : > { %3974 = vmatprep.mubr.msk.f32.mxu0 %vm4760_vm0, %v4759_v0  ;;  %4318 = vmatpush3.bf16.msra.mxu0 %v4974_v8 }
  0x49   : > { %4319 = vmatprep.subr.bf16.mxu0 %v4761_v1  ;;  %4297 = vmatpush3.bf16.msra.mxu1 %v4980_v9 }
  0x4a   : > { %4298 = vmatprep.subr.bf16.mxu1 %v4761_v1 }
  0x4c   : > { %4321 = vmatpush3.bf16.msra.mxu0 %v4980_v9 }
  0x4d   : > { %4322 = vmatprep.subr.bf16.mxu0 %v4761_v1  ;;  %4300 = vmatpush3.bf16.msra.mxu1 %v4998_v14 }
  0x4e   : > { %4301 = vmatprep.subr.bf16.mxu1 %v4761_v1 }
  0x50   : > { %4324 = vmatpush3.bf16.msra.mxu0 %v4998_v14 }
  0x51   : > { %4325 = vmatprep.subr.bf16.mxu0 %v4761_v1  ;;  %4303 = vmatpush3.bf16.msra.mxu1 %v5010_v17 }
  0x52   : > { %4304 = vmatprep.subr.bf16.mxu1 %v4761_v1 }
  0x54   : > { %4327 = vmatpush3.bf16.msra.mxu0 %v5010_v17 }
  0x55   : > { %4328 = vmatprep.subr.bf16.mxu0 %v4761_v1  ;;  %4306 = vmatpush3.bf16.msra.mxu1 %v5022_v20 }
  0x56   : > { %4307 = vmatprep.subr.bf16.mxu1 %v4761_v1 }
  0x58   : > { %4330 = vmatpush3.bf16.msra.mxu0 %v5022_v20 }
  0x59   : > { %4331 = vmatprep.subr.bf16.mxu0 %v4761_v1  ;;  %4309 = vmatpush3.bf16.msra.mxu1 %v5034_v23 }
  0x5a   : > { %4310 = vmatprep.subr.bf16.mxu1 %v4761_v1 }
  0x5c   : > { %4333 = vmatpush3.bf16.msra.mxu0 %v5034_v23 }
  0x5d   : > { %4334 = vmatprep.subr.bf16.mxu0 %v4761_v1  ;;  %4312 = vmatpush3.bf16.msra.mxu1 %v5046_v26 }
  0x5e   : > { %4313 = vmatprep.subr.bf16.mxu1 %v4761_v1 }
  0x60   : > { %4336 = vmatpush3.bf16.msra.mxu0 %v5046_v26 }
  0x61   : > { %4337 = vmatprep.subr.bf16.mxu0 %v4761_v1  ;;  %4315 = vmatpush3.bf16.msra.mxu1 %v5052_v27 }
  0x62   : > { %4340 = vmatprep.subr.bf16.mxu1 %v4761_v1 }
  0x64   : > { %4339 = vmatpush3.bf16.msra.mxu0 %v5052_v27  ;;  %3940 = vmatmul.mubr.f32.vlgmr.msra.gmra.mrb[0].mxu1 %v4759_v0 }
  0x65   : > { %4364 = vmatprep.subr.bf16.mxu0 %v4761_v1  ;;  %4342 = vmatpush3.bf16.msra.mxu1 %v4974_v8 }
  0x66   : > { %4343 = vmatprep.subr.bf16.mxu1 %v4761_v1  ;;  %4009 = vmatprep.mubr.msk.f32.mxu1 %vm4760_vm0, %v4759_v0 }
  0x67   : > { %3975 = vmatmul.mubr.f32.vlgmr.msra.gmra.mrb[2].mxu0 %v4759_v0 }
  0x68   : > { %4366 = vmatpush3.bf16.msra.mxu0 %v4974_v8  ;;  %4044 = vmatprep.mubr.msk.f32.mxu0 %vm4760_vm0, %v4759_v0 }
  0x69   : > { %4367 = vmatprep.subr.bf16.mxu0 %v4761_v1  ;;  %4345 = vmatpush3.bf16.msra.mxu1 %v4980_v9 }
  0x6a   : > { %4346 = vmatprep.subr.bf16.mxu1 %v4761_v1 }
  0x6c   : > { %4369 = vmatpush3.bf16.msra.mxu0 %v4980_v9 }
  0x6d   : > { %4370 = vmatprep.subr.bf16.mxu0 %v4761_v1  ;;  %4348 = vmatpush3.bf16.msra.mxu1 %v4998_v14 }
  0x6e   : > { %4349 = vmatprep.subr.bf16.mxu1 %v4761_v1 }
  0x70   : > { %4372 = vmatpush3.bf16.msra.mxu0 %v4998_v14 }
  0x71   : > { %4373 = vmatprep.subr.bf16.mxu0 %v4761_v1  ;;  %4351 = vmatpush3.bf16.msra.mxu1 %v5010_v17 }
  0x72   : > { %4352 = vmatprep.subr.bf16.mxu1 %v4761_v1 }
  0x74   : > { %4375 = vmatpush3.bf16.msra.mxu0 %v5010_v17 }
  0x75   : > { %4376 = vmatprep.subr.bf16.mxu0 %v4761_v1  ;;  %4354 = vmatpush3.bf16.msra.mxu1 %v5022_v20 }
  0x76   : > { %4355 = vmatprep.subr.bf16.mxu1 %v4761_v1 }
  0x78   : > { %4378 = vmatpush3.bf16.msra.mxu0 %v5022_v20 }
  0x79   : > { %4379 = vmatprep.subr.bf16.mxu0 %v4761_v1  ;;  %4357 = vmatpush3.bf16.msra.mxu1 %v5034_v23 }
  0x7a   : > { %4358 = vmatprep.subr.bf16.mxu1 %v4761_v1 }
  0x7c   : > { %4381 = vmatpush3.bf16.msra.mxu0 %v5034_v23 }
  0x7d   : > { %4382 = vmatprep.subr.bf16.mxu0 %v4761_v1  ;;  %4360 = vmatpush3.bf16.msra.mxu1 %v5046_v26 }
  0x7e   : > { %4361 = vmatprep.subr.bf16.mxu1 %v4761_v1 }
  0x80   : > { %4384 = vmatpush3.bf16.msra.mxu0 %v5046_v26 }
  0x81   : > { %4385 = vmatprep.subr.bf16.mxu0 %v4761_v1  ;;  %4363 = vmatpush3.bf16.msra.mxu1 %v5052_v27 }
  0x82   : > { %4388 = vmatprep.subr.bf16.mxu1 %v4761_v1 }
  0x84   : > { %4387 = vmatpush3.bf16.msra.mxu0 %v5052_v27 }
  0x85   : > { %4412 = vmatprep.subr.bf16.mxu0 %v4761_v1 }
 0x11a   : > { %v5098_v28 = vpop.f32.mrb[0].mxu0 }
 0x11b   : > { %v3906_v29 = vpop.f32.mrb[1].mxu0 }
 0x137   : > { %v722_v30 = vpop.f32.mrb[0].mxu1 }
 0x138   : > { %v726_v32 = vadd.f32 %v722_v30, %v5098_v28  ;;  %v3941_v34 = vpop.f32.mrb[1].mxu1 }
 0x13a   : > { %v802_v31 = vpop.f32.mrb[2].mxu0  ;;  %v812_v36 = vmul.f32 0.004, %v726_v32  ;;  %v814_v38 = vmul.f32 0.8, %v726_v32 }
 0x13b   : > { %v807_v33 = vrot.slane %v802_v31, 7  ;;  %v3976_v35 = vpop.f32.mrb[3].mxu0 }
 0x13c   : > { %vm815_vm3 = vcmp.gt.f32.partialorder %v812_v36, 0.1 }
 0x13d   : > { %v809_v37 = vadd.f32 %v807_v33, %v5098_v28  ;;  %v3499_v40 = vsel %vm815_vm3, 1.0, %v4759_v0  ;;  %4010 = vmatmul.mubr.msk.f32.vlgmr.msra.gmra.mrb[2].mxu1 %vm815_vm3, %v4762_v41 }
 0x13e   : > { %v818_v42 = vsub.f32 1.0, %v3499_v40  ;;  %826 = vst [vmem:[#allocation2 + $0x1] sm:$0x1] %v3499_v40  ;;  %4390 = vmatpush3.bf16.msra.mxu1 %v4974_v8  ;;  %4079 = vmatprep.mubr.msk.f32.mxu1 %vm4760_vm0, %v4759_v0  ;;  %v820_v45 = vmul.f32 0.0, %v3499_v40 }
 0x13f   : > { %v823_v39 = vrot.slane %v809_v37, 1  ;;  %4391 = vmatprep.subr.bf16.mxu1 %v4761_v1 }
 0x140   : > { %v819_v44 = vmul.f32 %v818_v42, %v812_v36 }
 0x141   : > { %v825_v43 = vadd.f32 %v823_v39, %v814_v38 }
 0x142   : > { %v821_v46 = vadd.f32 %v820_v45, %v819_v44  ;;  %4393 = vmatpush3.bf16.msra.mxu1 %v4980_v9 }
 0x143   : > { %4394 = vmatprep.subr.bf16.mxu1 %v4761_v1  ;;  %v905_v60 = vmul.f32 0.8, %v825_v43 }
 0x144   : > { %v901_v47 = vsub.f32 0.0, %v821_v46 }
 0x146   : > { %v902_v48 = vadd.f32 %v901_v47, %v825_v43  ;;  %4396 = vmatpush3.bf16.msra.mxu1 %v4998_v14 }
 0x147   : > { %4397 = vmatprep.subr.bf16.mxu1 %v4761_v1 }
 0x148   : > { %v903_v49 = vmul.f32 0.004, %v902_v48 }
 0x14a   : > { %v904_v50 = vadd.f32 %v903_v49, %v821_v46  ;;  %4399 = vmatpush3.bf16.msra.mxu1 %v5010_v17 }
 0x14b   : > { %4400 = vmatprep.subr.bf16.mxu1 %v4761_v1 }
 0x14c   : > { %vm906_vm4 = vcmp.gt.f32.partialorder %v904_v50, 0.1 }
 0x14d   : > { %v3501_v51 = vsel %vm906_vm4, 1.0, %v4759_v0  ;;  %4045 = vmatmul.mubr.msk.f32.vlgmr.msra.gmra.mrb[4].mxu0 %vm906_vm4, %v4762_v41 }
 0x14e   : > { %v909_v52 = vsub.f32 1.0, %v3501_v51  ;;  %917 = vst [vmem:[#allocation2 + $0x2] sm:$0x1] %v3501_v51  ;;  %4402 = vmatpush3.bf16.msra.mxu1 %v5022_v20  ;;  %4414 = vmatpush3.bf16.msra.mxu0 %v4974_v8  ;;  %v911_v54 = vmul.f32 0.0, %v3501_v51 }
 0x14f   : > { %4403 = vmatprep.subr.bf16.mxu1 %v4761_v1  ;;  %4415 = vmatprep.subr.bf16.mxu0 %v4761_v1 }
 0x150   : > { %v910_v53 = vmul.f32 %v909_v52, %v904_v50  ;;  %4114 = vmatprep.mubr.msk.f32.mxu0 %vm4760_vm0, %v4759_v0 }
 0x152   : > { %v912_v55 = vadd.f32 %v911_v54, %v910_v53  ;;  %4405 = vmatpush3.bf16.msra.mxu1 %v5034_v23  ;;  %4417 = vmatpush3.bf16.msra.mxu0 %v4980_v9 }
 0x153   : > { %4406 = vmatprep.subr.bf16.mxu1 %v4761_v1  ;;  %4418 = vmatprep.subr.bf16.mxu0 %v4761_v1 }
 0x154   : > { %v992_v63 = vsub.f32 0.0, %v912_v55 }
 0x156   : > { %4408 = vmatpush3.bf16.msra.mxu1 %v5046_v26  ;;  %4420 = vmatpush3.bf16.msra.mxu0 %v4998_v14 }
 0x157   : > { %4409 = vmatprep.subr.bf16.mxu1 %v4761_v1  ;;  %4421 = vmatprep.subr.bf16.mxu0 %v4761_v1 }
 0x15a   : > { %4411 = vmatpush3.bf16.msra.mxu1 %v5052_v27  ;;  %4423 = vmatpush3.bf16.msra.mxu0 %v5010_v17 }
 0x15b   : > { %4424 = vmatprep.subr.bf16.mxu0 %v4761_v1  ;;  %4436 = vmatprep.subr.bf16.mxu1 %v4761_v1 }
 0x15e   : > { %4426 = vmatpush3.bf16.msra.mxu0 %v5022_v20 }
 0x15f   : > { %4427 = vmatprep.subr.bf16.mxu0 %v4761_v1 }
 0x162   : > { %4429 = vmatpush3.bf16.msra.mxu0 %v5034_v23 }
 0x163   : > { %4430 = vmatprep.subr.bf16.mxu0 %v4761_v1 }
 0x166   : > { %4432 = vmatpush3.bf16.msra.mxu0 %v5046_v26 }
 0x167   : > { %4433 = vmatprep.subr.bf16.mxu0 %v4761_v1 }
 0x16a   : > { %4435 = vmatpush3.bf16.msra.mxu0 %v5052_v27 }
 0x16b   : > { %4152 = vmatprep.subr.bf16.mxu0 %v4759_v0 }
 0x210   : > { %v893_v56 = vpop.f32.mrb[2].mxu1 }
 0x211   : > { %v898_v57 = vrot.slane %v893_v56, 6  ;;  %v4011_v58 = vpop.f32.mrb[3].mxu1 }
 0x213   : > { %v900_v59 = vadd.f32 %v898_v57, %v5098_v28 }
 0x215   : > { %v914_v61 = vrot.slane %v900_v59, 2  ;;  %v4525_v59 = vld [vmem:[%s5691_s3 + $0x8] sm:$0xff]  }
 0x217   : > { %v916_v62 = vadd.f32 %v914_v61, %v905_v60  ;;  %v4526_v60 = vld [vmem:[%s5691_s3 + $0x10] sm:$0xff]   ;;  %v4527_v61 = vld [vmem:[%s5691_s3 + $0x18] sm:$0xff]  }
 0x219   : > { %v993_v2 = vadd.f32 %v992_v63, %v916_v62  ;;  %v996_v16 = vmul.f32 0.8, %v916_v62  ;;  %v4528_v62 = vld [vmem:[%s5691_s3 + $0x20] sm:$0xff]   ;;  %v4529_v63 = vld [vmem:[%s5691_s3 + $0x28] sm:$0xff]  }
 0x21b   : > { %v994_v3 = vmul.f32 0.004, %v993_v2  ;;  %v4530_v2 = vld [vmem:[%s5691_s3 + $0x30] sm:$0xff]  }
 0x21d   : > { %v995_v4 = vadd.f32 %v994_v3, %v912_v55  ;;  %v4531_v3 = vld [vmem:[%s5691_s3 + $0x38] sm:$0xff]  }
 0x21f   : > { %vm997_vm5 = vcmp.gt.f32.partialorder %v995_v4, 0.1 }
 0x220   : > { %v984_v5 = vpop.f32.mrb[4].mxu0  ;;  %v3503_v6 = vsel %vm997_vm5, 1.0, %v4759_v0  ;;  %4080 = vmatmul.mubr.msk.f32.vlgmr.msra.gmra.mrb[4].mxu1 %vm997_vm5, %v4762_v41 }
 0x221   : > { %v989_v7 = vrot.slane %v984_v5, 5  ;;  %v1000_v10 = vsub.f32 1.0, %v3503_v6  ;;  %1008 = vst [vmem:[#allocation2 + $0x3] sm:$0x1] %v3503_v6  ;;  %v4046_v11 = vpop.f32.mrb[5].mxu0  ;;  %4438 = vmatpush3.bf16.msra.mxu1 %v4974_v8  ;;  %4149 = vmatprep.mubr.msk.f32.mxu1 %vm4760_vm0, %v4759_v0  ;;  %v1002_v15 = vmul.f32 0.0, %v3503_v6 }
 0x222   : > { %4439 = vmatprep.subr.bf16.mxu1 %v4761_v1 }
 0x223   : > { %v991_v12 = vadd.f32 %v989_v7, %v5098_v28  ;;  %v1001_v13 = vmul.f32 %v1000_v10, %v995_v4  ;;  %v4534_v4 = vld [vmem:[%s5693_s5 + $0x4] ss:$8 sps:$4 sm:$0xff]  }
 0x225   : > { %v1005_v18 = vrot.slane %v991_v12, 3  ;;  %v1003_v19 = vadd.f32 %v1002_v15, %v1001_v13  ;;  %4441 = vmatpush3.bf16.msra.mxu1 %v4980_v9 }
 0x226   : > { %4442 = vmatprep.subr.bf16.mxu1 %v4761_v1 }
 0x227   : > { %v1007_v21 = vadd.f32 %v1005_v18, %v996_v16  ;;  %v1083_v22 = vsub.f32 0.0, %v1003_v19 }
 0x229   : > { %v1084_v24 = vadd.f32 %v1083_v22, %v1007_v21  ;;  %4444 = vmatpush3.bf16.msra.mxu1 %v4998_v14  ;;  %v1087_v34 = vmul.f32 0.8, %v1007_v21 }
 0x22a   : > { %4445 = vmatprep.subr.bf16.mxu1 %v4761_v1 }
 0x22b   : > { %v1085_v8 = vmul.f32 0.004, %v1084_v24  ;;  %v4532_v24 = vld [vmem:[%s5693_s5] ss:$8 sps:$4 sm:$0xff]  }
 0x22d   : > { %v1086_v25 = vadd.f32 %v1085_v8, %v1003_v19  ;;  %4447 = vmatpush3.bf16.msra.mxu1 %v5010_v17  ;;  %v4524_v17 = vld [vmem:[%s5691_s3] sm:$0xff]  }
 0x22e   : > { %4448 = vmatprep.subr.bf16.mxu1 %v4761_v1 }
 0x22f   : > { %vm1088_vm6 = vcmp.gt.f32.partialorder %v1086_v25, 0.1 }
 0x230   : > { %v3505_v29 = vsel %vm1088_vm6, 1.0, %v4759_v0  ;;  %4115 = vmatmul.mubr.msk.f32.vlgmr.msra.gmra.mrb[6].mxu0 %vm1088_vm6, %v4762_v41 }
 0x231   : > { %v1091_v9 = vsub.f32 1.0, %v3505_v29  ;;  %1099 = vst [vmem:[#allocation2 + $0x4] sm:$0x1] %v3505_v29  ;;  %4450 = vmatpush3.bf16.msra.mxu1 %v5022_v20  ;;  %4168 = vmatprep.mubr.msk.bf16.mxu0 %vm4760_vm0, %v4759_v0  ;;  %v1093_v30 = vmul.f32 0.0, %v3505_v29  ;;  %v4540_v29 = vld [vmem:[%s5693_s5 + $0x24] ss:$8 sps:$4 sm:$0xff]  }
 0x232   : > { %4451 = vmatprep.subr.bf16.mxu1 %v4761_v1  ;;  %4153 = vmatpush3.bf16.msra.mxu0 %v4524_v17  ;;  %v3511_v17 = vld [vmem:[%s5692_s4] ss:$0 sm:$0xff] }
 0x233   : > { %v1092_v14 = vmul.f32 %v1091_v9, %v1086_v25  ;;  %4154 = vmatprep.subr.bf16.mxu0 %v4759_v0  ;;  %v4535_v25 = vld [vmem:[%s5693_s5 + $0x10] ss:$8 sps:$4 sm:$0xff]   ;;  %v4538_v9 = vld [vmem:[%s5693_s5 + $0x20] ss:$8 sps:$4 sm:$0xff]  }
 0x235   : > { %v1094_v31 = vadd.f32 %v1093_v30, %v1092_v14  ;;  %4453 = vmatpush3.bf16.msra.mxu1 %v5034_v23  ;;  %v4543_v14 = vld [vmem:[%s5693_s5 + $0x34] ss:$8 sps:$4 sm:$0xff]   ;;  %v4541_v30 = vld [vmem:[%s5693_s5 + $0x30] ss:$8 sps:$4 sm:$0xff]  }
 0x236   : > { %4454 = vmatprep.subr.bf16.mxu1 %v4761_v1  ;;  %4155 = vmatpush3.bf16.msra.mxu0 %v4525_v59 }
 0x237   : > { %4156 = vmatprep.subr.bf16.mxu0 %v4759_v0 }
 0x239   : > { %4456 = vmatpush3.bf16.msra.mxu1 %v5046_v26 }
 0x23a   : > { %4457 = vmatprep.subr.bf16.mxu1 %v4761_v1  ;;  %v1174_v1 = vsub.f32 0.0, %v1094_v31  ;;  %4157 = vmatpush3.bf16.msra.mxu0 %v4526_v60 }
 0x23b   : > { %4158 = vmatprep.subr.bf16.mxu0 %v4759_v0 }
 0x23d   : > { %4459 = vmatpush3.bf16.msra.mxu1 %v5052_v27 }
 0x23e   : > { %4184 = vmatprep.subr.bf16.mxu1 %v4759_v0  ;;  %4159 = vmatpush3.bf16.msra.mxu0 %v4527_v61 }
 0x23f   : > { %4160 = vmatprep.subr.bf16.mxu0 %v4759_v0 }
 0x242   : > { %4161 = vmatpush3.bf16.msra.mxu0 %v4528_v62 }
 0x243   : > { %4162 = vmatprep.subr.bf16.mxu0 %v4759_v0 }
 0x246   : > { %4163 = vmatpush3.bf16.msra.mxu0 %v4529_v63 }
 0x247   : > { %4164 = vmatprep.subr.bf16.mxu0 %v4759_v0 }
 0x24a   : > { %4165 = vmatpush3.bf16.msra.mxu0 %v4530_v2 }
 0x24b   : > { %4166 = vmatprep.subr.bf16.mxu0 %v4759_v0 }
 0x24e   : > { %4167 = vmatpush3.bf16.msra.mxu0 %v4531_v3 }
 0x24f   : > { %1468 = vmatprep.subr.bf16.mxu0 %v4534_v4 }
 0x2f3   : > { %v1075_v20 = vpop.f32.mrb[4].mxu1 }
 0x2f4   : > { %v1080_v32 = vrot.slane %v1075_v20, 4  ;;  %v4081_v23 = vpop.f32.mrb[5].mxu1 }
 0x2f6   : > { %v1082_v33 = vadd.f32 %v1080_v32, %v5098_v28 }
 0x2f8   : > { %v1096_v26 = vrot.slane %v1082_v33, 4 }
 0x2fa   : > { %v1098_v35 = vadd.f32 %v1096_v26, %v1087_v34 }
 0x2fc   : > { %v1175_v36 = vadd.f32 %v1174_v1, %v1098_v35  ;;  %v1178_v47 = vmul.f32 0.8, %v1098_v35  ;;  %v1414_v35 = vlaneseq }
 0x2fe   : > { %v1176_v27 = vmul.f32 0.004, %v1175_v36  ;;  %v1415_v1 = vshrl.u32 %v1414_v35, 7 }
 0x300   : > { %v1177_v37 = vadd.f32 %v1176_v27, %v1094_v31  ;;  %v4763_v31 = vmov 0   ;;  %v5244_v36 = vsub.s32 0, %v1415_v1  ;;  %v1412_v27 = vld [vmem:[%s5694_s6] sm:$0x3] }
 0x302   : > { %vm1179_vm7 = vcmp.gt.f32.partialorder %v1177_v37, 0.1 }
 0x303   : > { %v1166_v38 = vpop.f32.mrb[6].mxu0  ;;  %v3507_v39 = vsel %vm1179_vm7, 1.0, %v4759_v0  ;;  %4150 = vmatmul.mubr.msk.f32.vlgmr.msra.gmra.mrb[6].mxu1 %vm1179_vm7, %v4762_v41 }
 0x304   : > { %v1171_v40 = vrot.slane %v1166_v38, 3  ;;  %v1182_v42 = vsub.f32 1.0, %v3507_v39  ;;  %1190 = vst [vmem:[#allocation2 + $0x5] sm:$0x1] %v3507_v39  ;;  %v4116_v43 = vpop.f32.mrb[7].mxu0  ;;  %4186 = vmatprep.mubr.msk.bf16.mxu1 %vm4760_vm0, %v4759_v0  ;;  %v1184_v46 = vmul.f32 0.0, %v3507_v39 }
 0x306   : > { %v1173_v44 = vadd.f32 %v1171_v40, %v5098_v28  ;;  %v1183_v45 = vmul.f32 %v1182_v42, %v1177_v37  ;;  %v1417_v37 = vrot.slane %v1412_v27, %v5244_v36 }
 0x308   : > { %v1187_v48 = vrot.slane %v1173_v44, 5  ;;  %v1185_v49 = vadd.f32 %v1184_v46, %v1183_v45  ;;  %v5257_v45 = vsub.s32 1, %v1415_v1 }
 0x30a   : > { %v1189_v50 = vadd.f32 %v1187_v48, %v1178_v47  ;;  %v1265_v51 = vsub.f32 0.0, %v1185_v49  ;;  %v1421_v46 = vrot.slane %v1412_v27, %v5257_v45 }
 0x30c   : > { %v1266_v52 = vadd.f32 %v1265_v51, %v1189_v50  ;;  %v1269_v11 = vmul.f32 0.8, %v1189_v50 }
 0x30e   : > { %v1267_v53 = vmul.f32 0.004, %v1266_v52 }
 0x310   : > { %v1268_v54 = vadd.f32 %v1267_v53, %v1185_v49 }
 0x312   : > { %vm1270_vm8 = vcmp.gt.f32.partialorder %v1268_v54, 0.1 }
 0x313   : > { %v3509_v41 = vsel %vm1270_vm8, 1.0, %v4759_v0 }
 0x314   : > { %v1273_v55 = vsub.f32 1.0, %v3509_v41  ;;  %1281 = vst [vmem:[#allocation2 + $0x6] sm:$0x1] %v3509_v41  ;;  %v1275_v57 = vmul.f32 0.0, %v3509_v41 }
 0x316   : > { %v1274_v56 = vmul.f32 %v1273_v55, %v1268_v54 }
 0x318   : > { %v1276_v58 = vadd.f32 %v1275_v57, %v1274_v56 }
 0x31a   : > { %v1282_v15 = vsub.f32 0.0, %v1276_v58 }
 0x3d6   : > { %v1257_v5 = vpop.f32.mrb[6].mxu1 }
 0x3d7   : > { %v1262_v6 = vrot.slane %v1257_v5, 2  ;;  %v4151_v7 = vpop.f32.mrb[7].mxu1 }
 0x3d9   : > { %v1264_v10 = vadd.f32 %v1262_v6, %v5098_v28  ;;  %v4537_v28 = vld [vmem:[%s5693_s5 + $0x14] ss:$8 sps:$4 sm:$0xff]  }
 0x3db   : > { %v1278_v12 = vrot.slane %v1264_v10, 6 }
 0x3dd   : > { %v1280_v13 = vadd.f32 %v1278_v12, %v1269_v11 }
 0x3df   : > { %v1283_v16 = vadd.f32 %v1282_v15, %v1280_v13 }
 0x3e1   : > { %v1284_v18 = vmul.f32 0.004, %v1283_v16 }
 0x3e3   : > { %v1285_v19 = vadd.f32 %v1284_v18, %v1276_v58 }
 0x3e5   : > { %vm1286_vm9 = vcmp.gt.f32.partialorder %v1285_v19, 0.1 }
 0x3e6   : > { %v3510_v21 = vsel %vm1286_vm9, 1.0, %v4759_v0 }
 0x3e7   : > { %1289 = vst [vmem:[#allocation2 + $0x7] sm:$0x1] %v3510_v21 }
 0x3ee   : > { %v1290_v22 = vld [vmem:[#allocation2] sm:$0xff] }
 0x3ef   : > { %v1307_v8 = vpack.c.bf16 %v1290_v22, %v1290_v22 }
 0x3f1   : > { %4169 = vmatmul.mubr.bf16.vlgmr.msra.gmra.mrb[8].mxu0 %v1307_v8 }
 0x3f2   : > { %1469 = vmatpush1.bf16.msra.mxu0 %v4532_v24  ;;  %1500 = vmatprep.mubr.bf16.mxu0 %v4763_v31 }
 0x3f3   : > { %1470 = vmatprep.subr.bf16.mxu0 %v4537_v28 }
 0x3f6   : > { %1471 = vmatpush1.bf16.msra.mxu0 %v4535_v25 }
 0x3f7   : > { %1472 = vmatprep.subr.bf16.mxu0 %v4540_v29 }
 0x3fa   : > { %1473 = vmatpush1.bf16.msra.mxu0 %v4538_v9 }
 0x3fb   : > { %1474 = vmatprep.subr.bf16.mxu0 %v4543_v14 }
 0x3fe   : > { %1475 = vmatpush1.bf16.msra.mxu0 %v4541_v30 }
 0x3ff   : > { %4172 = vmatprep.subr.bf16.mxu0 %v4759_v0 }
 0x4c4   : > { %v1397_v20 = vpop.f32.mrb[8].mxu0 }
 0x4c5   : > { %v5237_v32 = vadd.f32 %v3511_v17, %v1397_v20  ;;  %v4170_v23 = vpop.f32.mrb[9].mxu0 }
 0x4c6   : > { %v1400_v33 = vpop.f32.mrb[10].mxu0 }
 0x4c7   : > { %v1411_v34 = vpack.c.bf16 %v5237_v32, %v5237_v32  ;;  %v4171_v26 = vpop.f32.mrb[11].mxu0 }
 0x4c9   : > { %3528 = vmatmul.mubr.msk.bf16.vlgmr.msra.gmra.mrb[12].mxu0 %vm1464_vm10, %v1411_v34 }
 0x4ca   : > { %4174 = vmatprep.mubr.msk.bf16.mxu0 %vm4760_vm0, %v4759_v0 }
 0x59c   : > { %v1502_v38 = vpop.f32.mrb[12].mxu0 }
 0x59d   : > { %v1503_v39 = vadd.f32 %v1502_v38, %v1417_v37  ;;  %v1504_v40 = vpop.f32.mrb[13].mxu0 }
 0x59e   : > { %v1506_v42 = vpop.f32.mrb[14].mxu0  ;;  %v1505_v48 = vadd.f32 %v1504_v40, %v1421_v46 }
 0x59f   : > { %v1509_v43 = vpack.c.bf16 %v1503_v39, %v1503_v39  ;;  %v1507_v44 = vpop.f32.mrb[15].mxu0 }
 0x5a0   : > { %v5262_v52 = vpack.c.bf16 %v1505_v48, %v1505_v48 }
 0x5a1   : > { %1621 = vrot.lane.b32.xlu1 %v1509_v43, %s4764_s23  ;;  %1512 = vrot.lane.b32.xlu0 %v1509_v43, %s4765_s29 }
 0x5a2   : > { %v1579_v54 = vsel %vm566_vm1, %v5262_v52, 0 }
 0x5a5   : > { %1735 = vrot.lane.b32.xlu1 %v1509_v43, %s4766_s22  ;;  %1623 = vrot.lane.b32.xlu0 %v1509_v43, %s4767_s26 }
 0x5a9   : > { %1846 = vrot.lane.b32.xlu1 %v1509_v43, %s5718_s0  ;;  %1733 = vrot.lane.b32.xlu0 %v1509_v43, %s5720_s30 }
 0x5ad   : > { %1844 = vrot.lane.b32.xlu0 %v1509_v43, %s5716_s18 }
 0x613   : > { %v1513_v47 = vpop.permute.xlu0 %1512  ;;  %v1622_v50 = vpop.permute.xlu1 %1621 }
 0x614   : > { %v1519_v49 = vsel %vm1514_vm11, %v1513_v47, 0 }
 0x615   : > { %4173 = vmatpush3.bf16.xpose.msra.mxu0 %v1519_v49 }
 0x616   : > { %4178 = vmatprep.subr.bf16.mxu0 %v4759_v0 }
 0x617   : > { %v1624_v51 = vpop.permute.xlu0 %1623  ;;  %v1736_v41 = vpop.permute.xlu1 %1735 }
 0x618   : > { %v1629_v53 = vsel %vm1514_vm11, %v1624_v51, 0  ;;  %v1741_v55 = vsel %vm1514_vm11, %v1736_v41, 0 }
 0x619   : > { %4185 = vmatpush3.bf16.xpose.msra.mxu1 %v1629_v53 }
 0x61a   : > { %4196 = vmatprep.subr.bf16.mxu1 %v4759_v0 }
 0x61b   : > { %v1847_v56 = vpop.permute.xlu1 %1846  ;;  %v1734_v57 = vpop.permute.xlu0 %1733 }
 0x61c   : > { %4175 = vmatmul.mubr.msk.bf16.vlgmr.msra.gmra.mrb[16].mxu0 %vm1514_vm11, %v1509_v43  ;;  %v1852_v58 = vsel %vm1514_vm11, %v1847_v56, 0 }
 0x61d   : > { %4179 = vmatpush3.bf16.msra.mxu0 %v1579_v54  ;;  %4180 = vmatprep.mubr.msk.bf16.mxu0 %vm4760_vm0, %v4759_v0 }
 0x61e   : > { %4190 = vmatprep.subr.bf16.mxu0 %v4759_v0 }
 0x61f   : > { %v1845_v59 = vpop.permute.xlu0 %1844 }
 0x620   : > { %4187 = vmatmul.mubr.msk.bf16.vlgmr.msra.gmra.mrb[8].mxu1 %vm1514_vm11, %v1622_v50 }
 0x621   : > { %4197 = vmatpush3.bf16.xpose.msra.mxu1 %v1741_v55  ;;  %4198 = vmatprep.mubr.msk.bf16.mxu1 %vm4760_vm0, %v4759_v0 }
 0x622   : > { %4208 = vmatprep.subr.bf16.mxu1 %v4759_v0 }
 0x628   : > { %4199 = vmatmul.mubr.msk.bf16.vlgmr.msra.gmra.mrb[12].mxu1 %vm1514_vm11, %v1734_v57 }
 0x629   : > { %4209 = vmatpush3.bf16.xpose.msra.mxu1 %v1852_v58  ;;  %4210 = vmatprep.mubr.msk.bf16.mxu1 %vm4760_vm0, %v4759_v0 }
 0x62a   : > { %4220 = vmatprep.subr.bf16.mxu1 %v4759_v0 }
 0x630   : > { %4211 = vmatmul.mubr.msk.bf16.vlgmr.msra.gmra.mrb[16].mxu1 %vm1514_vm11, %v1845_v59 }
 0x631   : > { %4228 = vmatprep.mubr.msk.bf16.mxu1 %vm4760_vm0, %v4759_v0 }
 0x6ef   : > { %v1555_v60 = vpop.f32.mrb[16].mxu0 }
 0x6f0   : > { %v1561_v61 = vmul.f32 0.25, %v1555_v60  ;;  %v4176_v62 = vpop.f32.mrb[17].mxu0 }
 0x6f1   : > { %v1558_v63 = vpop.f32.mrb[18].mxu0 }
 0x6f2   : > { %v4177_v2 = vpop.f32.mrb[19].mxu0  ;;  %v1563_v3 = vsel %vm1562_vm12, %v1561_v61, -inf }
 0x6f3   : > { %1564 = vmax.xlane.f32.xlu1 %v1563_v3  ;;  %v1665_v4 = vpop.f32.mrb[8].mxu1 }
 0x6f4   : > { %v1671_v5 = vmul.f32 0.25, %v1665_v4  ;;  %v4188_v6 = vpop.f32.mrb[9].mxu1 }
 0x6f5   : > { %v1668_v7 = vpop.f32.mrb[10].mxu1 }
 0x6f6   : > { %v4189_v10 = vpop.f32.mrb[11].mxu1  ;;  %v1672_v11 = vsel %vm1562_vm12, %v1671_v5, -inf }
 0x6f7   : > { %1673 = vmax.xlane.f32.xlu0 %v1672_v11  ;;  %v4544_v11 = vld [vmem:[#allocation3] sm:$0xff]  }
 0x6f8   : > { %4221 = vmatpush3.bf16.msra.mxu1 %v4544_v11  ;;  %v3543_v11 = vld [vmem:[%s5697_s9] ss:$0 sm:$0xff] }
 0x6f9   : > { %4222 = vmatprep.subr.bf16.mxu1 %v4759_v0 }
 0x6fb   : > { %v1777_v12 = vpop.f32.mrb[12].mxu1 }
 0x6fc   : > { %v1783_v13 = vmul.f32 0.25, %v1777_v12  ;;  %v4200_v15 = vpop.f32.mrb[13].mxu1  ;;  %v4545_v12 = vld [vmem:[#allocation3 + $0x8] sm:$0xff]  }
 0x6fd   : > { %v1780_v16 = vpop.f32.mrb[14].mxu1  ;;  %4223 = vmatpush3.bf16.msra.mxu1 %v4545_v12 }
 0x6fe   : > { %v4201_v18 = vpop.f32.mrb[15].mxu1  ;;  %v1784_v19 = vsel %vm1562_vm12, %v1783_v13, -inf  ;;  %4224 = vmatprep.subr.bf16.mxu1 %v4759_v0 }
 0x6ff   : > { %1785 = vmax.xlane.f32.xlu0 %v1784_v19  ;;  %v4546_v18 = vld [vmem:[#allocation3 + $0x10] sm:$0xff]  }
 0x701   : > { %4225 = vmatpush3.bf16.msra.mxu1 %v4546_v18 }
 0x702   : > { %4226 = vmatprep.subr.bf16.mxu1 %v4759_v0 }
 0x703   : > { %v1888_v21 = vpop.f32.mrb[16].mxu1 }
 0x704   : > { %v1894_v22 = vmul.f32 0.25, %v1888_v21  ;;  %v4212_v24 = vpop.f32.mrb[17].mxu1 }
 0x705   : > { %v1891_v8 = vpop.f32.mrb[18].mxu1 }
 0x706   : > { %v4213_v28 = vpop.f32.mrb[19].mxu1  ;;  %v1895_v25 = vsel %vm1562_vm12, %v1894_v22, -inf }
 0x707   : > { %1896 = vmax.xlane.f32.xlu1 %v1895_v25  ;;  %v4547_v28 = vld [vmem:[#allocation3 + $0x18] sm:$0xff]  }
 0x708   : > { %4227 = vmatpush3.bf16.msra.mxu1 %v4547_v28 }
 0x780   : > { %v1565_v29 = vpop.xlane.xlu1 %1564 }
 0x781   : > { %v1566_v9 = vsub.f32 %v1561_v61, %v1565_v29 }
 0x783   : > { %v1567_v14 = vmul.f32 1.442695, %v1566_v9 }
 0x784   : > { %v1674_v30 = vpop.xlane.xlu0 %1673 }
 0x785   : > { %4620 = vpow2.f32 %v1567_v14  ;;  %v1675_v17 = vsub.f32 %v1671_v5, %v1674_v30 }
 0x787   : > { %v1676_v20 = vmul.f32 1.442695, %v1675_v17 }
 0x789   : > { %4622 = vpow2.f32 %v1676_v20 }
 0x78c   : > { %v1786_v23 = vpop.xlane.xlu0 %1785 }
 0x78d   : > { %v1787_v33 = vsub.f32 %v1783_v13, %v1786_v23 }
 0x78f   : > { %v4621_v34 = vpop.eup %4620  ;;  %v1788_v26 = vmul.f32 1.442695, %v1787_v33 }
 0x790   : > { %v1569_v35 = vsel %vm1562_vm12, %v4621_v34, 0.0 }
 0x791   : > { %4624 = vpow2.f32 %v1788_v26  ;;  %1570 = vadd.xlane.f32.xlu0 %v1569_v35  ;;  %v3537_v35 = vld [vmem:[%s5696_s8] ss:$0 sm:$0xff] }
 0x793   : > { %v4623_v1 = vpop.eup %4622 }
 0x794   : > { %v1678_v27 = vsel %vm1562_vm12, %v4623_v1, 0.0  ;;  %v1897_v39 = vpop.xlane.xlu1 %1896 }
 0x795   : > { %1679 = vadd.xlane.f32.xlu1 %v1678_v27  ;;  %v1898_v40 = vsub.f32 %v1894_v22, %v1897_v39 }
 0x797   : > { %v1899_v42 = vmul.f32 1.442695, %v1898_v40 }
 0x799   : > { %4626 = vpow2.f32 %v1899_v42 }
 0x79b   : > { %v4625_v37 = vpop.eup %4624 }
 0x79c   : > { %v1790_v38 = vsel %vm1562_vm12, %v4625_v37, 0.0 }
 0x79d   : > { %1791 = vadd.xlane.f32.xlu0 %v1790_v38 }
 0x7a3   : > { %v4627_v43 = vpop.eup %4626 }
 0x7a4   : > { %v1901_v44 = vsel %vm1562_vm12, %v4627_v43, 0.0 }
 0x7a6   : > { %1796 = vrot.lane.b32.xlu1 %v5262_v52, %s5720_s30  ;;  %s5743_s30 = smov 16  }
 0x7b3   : > { %1685 = vrot.lane.b32.xlu0 %v5262_v52, %s4764_s23 }
 0x7ca   : > { %1902 = vadd.xlane.f32.xlu1 %v1901_v44 }
 0x7db   : > { %1907 = vrot.lane.b32.xlu1 %v5262_v52, %s5716_s18 }
 0x81e   : > { %v1571_v46 = vpop.xlane.xlu0 %1570 }
 0x81f   : > { %4628 = vrcp.f32 %v1571_v46 }
 0x822   : > { %v1680_v47 = vpop.xlane.xlu1 %1679 }
 0x823   : > { %4630 = vrcp.f32 %v1680_v47 }
 0x826   : > { %v1797_v52 = vpop.permute.xlu1 %1796 }
 0x827   : > { %v1802_v58 = vsel %vm566_vm1, %v1797_v52, 0  ;;  %v4560_v52 = vld [vmem:[%s5701_s13 + $0x40] sm:$0xff]  }
 0x828   : > { %3837 = vmatprep.subr.bf16.mxu1 %v4560_v52  ;;  %v4587_v52 = vld [vmem:[%s5693_s5 + $0x74] ss:$8 sps:$4 sm:$0xff]  }
 0x829   : > { %v4629_v48 = vpop.eup %4628 }
 0x82a   : > { %v1573_v49 = vmul.f32 %v4629_v48, %v4621_v34  ;;  %v1792_v50 = vpop.xlane.xlu0 %1791 }
 0x82b   : > { %4632 = vrcp.f32 %v1792_v50  ;;  %v4548_v50 = vld [vmem:[%s5699_s11] ss:$8 sps:$4 sm:$0xff]  }
 0x82c   : > { %v1574_v51 = vpack.c.bf16 %v1573_v49, %v1573_v49  ;;  %v4550_v49 = vld [vmem:[%s5699_s11 + $0x4] ss:$8 sps:$4 sm:$0xff]  }
 0x82d   : > { %v4631_v53 = vpop.eup %4630 }
 0x82e   : > { %4181 = vmatmul.mubr.msk.bf16.vlgmr.msra.gmra.mrb[20].mxu0 %vm1562_vm12, %v1574_v51  ;;  %v1686_v54 = vpop.permute.xlu0 %1685  ;;  %v1682_v55 = vmul.f32 %v4631_v53, %v4623_v1  ;;  %v4551_v51 = vld [vmem:[%s5699_s11 + $0x10] ss:$8 sps:$4 sm:$0xff]   ;;  %v4556_v53 = vld [vmem:[%s5699_s11 + $0x24] ss:$8 sps:$4 sm:$0xff]  }
 0x82f   : > { %v1691_v41 = vsel %vm566_vm1, %v1686_v54, 0  ;;  %4192 = vmatprep.mubr.msk.bf16.mxu0 %vm4760_vm0, %v4759_v0  ;;  %v4554_v54 = vld [vmem:[%s5699_s11 + $0x20] ss:$8 sps:$4 sm:$0xff]  }
 0x830   : > { %4191 = vmatpush3.bf16.msra.mxu0 %v1691_v41  ;;  %v1683_v56 = vpack.c.bf16 %v1682_v55, %v1682_v55  ;;  %v4557_v41 = vld [vmem:[%s5699_s11 + $0x30] ss:$8 sps:$4 sm:$0xff]   ;;  %v4559_v55 = vld [vmem:[%s5699_s11 + $0x34] ss:$8 sps:$4 sm:$0xff]  }
 0x831   : > { %4202 = vmatprep.subr.bf16.mxu0 %v4759_v0 }
 0x835   : > { %v4633_v57 = vpop.eup %4632 }
 0x836   : > { %4193 = vmatmul.mubr.msk.bf16.vlgmr.msra.gmra.mrb[24].mxu0 %vm1562_vm12, %v1683_v56  ;;  %v1794_v59 = vmul.f32 %v4633_v57, %v4625_v37  ;;  %v4561_v56 = vld [vmem:[%s5701_s13] sm:$0xff]   ;;  %v4562_v57 = vld [vmem:[%s5701_s13 + $0x48] sm:$0xff]  }
 0x837   : > { %4203 = vmatpush3.bf16.msra.mxu0 %v1802_v58  ;;  %4204 = vmatprep.mubr.msk.bf16.mxu0 %vm4760_vm0, %v4759_v0  ;;  %v4563_v58 = vld [vmem:[%s5701_s13 + $0x8] sm:$0xff]  }
 0x838   : > { %4214 = vmatprep.subr.bf16.mxu0 %v4759_v0  ;;  %v1795_v60 = vpack.c.bf16 %v1794_v59, %v1794_v59  ;;  %v4564_v59 = vld [vmem:[%s5701_s13 + $0x50] sm:$0xff]  }
 0x83e   : > { %4205 = vmatmul.mubr.msk.bf16.vlgmr.msra.gmra.mrb[28].mxu0 %vm1562_vm12, %v1795_v60  ;;  %v4565_v60 = vld [vmem:[%s5701_s13 + $0x10] sm:$0xff]  }
 0x83f   : > { %4216 = vmatprep.mubr.msk.bf16.mxu0 %vm4760_vm0, %v4759_v0 }
 0x857   : > { %v1903_v61 = vpop.xlane.xlu1 %1902 }
 0x858   : > { %4634 = vrcp.f32 %v1903_v61  ;;  %v4566_v61 = vld [vmem:[%s5701_s13 + $0x58] sm:$0xff]  }
 0x85b   : > { %v1908_v62 = vpop.permute.xlu1 %1907 }
 0x85c   : > { %v1913_v63 = vsel %vm566_vm1, %v1908_v62, 0  ;;  %v4567_v62 = vld [vmem:[%s5701_s13 + $0x18] sm:$0xff]  }
 0x85d   : > { %4215 = vmatpush3.bf16.msra.mxu0 %v1913_v63  ;;  %v4568_v63 = vld [vmem:[%s5701_s13 + $0x60] sm:$0xff]  }
 0x85e   : > { %2150 = vmatprep.subr.bf16.mxu0 %v4550_v49 }
 0x862   : > { %v4635_v2 = vpop.eup %4634 }
 0x863   : > { %v1905_v3 = vmul.f32 %v4635_v2, %v4627_v43  ;;  %v4569_v2 = vld [vmem:[%s5701_s13 + $0x20] sm:$0xff]  }
 0x865   : > { %v1906_v4 = vpack.c.bf16 %v1905_v3, %v1905_v3  ;;  %v4570_v3 = vld [vmem:[%s5701_s13 + $0x68] sm:$0xff]  }
 0x867   : > { %4217 = vmatmul.mubr.msk.bf16.vlgmr.msra.gmra.mrb[32].mxu0 %vm1562_vm12, %v1906_v4  ;;  %v4571_v4 = vld [vmem:[%s5701_s13 + $0x28] sm:$0xff]  }
 0x868   : > { %2182 = vmatprep.mubr.bf16.mxu0 %v4763_v31  ;;  %2151 = vmatpush1.bf16.msra.mxu0 %v4548_v50  ;;  %v4578_v50 = vld [vmem:[%s5693_s5 + $0x44] ss:$8 sps:$4 sm:$0xff]  }
 0x901   : > { %v1615_v5 = vpop.f32.mrb[20].mxu0 }
 0x902   : > { %v4182_v6 = vpop.f32.mrb[21].mxu0 }
 0x903   : > { %v1618_v7 = vpop.f32.mrb[22].mxu0 }
 0x904   : > { %v4183_v10 = vpop.f32.mrb[23].mxu0 }
 0x909   : > { %v1727_v13 = vpop.f32.mrb[24].mxu0 }
 0x90a   : > { %1956 = vrot.lane.b32.xlu0 %v1727_v13, %s5718_s0  ;;  %v4194_v15 = vpop.f32.mrb[25].mxu0  ;;  %v3544_v13 = vld [vmem:[%s5698_s10] ss:$0 sm:$0xff]  ;;  %s5742_s0 = smov 96  }
 0x90b   : > { %v1730_v16 = vpop.f32.mrb[26].mxu0 }
 0x90c   : > { %v4195_v19 = vpop.f32.mrb[27].mxu0 }
 0x90d   : > { %v4572_v19 = vld [vmem:[%s5701_s13 + $0x70] sm:$0xff]  }
 0x911   : > { %v1838_v21 = vpop.f32.mrb[28].mxu0 }
 0x912   : > { %1960 = vrot.lane.b32.xlu1 %v1838_v21, %s4766_s22  ;;  %v4206_v22 = vpop.f32.mrb[29].mxu0  ;;  %v4573_v21 = vld [vmem:[%s5701_s13 + $0x30] sm:$0xff]  }
 0x913   : > { %v1841_v24 = vpop.f32.mrb[30].mxu0  ;;  %v4574_v22 = vld [vmem:[%s5701_s13 + $0x78] sm:$0xff]  }
 0x914   : > { %v4207_v8 = vpop.f32.mrb[31].mxu0  ;;  %v4575_v24 = vld [vmem:[%s5701_s13 + $0x38] sm:$0xff]  }
 0x915   : > { %v2095_v8 = vld [vmem:[%s5700_s12] sm:$0x3] }
 0x916   : > { %v2100_v28 = vrot.slane %v2095_v8, %v5244_v36 }
 0x93a   : > { %v1949_v25 = vpop.f32.mrb[32].mxu0 }
 0x93b   : > { %1964 = vrot.lane.b32.xlu0 %v1949_v25, %s4767_s26  ;;  %v4218_v29 = vpop.f32.mrb[33].mxu0  ;;  %v2104_v25 = vrot.slane %v2095_v8, %v5257_v45 }
 0x93c   : > { %v1952_v9 = vpop.f32.mrb[34].mxu0 }
 0x93d   : > { %v4219_v14 = vpop.f32.mrb[35].mxu0 }
 0x97c   : > { %v1957_v30 = vpop.permute.xlu0 %1956 }
 0x97d   : > { %v1967_v20 = vsel %vm1514_vm11, %v1615_v5, %v1957_v30 }
 0x984   : > { %v1961_v17 = vpop.permute.xlu1 %1960 }
 0x985   : > { %v1969_v23 = vsel %vm1968_vm13, %v1967_v20, %v1961_v17 }
 0x9ad   : > { %v1965_v33 = vpop.permute.xlu0 %1964 }
 0x9ae   : > { %v1971_v34 = vsel %vm1970_vm14, %v1969_v23, %v1965_v33 }
 0x9af   : > { %v1980_v26 = vpack.c.bf16 %v1971_v34, %v1971_v34 }
 0x9b1   : > { %4229 = vmatmul.mubr.msk.bf16.vlgmr.msra.gmra.mrb[20].mxu1 %vm1464_vm10, %v1980_v26 }
 0x9b2   : > { %3838 = vmatpush3.bf16.msra.mxu1 %v4561_v56 }
 0x9b3   : > { %3839 = vmatprep.subr.bf16.mxu1 %v4562_v57 }
 0x9b6   : > { %3840 = vmatpush3.bf16.msra.mxu1 %v4563_v58 }
 0x9b7   : > { %3841 = vmatprep.subr.bf16.mxu1 %v4564_v59 }
 0x9ba   : > { %3842 = vmatpush3.bf16.msra.mxu1 %v4565_v60  ;;  %v3571_v60 = vld [vmem:[%s5703_s15] ss:$0 sm:$0xff] }
 0x9bb   : > { %3843 = vmatprep.subr.bf16.mxu1 %v4566_v61 }
 0x9be   : > { %3844 = vmatpush3.bf16.msra.mxu1 %v4567_v62  ;;  %v3572_v62 = vld [vmem:[%s5704_s16] ss:$0 sm:$0xff] }
 0x9bf   : > { %3845 = vmatprep.subr.bf16.mxu1 %v4568_v63 }
 0x9c2   : > { %3846 = vmatpush3.bf16.msra.mxu1 %v4569_v2 }
 0x9c3   : > { %3847 = vmatprep.subr.bf16.mxu1 %v4570_v3 }
 0x9c6   : > { %3848 = vmatpush3.bf16.msra.mxu1 %v4571_v4  ;;  %v3581_v4 = vld [vmem:[%s5694_s6 + $0x2] sm:$0x3] }
 0x9c7   : > { %3849 = vmatprep.subr.bf16.mxu1 %v4572_v19 }
 0x9ca   : > { %3850 = vmatpush3.bf16.msra.mxu1 %v4573_v21 }
 0x9cb   : > { %3851 = vmatprep.subr.bf16.mxu1 %v4574_v22 }
 0x9ce   : > { %3852 = vmatpush3.bf16.msra.mxu1 %v4575_v24 }
 0x9cf   : > { %4244 = vmatprep.subr.bf16.mxu1 %v4759_v0 }
 0xa84   : > { %v2049_v1 = vpop.f32.mrb[20].mxu1 }
 0xa85   : > { %v2050_v27 = vadd.f32 %v3537_v35, %v2049_v1  ;;  %v4230_v37 = vpop.f32.mrb[21].mxu1  ;;  %v3554_v1 = vld [vmem:[%s5702_s14] ss:$0 sm:$0xff] }
 0xa86   : > { %v2052_v38 = vpop.f32.mrb[22].mxu1 }
 0xa87   : > { %v4231_v39 = vpop.f32.mrb[23].mxu1  ;;  %v2055_v40 = vadd.f32 %v2050_v27, %v5237_v32  ;;  %v4553_v32 = vld [vmem:[%s5699_s11 + $0x14] ss:$8 sps:$4 sm:$0xff]  }
 0xa88   : > { %2152 = vmatprep.subr.bf16.mxu0 %v4553_v32  ;;  %v4576_v32 = vld [vmem:[%s5693_s5 + $0x40] ss:$8 sps:$4 sm:$0xff]  }
 0xa89   : > { %v2058_v42 = vsel %vm1464_vm10, %v2055_v40, 0.0  ;;  %2153 = vmatpush1.bf16.msra.mxu0 %v4551_v51  ;;  %v4581_v51 = vld [vmem:[%s5693_s5 + $0x54] ss:$8 sps:$4 sm:$0xff]  }
 0xa8a   : > { %2059 = vadd.xlane.f32.xlu1 %v2058_v42  ;;  %2154 = vmatprep.subr.bf16.mxu0 %v4556_v53  ;;  %v4579_v53 = vld [vmem:[%s5693_s5 + $0x50] ss:$8 sps:$4 sm:$0xff]  }
 0xa8d   : > { %2155 = vmatpush1.bf16.msra.mxu0 %v4554_v54  ;;  %v4584_v54 = vld [vmem:[%s5693_s5 + $0x64] ss:$8 sps:$4 sm:$0xff]  }
 0xa8e   : > { %2156 = vmatprep.subr.bf16.mxu0 %v4559_v55  ;;  %v4585_v55 = vld [vmem:[%s5693_s5 + $0x70] ss:$8 sps:$4 sm:$0xff]  }
 0xa91   : > { %2157 = vmatpush1.bf16.msra.mxu0 %v4557_v41  ;;  %v4582_v41 = vld [vmem:[%s5693_s5 + $0x60] ss:$8 sps:$4 sm:$0xff]  }
 0xa92   : > { %2466 = vmatprep.subr.bf16.mxu0 %v4578_v50 }
 0xb17   : > { %v2060_v43 = vpop.xlane.xlu1 %2059 }
 0xb18   : > { %v2062_v44 = vmul.f32 0.015625, %v2060_v43 }
 0xb1a   : > { %v2063_v46 = vsub.f32 %v2055_v40, %v2062_v44 }
 0xb1c   : > { %v2064_v47 = vmul.f32 %v2063_v46, %v2063_v46 }
 0xb1e   : > { %v2065_v48 = vsel %vm1464_vm10, %v2064_v47, 0.0 }
 0xb1f   : > { %2066 = vadd.xlane.f32.xlu0 %v2065_v48 }
 0xbac   : > { %v2067_v5 = vpop.xlane.xlu0 %2066 }
 0xbad   : > { %v2068_v6 = vmul.f32 0.015625, %v2067_v5  ;;  %v2416_v5 = vrot.slane %v3581_v4, %v5244_v36 }
 0xbaf   : > { %v2069_v7 = vadd.f32 1e-05, %v2068_v6 }
 0xbb1   : > { %4636 = vrsqrt.f32 %v2069_v7 }
 0xbbb   : > { %v4637_v10 = vpop.eup %4636 }
 0xbbc   : > { %v2071_v12 = vmul.f32 %v4637_v10, %v2063_v46 }
 0xbbe   : > { %v2078_v15 = vmul.f32 %v3543_v11, %v2071_v12 }
 0xbc0   : > { %v2085_v16 = vadd.f32 %v3544_v13, %v2078_v15  ;;  %v2420_v15 = vrot.slane %v3581_v4, %v5257_v45 }
 0xbc2   : > { %v2094_v18 = vpack.c.bf16 %v2085_v16, %v2085_v16 }
 0xbc4   : > { %3553 = vmatmul.mubr.msk.bf16.vlgmr.msra.gmra.mrb[36].mxu0 %vm1464_vm10, %v2094_v18 }
 0xbc5   : > { %2498 = vmatprep.mubr.bf16.mxu0 %v4763_v31  ;;  %2467 = vmatpush1.bf16.msra.mxu0 %v4576_v32 }
 0xbc6   : > { %2468 = vmatprep.subr.bf16.mxu0 %v4581_v51 }
 0xbc9   : > { %2469 = vmatpush1.bf16.msra.mxu0 %v4579_v53 }
 0xbca   : > { %2470 = vmatprep.subr.bf16.mxu0 %v4584_v54 }
 0xbcd   : > { %2471 = vmatpush1.bf16.msra.mxu0 %v4582_v41 }
 0xbce   : > { %2472 = vmatprep.subr.bf16.mxu0 %v4587_v52 }
 0xbd1   : > { %2473 = vmatpush1.bf16.msra.mxu0 %v4585_v55 }
 0xbd2   : > { %4232 = vmatprep.subr.bf16.mxu0 %v4759_v0 }
 0xc97   : > { %v2184_v29 = vpop.f32.mrb[36].mxu0 }
 0xc98   : > { %v2185_v9 = vadd.f32 %v2184_v29, %v2100_v28  ;;  %v2186_v14 = vpop.f32.mrb[37].mxu0 }
 0xc99   : > { %v2187_v30 = vadd.f32 %v2186_v14, %v2104_v25  ;;  %v2188_v17 = vpop.f32.mrb[38].mxu0 }
 0xc9a   : > { %v2191_v20 = vmax.f32 %v2185_v9, 0.0  ;;  %v2189_v23 = vpop.f32.mrb[39].mxu0 }
 0xc9b   : > { %v2192_v33 = vmax.f32 %v2187_v30, 0.0 }
 0xc9c   : > { %v2225_v26 = vpack.c.bf16 %v2191_v20, %v2191_v20 }
 0xc9d   : > { %v2226_v34 = vpack.c.bf16 %v2192_v33, %v2192_v33 }
 0xc9f   : > { %2362 = vmatprep.mubr.bf16.mxu1 %v2226_v34 }
 0xca0   : > { %2363 = vmatmul.mubr.bf16.vlgmr.msra.gmra.mrb[24].mxu1 %v2225_v26 }
 0xca1   : > { %4246 = vmatprep.mubr.msk.bf16.mxu1 %vm4760_vm0, %v4759_v0 }
 0xd73   : > { %v3853_v35 = vpop.f32.mrb[24].mxu1 }
 0xd74   : > { %v3854_v27 = vpop.f32.mrb[25].mxu1 }
 0xd75   : > { %v3855_v37 = vadd.f32 %v3854_v27, %v3853_v35  ;;  %v3856_v38 = vpop.f32.mrb[26].mxu1 }
 0xd76   : > { %v3857_v39 = vpop.f32.mrb[27].mxu1 }
 0xd77   : > { %v2365_v40 = vadd.f32 %v3855_v37, %v3554_v1 }
 0xd79   : > { %v2370_v42 = vadd.f32 %v2365_v40, %v2085_v16 }
 0xd7b   : > { %v2373_v43 = vsel %vm1464_vm10, %v2370_v42, 0.0 }
 0xd7c   : > { %2374 = vadd.xlane.f32.xlu0 %v2373_v43 }
 0xe09   : > { %v2375_v44 = vpop.xlane.xlu0 %2374 }
 0xe0a   : > { %v2376_v46 = vmul.f32 0.015625, %v2375_v44 }
 0xe0c   : > { %v2377_v47 = vsub.f32 %v2370_v42, %v2376_v46 }
 0xe0e   : > { %v2378_v48 = vmul.f32 %v2377_v47, %v2377_v47 }
 0xe10   : > { %v2379_v49 = vsel %vm1464_vm10, %v2378_v48, 0.0 }
 0xe11   : > { %2380 = vadd.xlane.f32.xlu1 %v2379_v49 }
 0xe9e   : > { %v2381_v56 = vpop.xlane.xlu1 %2380 }
 0xe9f   : > { %v2382_v57 = vmul.f32 0.015625, %v2381_v56 }
 0xea1   : > { %v2383_v58 = vadd.f32 1e-05, %v2382_v57 }
 0xea3   : > { %4638 = vrsqrt.f32 %v2383_v58 }
 0xead   : > { %v4639_v59 = vpop.eup %4638 }
 0xeae   : > { %v2385_v61 = vmul.f32 %v4639_v59, %v2377_v47 }
 0xeb0   : > { %v2392_v63 = vmul.f32 %v3571_v60, %v2385_v61 }
 0xeb2   : > { %v5455_v2 = vadd.f32 %v3572_v62, %v2392_v63 }
 0xeb4   : > { %v2409_v3 = vpack.c.bf16 %v5455_v2, %v5455_v2 }
 0xeb6   : > { %3590 = vmatmul.mubr.msk.bf16.vlgmr.msra.gmra.mrb[40].mxu0 %vm1464_vm10, %v2409_v3 }
 0xeb7   : > { %4234 = vmatprep.mubr.msk.bf16.mxu0 %vm4760_vm0, %v4759_v0 }
 0xf89   : > { %v2500_v6 = vpop.f32.mrb[40].mxu0 }
 0xf8a   : > { %v2501_v7 = vadd.f32 %v2500_v6, %v2416_v5  ;;  %v2502_v10 = vpop.f32.mrb[41].mxu0 }
 0xf8b   : > { %v2504_v11 = vpop.f32.mrb[42].mxu0  ;;  %v2503_v19 = vadd.f32 %v2502_v10, %v2420_v15 }
 0xf8c   : > { %v2507_v12 = vpack.c.bf16 %v2501_v7, %v2501_v7  ;;  %v2505_v13 = vpop.f32.mrb[43].mxu0 }
 0xf8d   : > { %v5478_v24 = vpack.c.bf16 %v2503_v19, %v2503_v19 }
 0xf8e   : > { %2619 = vrot.lane.b32.xlu1 %v2507_v12, %s4767_s26  ;;  %2510 = vrot.lane.b32.xlu0 %v2507_v12, %s4765_s29 }
 0xf8f   : > { %v2575_v29 = vsel %vm566_vm1, %v5478_v24, 0 }
 0xf92   : > { %2617 = vrot.lane.b32.xlu1 %v2507_v12, %s4764_s23  ;;  %2731 = vrot.lane.b32.xlu0 %v2507_v12, %s4766_s22 }
 0xf96   : > { %2729 = vrot.lane.b32.xlu1 %v2507_v12, %s5742_s0  ;;  %2842 = vrot.lane.b32.xlu0 %v2507_v12, %s5743_s30 }
 0xf9a   : > { %2840 = vrot.lane.b32.xlu1 %v2507_v12, %s5744_s20 }
0x1000   : > { %v2620_v16 = vpop.permute.xlu1 %2619  ;;  %v2511_v18 = vpop.permute.xlu0 %2510 }
0x1001   : > { %v2625_v21 = vsel %vm1514_vm11, %v2620_v16, 0  ;;  %v2516_v22 = vsel %vm1514_vm11, %v2511_v18, 0 }
0x1002   : > { %4233 = vmatpush3.bf16.xpose.msra.mxu0 %v2516_v22  ;;  %4245 = vmatpush3.bf16.xpose.msra.mxu1 %v2625_v21 }
0x1003   : > { %4238 = vmatprep.subr.bf16.mxu0 %v4759_v0  ;;  %4256 = vmatprep.subr.bf16.mxu1 %v4759_v0 }
0x1004   : > { %v2732_v8 = vpop.permute.xlu0 %2731  ;;  %v2618_v28 = vpop.permute.xlu1 %2617 }
0x1005   : > { %v2737_v25 = vsel %vm1514_vm11, %v2732_v8, 0 }
0x1008   : > { %v2843_v9 = vpop.permute.xlu0 %2842  ;;  %v2730_v14 = vpop.permute.xlu1 %2729 }
0x1009   : > { %4235 = vmatmul.mubr.msk.bf16.vlgmr.msra.gmra.mrb[44].mxu0 %vm1514_vm11, %v2507_v12  ;;  %4247 = vmatmul.mubr.msk.bf16.vlgmr.msra.gmra.mrb[28].mxu1 %vm1514_vm11, %v2618_v28  ;;  %v2848_v30 = vsel %vm1514_vm11, %v2843_v9, 0 }
0x100a   : > { %4239 = vmatpush3.bf16.msra.mxu0 %v2575_v29  ;;  %4257 = vmatpush3.bf16.xpose.msra.mxu1 %v2737_v25 }
0x100b   : > { %4258 = vmatprep.mubr.msk.bf16.mxu1 %vm4760_vm0, %v4759_v0  ;;  %4268 = vmatprep.subr.bf16.mxu1 %v4759_v0 }
0x100c   : > { %4240 = vmatprep.mubr.msk.bf16.mxu0 %vm4760_vm0, %v4759_v0  ;;  %4250 = vmatprep.subr.bf16.mxu0 %v4759_v0  ;;  %v2841_v17 = vpop.permute.xlu1 %2840 }
0x1011   : > { %4259 = vmatmul.mubr.msk.bf16.vlgmr.msra.gmra.mrb[32].mxu1 %vm1514_vm11, %v2730_v14 }
0x1012   : > { %4269 = vmatpush3.bf16.xpose.msra.mxu1 %v2848_v30  ;;  %4270 = vmatprep.mubr.msk.bf16.mxu1 %vm4760_vm0, %v4759_v0 }
0x1013   : > { %4280 = vmatprep.subr.bf16.mxu1 %v4759_v0 }
0x1019   : > { %4271 = vmatmul.mubr.msk.bf16.vlgmr.msra.gmra.mrb[36].mxu1 %vm1514_vm11, %v2841_v17 }
0x101a   : > { %4288 = vmatprep.mubr.msk.bf16.mxu1 %vm4760_vm0, %v4759_v0 }
0x10dc   : > { %v2552_v20 = vpop.f32.mrb[44].mxu0  ;;  %v2661_v23 = vpop.f32.mrb[28].mxu1 }
0x10dd   : > { %v2558_v33 = vmul.f32 0.25, %v2552_v20  ;;  %v2667_v34 = vmul.f32 0.25, %v2661_v23  ;;  %v4236_v26 = vpop.f32.mrb[45].mxu0  ;;  %v4248_v35 = vpop.f32.mrb[29].mxu1 }
0x10de   : > { %v2555_v1 = vpop.f32.mrb[46].mxu0  ;;  %v2664_v27 = vpop.f32.mrb[30].mxu1 }
0x10df   : > { %v4237_v37 = vpop.f32.mrb[47].mxu0  ;;  %v4249_v38 = vpop.f32.mrb[31].mxu1  ;;  %v2668_v39 = vsel %vm1562_vm12, %v2667_v34, -inf  ;;  %v2559_v40 = vsel %vm1562_vm12, %v2558_v33, -inf  ;;  %v4588_v27 = vld [vmem:[#allocation3 + $0x20] sm:$0xff]  }
0x10e0   : > { %2669 = vmax.xlane.f32.xlu1 %v2668_v39  ;;  %2560 = vmax.xlane.f32.xlu0 %v2559_v40 }
0x10e1   : > { %4281 = vmatpush3.bf16.msra.mxu1 %v4588_v27 }
0x10e2   : > { %4282 = vmatprep.subr.bf16.mxu1 %v4759_v0 }
0x10e4   : > { %v2773_v42 = vpop.f32.mrb[32].mxu1 }
0x10e5   : > { %v2779_v43 = vmul.f32 0.25, %v2773_v42  ;;  %v4260_v44 = vpop.f32.mrb[33].mxu1 }
0x10e6   : > { %v2776_v46 = vpop.f32.mrb[34].mxu1 }
0x10e7   : > { %v4261_v47 = vpop.f32.mrb[35].mxu1  ;;  %v2780_v48 = vsel %vm1562_vm12, %v2779_v43, -inf }
0x10e8   : > { %2781 = vmax.xlane.f32.xlu0 %v2780_v48  ;;  %v4589_v47 = vld [vmem:[#allocation3 + $0x28] sm:$0xff]   ;;  %v4590_v48 = vld [vmem:[#allocation3 + $0x30] sm:$0xff]  }
0x10e9   : > { %4283 = vmatpush3.bf16.msra.mxu1 %v4589_v47  ;;  %v4617_v47 = vld [vmem:[%s5701_s13 + $0xb0] sm:$0xff]  }
0x10ea   : > { %4284 = vmatprep.subr.bf16.mxu1 %v4759_v0 }
0x10ec   : > { %v2884_v49 = vpop.f32.mrb[36].mxu1 }
0x10ed   : > { %v2890_v50 = vmul.f32 0.25, %v2884_v49  ;;  %v4272_v32 = vpop.f32.mrb[37].mxu1  ;;  %4285 = vmatpush3.bf16.msra.mxu1 %v4590_v48  ;;  %v4618_v48 = vld [vmem:[%s5701_s13 + $0xf8] sm:$0xff]  }
0x10ee   : > { %v2887_v51 = vpop.f32.mrb[38].mxu1  ;;  %4286 = vmatprep.subr.bf16.mxu1 %v4759_v0 }
0x10ef   : > { %v4273_v53 = vpop.f32.mrb[39].mxu1  ;;  %v2891_v54 = vsel %vm1562_vm12, %v2890_v50, -inf }
0x10f0   : > { %2892 = vmax.xlane.f32.xlu0 %v2891_v54 }
0x116d   : > { %v2670_v41 = vpop.xlane.xlu1 %2669  ;;  %v2561_v55 = vpop.xlane.xlu0 %2560 }
0x116e   : > { %v2671_v52 = vsub.f32 %v2667_v34, %v2670_v41  ;;  %v2562_v56 = vsub.f32 %v2558_v33, %v2561_v55 }
0x1170   : > { %v2672_v57 = vmul.f32 1.442695, %v2671_v52  ;;  %v2563_v58 = vmul.f32 1.442695, %v2562_v56 }
0x1172   : > { %4640 = vpow2.f32 %v2672_v57 }
0x1173   : > { %4642 = vpow2.f32 %v2563_v58 }
0x1175   : > { %v2782_v59 = vpop.xlane.xlu0 %2781 }
0x1176   : > { %v2783_v10 = vsub.f32 %v2779_v43, %v2782_v59 }
0x1178   : > { %v2784_v11 = vmul.f32 1.442695, %v2783_v10 }
0x117c   : > { %v4641_v60 = vpop.eup %4640 }
0x117d   : > { %v4643_v61 = vpop.eup %4642  ;;  %v2893_v62 = vpop.xlane.xlu0 %2892  ;;  %v2674_v63 = vsel %vm1562_vm12, %v4641_v60, 0.0 }
0x117e   : > { %v2894_v3 = vsub.f32 %v2890_v50, %v2893_v62  ;;  %2675 = vadd.xlane.f32.xlu0 %v2674_v63  ;;  %v2565_v4 = vsel %vm1562_vm12, %v4643_v61, 0.0 }
0x117f   : > { %2566 = vadd.xlane.f32.xlu1 %v2565_v4 }
0x1180   : > { %v2895_v5 = vmul.f32 1.442695, %v2894_v3 }
0x1182   : > { %4644 = vpow2.f32 %v2895_v5 }
0x1183   : > { %4646 = vpow2.f32 %v2784_v11 }
0x118c   : > { %v4645_v6 = vpop.eup %4644 }
0x118d   : > { %v2897_v7 = vsel %vm1562_vm12, %v4645_v6, 0.0  ;;  %v4647_v12 = vpop.eup %4646 }
0x118e   : > { %2898 = vadd.xlane.f32.xlu0 %v2897_v7  ;;  %v2786_v13 = vsel %vm1562_vm12, %v4647_v12, 0.0 }
0x1190   : > { %2681 = vrot.lane.b32.xlu1 %v5478_v24, %s4764_s23 }
0x11a4   : > { %2792 = vrot.lane.b32.xlu0 %v5478_v24, %s5742_s0 }
0x11b4   : > { %2787 = vadd.xlane.f32.xlu1 %v2786_v13 }
0x11c5   : > { %2903 = vrot.lane.b32.xlu1 %v5478_v24, %s5744_s20  ;;  %s5745_s20 = sld [smem:[#allocation18_spill]] }
0x11cb   : > { %s5645_s23 = scalar_lea.hbm %s5745_s20, %s3683_s24 }
0x120b   : > { %v2676_v16 = vpop.xlane.xlu0 %2675 }
0x120c   : > { %v2567_v15 = vpop.xlane.xlu1 %2566 }
0x120d   : > { %4648 = vrcp.f32 %v2567_v15 }
0x120e   : > { %4650 = vrcp.f32 %v2676_v16  ;;  %v4594_v16 = vld [vmem:[%s5699_s11 + $0x44] ss:$8 sps:$4 sm:$0xff]  }
0x1210   : > { %v2682_v21 = vpop.permute.xlu1 %2681 }
0x1211   : > { %v2687_v25 = vsel %vm566_vm1, %v2682_v21, 0  ;;  %v4600_v21 = vld [vmem:[%s5699_s11 + $0x64] ss:$8 sps:$4 sm:$0xff]  }
0x1217   : > { %v4649_v18 = vpop.eup %4648 }
0x1218   : > { %v2569_v19 = vmul.f32 %v4649_v18, %v4643_v61  ;;  %v4651_v8 = vpop.eup %4650  ;;  %v3600_v61 = vld [vmem:[%s5696_s8 + $0x1] ss:$0 sm:$0xff] }
0x1219   : > { %v2678_v29 = vmul.f32 %v4651_v8, %v4641_v60  ;;  %v4592_v18 = vld [vmem:[%s5699_s11 + $0x40] ss:$8 sps:$4 sm:$0xff]   ;;  %v4601_v8 = vld [vmem:[%s5699_s11 + $0x70] ss:$8 sps:$4 sm:$0xff]  }
0x121a   : > { %v2570_v22 = vpack.c.bf16 %v2569_v19, %v2569_v19  ;;  %v4595_v19 = vld [vmem:[%s5699_s11 + $0x50] ss:$8 sps:$4 sm:$0xff]  }
0x121b   : > { %v2899_v28 = vpop.xlane.xlu0 %2898  ;;  %v2679_v9 = vpack.c.bf16 %v2678_v29, %v2678_v29  ;;  %v4605_v29 = vld [vmem:[%s5701_s13 + $0x80] sm:$0xff]  }
0x121c   : > { %4241 = vmatmul.mubr.msk.bf16.vlgmr.msra.gmra.mrb[48].mxu0 %vm1562_vm12, %v2570_v22  ;;  %v4598_v22 = vld [vmem:[%s5699_s11 + $0x60] ss:$8 sps:$4 sm:$0xff]  }
0x121d   : > { %4251 = vmatpush3.bf16.msra.mxu0 %v2687_v25  ;;  %4252 = vmatprep.mubr.msk.bf16.mxu0 %vm4760_vm0, %v4759_v0  ;;  %v4604_v25 = vld [vmem:[%s5701_s13 + $0xc0] sm:$0xff]  }
0x121e   : > { %4262 = vmatprep.subr.bf16.mxu0 %v4759_v0 }
0x121f   : > { %v2793_v24 = vpop.permute.xlu0 %2792 }
0x1220   : > { %v2798_v14 = vsel %vm566_vm1, %v2793_v24, 0  ;;  %v4606_v24 = vld [vmem:[%s5701_s13 + $0xc8] sm:$0xff]  }
0x1224   : > { %4253 = vmatmul.mubr.msk.bf16.vlgmr.msra.gmra.mrb[52].mxu0 %vm1562_vm12, %v2679_v9  ;;  %v4607_v9 = vld [vmem:[%s5701_s13 + $0x88] sm:$0xff]  }
0x1225   : > { %4263 = vmatpush3.bf16.msra.mxu0 %v2798_v14  ;;  %4264 = vmatprep.mubr.msk.bf16.mxu0 %vm4760_vm0, %v4759_v0  ;;  %v4608_v14 = vld [vmem:[%s5701_s13 + $0xd0] sm:$0xff]  }
0x1226   : > { %4274 = vmatprep.subr.bf16.mxu0 %v4759_v0 }
0x1241   : > { %v2788_v30 = vpop.xlane.xlu1 %2787 }
0x1242   : > { %4652 = vrcp.f32 %v2788_v30  ;;  %v4609_v30 = vld [vmem:[%s5701_s13 + $0x90] sm:$0xff]  }
0x1243   : > { %4654 = vrcp.f32 %v2899_v28  ;;  %v4603_v28 = vld [vmem:[%s5699_s11 + $0x74] ss:$8 sps:$4 sm:$0xff]  }
0x1245   : > { %v2904_v23 = vpop.permute.xlu1 %2903 }
0x1246   : > { %v2909_v26 = vsel %vm566_vm1, %v2904_v23, 0  ;;  %v4612_v23 = vld [vmem:[%s5701_s13 + $0xe0] sm:$0xff]  }
0x124c   : > { %v4653_v17 = vpop.eup %4652 }
0x124d   : > { %v2790_v20 = vmul.f32 %v4653_v17, %v4647_v12  ;;  %v4655_v34 = vpop.eup %4654  ;;  %v4610_v17 = vld [vmem:[%s5701_s13 + $0xd8] sm:$0xff]  }
0x124e   : > { %v2901_v35 = vmul.f32 %v4655_v34, %v4645_v6  ;;  %v4614_v34 = vld [vmem:[%s5701_s13 + $0xe8] sm:$0xff]  }
0x124f   : > { %v2791_v33 = vpack.c.bf16 %v2790_v20, %v2790_v20  ;;  %v4611_v20 = vld [vmem:[%s5701_s13 + $0x98] sm:$0xff]  }
0x1250   : > { %v2902_v1 = vpack.c.bf16 %v2901_v35, %v2901_v35 }
0x1251   : > { %4265 = vmatmul.mubr.msk.bf16.vlgmr.msra.gmra.mrb[56].mxu0 %vm1562_vm12, %v2791_v33  ;;  %v4613_v33 = vld [vmem:[%s5701_s13 + $0xa0] sm:$0xff]  }
0x1252   : > { %4275 = vmatpush3.bf16.msra.mxu0 %v2909_v26  ;;  %4276 = vmatprep.mubr.msk.bf16.mxu0 %vm4760_vm0, %v4759_v0  ;;  %v4615_v26 = vld [vmem:[%s5701_s13 + $0xa8] sm:$0xff]  }
0x1253   : > { %3149 = vmatprep.subr.bf16.mxu0 %v4594_v16 }
0x1259   : > { %4277 = vmatmul.mubr.msk.bf16.vlgmr.msra.gmra.mrb[60].mxu0 %vm1562_vm12, %v2902_v1 }
0x125a   : > { %3181 = vmatprep.mubr.bf16.mxu0 %v4763_v31  ;;  %v4591_v31 = vld [vmem:[#allocation3 + $0x38] sm:$0xff]   ;;  %3150 = vmatpush1.bf16.msra.mxu0 %v4592_v18 }
0x125b   : > { %4287 = vmatpush3.bf16.msra.mxu1 %v4591_v31  ;;  %v4619_v31 = vld [vmem:[%s5701_s13 + $0xb8] sm:$0xff]   ;;  %v3680_v18 = vld [vmem:[%s5703_s15 + $0x1] ss:$0 sm:$0xff] }
0x125c   : > { %3880 = vmatprep.subr.bf16.mxu1 %v4604_v25 }
0x12ef   : > { %v2611_v37 = vpop.f32.mrb[48].mxu0 }
0x12f0   : > { %v4242_v38 = vpop.f32.mrb[49].mxu0 }
0x12f1   : > { %v2614_v39 = vpop.f32.mrb[50].mxu0  ;;  %v3608_v38 = vld [vmem:[%s5697_s9 + $0x1] ss:$0 sm:$0xff] }
0x12f2   : > { %v4243_v40 = vpop.f32.mrb[51].mxu0 }
0x12f3   : > { %v3609_v40 = vld [vmem:[%s5698_s10 + $0x1] ss:$0 sm:$0xff] }
0x12f7   : > { %v2723_v42 = vpop.f32.mrb[52].mxu0 }
0x12f8   : > { %2952 = vrot.lane.b32.xlu1 %v2723_v42, %s5743_s30  ;;  %v4254_v43 = vpop.f32.mrb[53].mxu0 }
0x12f9   : > { %v2726_v44 = vpop.f32.mrb[54].mxu0 }
0x12fa   : > { %v4255_v46 = vpop.f32.mrb[55].mxu0 }
0x12fb   : > { %v4616_v46 = vld [vmem:[%s5701_s13 + $0xf0] sm:$0xff]  }
0x1324   : > { %v2834_v49 = vpop.f32.mrb[56].mxu0 }
0x1325   : > { %2956 = vrot.lane.b32.xlu0 %v2834_v49, %s4766_s22  ;;  %v4266_v50 = vpop.f32.mrb[57].mxu0  ;;  %v3618_v49 = vld [vmem:[%s5700_s12 + $0x2] sm:$0x3]  ;;  %s552_s22 = sand.u32 1, %s4746_s25  }
0x1326   : > { %v2837_v32 = vpop.f32.mrb[58].mxu0  ;;  %v3099_v50 = vrot.slane %v3618_v49, %v5244_v36  ;;  %s3405_s29 = scalar_lea.sflag [#allocation5], %s552_s22 }
0x1327   : > { %v4267_v51 = vpop.f32.mrb[59].mxu0  ;;  %v3103_v32 = vrot.slane %v3618_v49, %v5257_v45 }
0x132c   : > { %v2945_v53 = vpop.f32.mrb[60].mxu0 }
0x132d   : > { %2960 = vrot.lane.b32.xlu1 %v2945_v53, %s4767_s26  ;;  %v4278_v54 = vpop.f32.mrb[61].mxu0  ;;  %s3495_s26 = sshll.u32 %s552_s22, 3 }
0x132e   : > { %v2948_v41 = vpop.f32.mrb[62].mxu0  ;;  %s554_s18 = scalar_lea.vmem [#allocation6], %s3495_s26  ;;  %s4692_s26 = sshll.u32 %s4771_s28, 4  ;;  %s4693_s26 = int_to_ptr.vmem [resolvable:$false] %s4692_s26 }
0x132f   : > { %v4279_v55 = vpop.f32.mrb[63].mxu0  ;;  %s3418_s19 = sshll.u32 %s554_s18, 4  ;;  %s4694_s17 = scalar_lea.vmem %s4693_s26, 256  ;;  %s5647_s19 = int_to_ptr.vmem [resolvable:$true] %s3418_s19 }
0x1330   : > { %s4688_s7 = scalar_lea.vmem %s5647_s19, 128  ;;  %p4695_p2 = scmp.lt.s32.totalorder %s5647_s19, %s4693_s26 }
0x1331   : > { %p4689_p6 = scmp.ne.s32.totalorder %s5647_s19, %s4688_s7  ;;  %p4696_p3 = scmp.lt.s32.totalorder %s4694_s17, %s4688_s7 }
0x1333   : > { %p4690_p10 = pnand %p4689_p6, %p5746_p9  ;;  %p4697_p4 = por %p4696_p3, %p4695_p2 }
0x1335   : > { %p4691_p12 = pneg %p4690_p10 }
0x1337   : > { %p4698_p7 = pnand %p4697_p4, %p4691_p12 }
0x136a   : > { %v2953_v52 = vpop.permute.xlu1 %2952 }
0x136b   : > { %v2963_v57 = vsel %vm1514_vm11, %v2611_v37, %v2953_v52 }
0x1397   : > { %v2957_v56 = vpop.permute.xlu0 %2956 }
0x1398   : > { %v2964_v0 = vsel %vm1968_vm13, %v2963_v57, %v2957_v56 }
0x139f   : > { %v2961_v58 = vpop.permute.xlu1 %2960 }
0x13a0   : > { %v2965_v59 = vsel %vm1970_vm14, %v2964_v0, %v2961_v58 }
0x13a1   : > { %v2975_v60 = vpack.c.bf16 %v2965_v59, %v2965_v59 }
0x13a3   : > { %4289 = vmatmul.mubr.msk.bf16.vlgmr.msra.gmra.mrb[40].mxu1 %vm1464_vm10, %v2975_v60  ;;  %v3661_v60 = vld [vmem:[%s5702_s14 + $0x1] ss:$0 sm:$0xff] }
0x13a4   : > { %3881 = vmatpush3.bf16.msra.mxu1 %v4605_v29 }
0x13a5   : > { %3882 = vmatprep.subr.bf16.mxu1 %v4606_v24 }
0x13a8   : > { %3883 = vmatpush3.bf16.msra.mxu1 %v4607_v9 }
0x13a9   : > { %3884 = vmatprep.subr.bf16.mxu1 %v4608_v14 }
0x13ac   : > { %3885 = vmatpush3.bf16.msra.mxu1 %v4609_v30 }
0x13ad   : > { %3886 = vmatprep.subr.bf16.mxu1 %v4610_v17 }
0x13b0   : > { %3887 = vmatpush3.bf16.msra.mxu1 %v4611_v20 }
0x13b1   : > { %3888 = vmatprep.subr.bf16.mxu1 %v4612_v23 }
0x13b4   : > { %3889 = vmatpush3.bf16.msra.mxu1 %v4613_v33 }
0x13b5   : > { %3890 = vmatprep.subr.bf16.mxu1 %v4614_v34 }
0x13b8   : > { %3891 = vmatpush3.bf16.msra.mxu1 %v4615_v26 }
0x13b9   : > { %3892 = vmatprep.subr.bf16.mxu1 %v4616_v46 }
0x13bc   : > { %3893 = vmatpush3.bf16.msra.mxu1 %v4617_v47 }
0x13bd   : > { %3894 = vmatprep.subr.bf16.mxu1 %v4618_v48 }
0x13c0   : > { %3895 = vmatpush3.bf16.msra.mxu1 %v4619_v31 }
0x1476   : > { %v3045_v62 = vpop.f32.mrb[40].mxu1 }
0x1477   : > { %v3046_v63 = vadd.f32 %v3600_v61, %v3045_v62  ;;  %v4290_v3 = vpop.f32.mrb[41].mxu1 }
0x1478   : > { %v3048_v4 = vpop.f32.mrb[42].mxu1 }
0x1479   : > { %v4291_v5 = vpop.f32.mrb[43].mxu1  ;;  %v3051_v6 = vadd.f32 %v3046_v63, %v5455_v2  ;;  %v4597_v2 = vld [vmem:[%s5699_s11 + $0x54] ss:$8 sps:$4 sm:$0xff]  }
0x147a   : > { %3151 = vmatprep.subr.bf16.mxu0 %v4597_v2 }
0x147b   : > { %v3056_v7 = vsel %vm1464_vm10, %v3051_v6, 0.0  ;;  %3152 = vmatpush1.bf16.msra.mxu0 %v4595_v19  ;;  %v3681_v19 = vld [vmem:[%s5704_s16 + $0x1] ss:$0 sm:$0xff] }
0x147c   : > { %3057 = vadd.xlane.f32.xlu0 %v3056_v7  ;;  %3153 = vmatprep.subr.bf16.mxu0 %v4600_v21 }
0x147f   : > { %3154 = vmatpush1.bf16.msra.mxu0 %v4598_v22 }
0x1480   : > { %3155 = vmatprep.subr.bf16.mxu0 %v4603_v28 }
0x1483   : > { %3156 = vmatpush1.bf16.msra.mxu0 %v4601_v8 }
0x1509   : > { %v3058_v10 = vpop.xlane.xlu0 %3057 }
0x150a   : > { %v3059_v11 = vmul.f32 0.015625, %v3058_v10 }
0x150c   : > { %v3060_v12 = vsub.f32 %v3051_v6, %v3059_v11 }
0x150e   : > { %v3061_v13 = vmul.f32 %v3060_v12, %v3060_v12 }
0x1510   : > { %v3062_v15 = vsel %vm1464_vm10, %v3061_v13, 0.0 }
0x1511   : > { %3063 = vadd.xlane.f32.xlu1 %v3062_v15 }
0x159e   : > { %v3064_v35 = vpop.xlane.xlu1 %3063 }
0x159f   : > { %v3065_v1 = vmul.f32 0.015625, %v3064_v35 }
0x15a1   : > { %v3066_v27 = vadd.f32 1e-05, %v3065_v1 }
0x15a3   : > { %4656 = vrsqrt.f32 %v3066_v27 }
0x15ad   : > { %v4657_v37 = vpop.eup %4656 }
0x15ae   : > { %v3068_v39 = vmul.f32 %v4657_v37, %v3060_v12 }
0x15b0   : > { %v3075_v42 = vmul.f32 %v3608_v38, %v3068_v39 }
0x15b2   : > { %v3082_v43 = vadd.f32 %v3609_v40, %v3075_v42 }
0x15b4   : > { %v3092_v44 = vpack.c.bf16 %v3082_v43, %v3082_v43 }
0x15b6   : > { %3627 = vmatmul.mubr.msk.bf16.vlgmr.msra.gmra.mrb[64].mxu0 %vm1464_vm10, %v3092_v44 }
0x1689   : > { %v3183_v51 = vpop.f32.mrb[64].mxu0 }
0x168a   : > { %v3184_v53 = vadd.f32 %v3183_v51, %v3099_v50  ;;  %v3185_v54 = vpop.f32.mrb[65].mxu0 }
0x168b   : > { %v3186_v41 = vadd.f32 %v3185_v54, %v3103_v32  ;;  %v3187_v55 = vpop.f32.mrb[66].mxu0 }
0x168c   : > { %v3190_v52 = vmax.f32 %v3184_v53, 0.0  ;;  %v3188_v56 = vpop.f32.mrb[67].mxu0 }
0x168d   : > { %v3191_v57 = vmax.f32 %v3186_v41, 0.0 }
0x168e   : > { %v3225_v58 = vpack.c.bf16 %v3190_v52, %v3190_v52 }
0x168f   : > { %v3226_v0 = vpack.c.bf16 %v3191_v57, %v3191_v57 }
0x1691   : > { %3363 = vmatprep.mubr.bf16.mxu1 %v3226_v0 }
0x1692   : > { %3364 = vmatmul.mubr.bf16.vlgmr.msra.gmra.mrb[44].mxu1 %v3225_v58 }
0x1765   : > { %v3896_v59 = vpop.f32.mrb[44].mxu1 }
0x1766   : > { %v3897_v36 = vpop.f32.mrb[45].mxu1 }
0x1767   : > { %v3898_v61 = vadd.f32 %v3897_v36, %v3896_v59  ;;  %v3899_v45 = vpop.f32.mrb[46].mxu1 }
0x1768   : > { %v3900_v62 = vpop.f32.mrb[47].mxu1 }
0x1769   : > { %v3366_v63 = vadd.f32 %v3898_v61, %v3661_v60 }
0x176b   : > { %v3371_v3 = vadd.f32 %v3366_v63, %v3082_v43 }
0x176d   : > { %v3376_v4 = vsel %vm1464_vm10, %v3371_v3, 0.0 }
0x176e   : > { %3377 = vadd.xlane.f32.xlu0 %v3376_v4 }
0x17fb   : > { %v3378_v5 = vpop.xlane.xlu0 %3377 }
0x17fc   : > { %v3379_v6 = vmul.f32 0.015625, %v3378_v5 }
0x17fe   : > { %v3380_v7 = vsub.f32 %v3371_v3, %v3379_v6 }
0x1800   : > { %v3381_v10 = vmul.f32 %v3380_v7, %v3380_v7 }
0x1802   : > { %v3382_v11 = vsel %vm1464_vm10, %v3381_v10, 0.0 }
0x1803   : > { %3383 = vadd.xlane.f32.xlu0 %v3382_v11 }
0x1890   : > { %v3384_v12 = vpop.xlane.xlu0 %3383 }
0x1891   : > { %v3385_v13 = vmul.f32 0.015625, %v3384_v12 }
0x1893   : > { %v3386_v15 = vadd.f32 1e-05, %v3385_v13 }
0x1895   : > { %4658 = vrsqrt.f32 %v3386_v15 }
0x189f   : > { %v4659_v16 = vpop.eup %4658 }
0x18a0   : > { %v3388_v2 = vmul.f32 %v4659_v16, %v3380_v7 }
0x18a2   : > { %v3395_v21 = vmul.f32 %v3680_v18, %v3388_v2 }
0x18a4   : > { %v3402_v22 = vadd.f32 %v3681_v19, %v3395_v21 }
0x18a6   : > { %3403 = vst.msk [vmem:[%s554_s18] sm:$0xff] %vm1464_vm10, %v3402_v22 }
0x18a7   : > { %4701 = shalt.err (!%p4698_p7)
}
0x18a8   : > { %s4702_s22 = scalar_lea.hbm %s5645_s23, 128  ;;  %s4706_s24 = scalar_lea.hbm %s5745_s20, 256 }
0x18a9   : > { %p4703_p8 = scmp.ne.s32.totalorder %s5645_s23, %s4702_s22  ;;  %p4707_p1 = scmp.lt.u32.totalorder %s5645_s23, %s5745_s20 }
0x18aa   : > { %p4708_p0 = scmp.lt.u32.totalorder %s4706_s24, %s4702_s22  ;;  %p4710_p6 = scmp.lt.u32.totalorder %s4702_s22, %s5645_s23 }
0x18ab   : > { %p4704_p11 = pnand %p4703_p8, %p5746_p9 }
0x18ac   : > { %p4709_p5 = por %p4708_p0, %p4707_p1 }
0x18ad   : > { %p4705_p13 = pneg %p4704_p11 }
0x18ae   : > { %p4711_p10 = por %p4710_p6, %p4709_p5 }
0x18b0   : > { %p4712_p12 = pnand %p4711_p10, %p4705_p13 }
0x18b2   : > { %4715 = shalt.err (!%p4712_p12)
}
0x18b3   : > { %4464 = dma.vmem_to_hbm [thread:$0]  (%p5746_p9), %s5647_s19, 128, %s5645_s23, %s3405_s29  }
0x18b4 PF: > { %s5747_s30 = sld [smem:[#allocation11_spill]]  ;;  %s5748_s7 = sld [smem:[#allocation9_spill]] }
0x18b5   : > { %s5749_s28 = sld [smem:[#allocation14_spill]] }
0x18ba   : > { %p4476_p2 = scmp.ge.s32.totalorder %s5747_s30, 2  ;;  %s3430_s26 = sand.u32 1, %s5748_s7  }
0x18bb   : > { %p5750_p3 = scmp.ne.s32.totalorder %s5749_s28, 0  ;;  %s3431_s17 = scalar_lea.sflag [#allocation5], %s3430_s26 }
0x18bd   : > { %p4471_p4 = pnand %p4476_p2, %p5750_p3 }
0x18bf   : > { %4737 = dma.done.wait (!%p4471_p4), %s3431_s17, 128  }
0x18c0   : > { %4739 = vsyncadd (!%p4471_p4), %s3431_s17, 4294967168  ;;  %s5751_s27 = sld [smem:[#allocation12_spill]]  ;;  %s5752_s22 = sld [smem:[#allocation10_spill]] }
0x18c1   : > { %s5753_s26 = sld [smem:[#allocation13_spill]]  ;;  %s5754_s24 = smov %s4746_s25 }
0x18c6   : > { %p28_p7 = scmp.ge.s32.totalorder %s5751_s27, 4   ;;  %s5755_s25 = smov %s5752_s22 }
0x18c8   :  { %30 = sbr.rel (!%p28_p7) target bundleno = 9 (0x9), region = 140 }
0x18cf   :  { %3436 = vsyncpa [#allocation4], 1 }
0x18d0   :  { %3438 = vsyncpa [#allocation4 + $0x1], 1 }
0x18d1   :  { %3439 = vsyncpa [#allocation5], 1 }
0x18d2   :  { %3441 = vsyncpa [#allocation5 + $0x1], 1 }

</bundles_post_ra>
